<compile_context>
chip_gen: v5e
topology: v5e:2x2
jax: 0.10.0
libtpu: 0.0.40
codegen_flags: <defaults>
</compile_context>

<pallas_src>
import functools

import jax
import jax.numpy as jnp
from jax.experimental import pallas as pl
from jax.experimental.pallas import tpu as pltpu

# ----------------------------- configuration --------------------------------
DIM = 32
CONTEXT_DIM = 32
NUM_HEADS = 4
NUM_KV_HEADS = 2
HEAD_DIM = DIM // NUM_HEADS
NUM_EXPERTS = 4
TOP_K = 2                       # num_experts_per_tok
MOE_INTER = int(DIM * 4.0)      # moe_intermediate_size = dim * mlp_ratio
NORM_EPS = 1e-6
LAYER_SCALE_INIT = 1e-5
NORM_TOPK_PROB = False

DQ = NUM_HEADS * HEAD_DIM       # 32
DKV = NUM_KV_HEADS * HEAD_DIM   # 16


# ------------------------------ Pallas kernels -------------------------------
def _rmsnorm(x, w, eps):
    ms = jnp.mean(x * x, axis=-1, keepdims=True)
    return x * jax.lax.rsqrt(ms + eps) * w


def sa_qkv_kernel(h_ref, lnw_ref, w_ref, cq_ref, sq_ref, ck_ref, sk_ref,
                  q_ref, kv_ref, *, eps, dq, dkv):
    # fused: RMSNorm -> one [D, 2*dq+3*dkv] matmul -> RoPE (rotate folded in W)
    x = h_ref[...]                                            # (S, D) f32
    xn = _rmsnorm(x, lnw_ref[...], eps)
    proj = jnp.dot(xn.astype(jnp.bfloat16), w_ref[...],
                   preferred_element_type=jnp.float32)        # (S, 2dq+3dkv)
    q = proj[:, :dq]
    q_rot = proj[:, dq:2 * dq]
    k = proj[:, 2 * dq:2 * dq + dkv]
    k_rot = proj[:, 2 * dq + dkv:2 * dq + 2 * dkv]
    v = proj[:, 2 * dq + 2 * dkv:2 * dq + 3 * dkv]
    q_ref[...] = q * cq_ref[...] + q_rot * sq_ref[...]
    kv_ref[:, :dkv] = k * ck_ref[...] + k_rot * sk_ref[...]
    kv_ref[:, dkv:] = v


def ca_proj_kernel(h_ref, lnw_ref, wq_ref, ctx_ref, wkv_ref, q_ref, kv_ref, *, eps):
    # fused: RMSNorm(h) -> Q proj; context -> [K|V] proj
    # TODO(synk): DecoderCrossAttention's internal q/k norm (norm_layer/norm_eps
    # args) source is unavailable; standard GQA cross-attention implemented.
    x = h_ref[...]
    xn = _rmsnorm(x, lnw_ref[...], eps)
    q_ref[...] = jnp.dot(xn.astype(jnp.bfloat16), wq_ref[...],
                         preferred_element_type=jnp.float32)
    kv_ref[...] = jnp.dot(ctx_ref[...].astype(jnp.bfloat16), wkv_ref[...],
                          preferred_element_type=jnp.float32)


def attn_kernel(q_ref, kv_ref, res_ref, wo_ref, g_ref, o_ref, *,
                scale, causal, num_heads, num_kv_heads, head_dim):
    # per batch: all heads, in-kernel causal mask, softmax, out-proj, residual
    S = q_ref.shape[0]
    Skv = kv_ref.shape[0]
    D = o_ref.shape[-1]
    group = num_heads // num_kv_heads

    qb = q_ref[...].astype(jnp.bfloat16)          # (S, H*Dh)
    kvb = kv_ref[...].astype(jnp.bfloat16)        # (Skv, 2*Hkv*Dh)
    wob = wo_ref[...]                             # (H*Dh, D) bf16

    if causal:
        row = jax.lax.broadcasted_iota(jnp.int32, (S, Skv), 0)
        col = jax.lax.broadcasted_iota(jnp.int32, (S, Skv), 1)
        bias = jnp.where(col <= row, jnp.float32(0.0), jnp.float32(-1e9))

    acc = jnp.zeros((S, D), jnp.float32)
    for h in range(num_heads):
        kvh = h // group
        qh = qb[:, h * head_dim:(h + 1) * head_dim]
        kh = kvb[:, kvh * head_dim:(kvh + 1) * head_dim]
        vh = kvb[:, (num_kv_heads + kvh) * head_dim:(num_kv_heads + kvh + 1) * head_dim]
        s = jax.lax.dot_general(qh, kh, (((1,), (1,)), ((), ())),
                                preferred_element_type=jnp.float32) * scale
        if causal:
            s = s + bias
        s = s - jnp.max(s, axis=-1, keepdims=True)
        p = jnp.exp(s)
        p = p * pl.reciprocal(jnp.sum(p, axis=-1, keepdims=True), approx=True)
        oh = jnp.dot(p.astype(jnp.bfloat16), vh, preferred_element_type=jnp.float32)
        acc = acc + jnp.dot(oh.astype(jnp.bfloat16),
                            wob[h * head_dim:(h + 1) * head_dim, :],
                            preferred_element_type=jnp.float32)

    o_ref[...] = res_ref[...] + g_ref[...] * acc


def moe_kernel(h_ref, lnw_ref, rw_ref, wgu_ref, wd_ref, o_ref, logits_ref, *,
               eps, num_experts, top_k, inter, norm_topk):
    # fused: RMSNorm -> router matmul + softmax + top-k -> all experts -> residual
    x = h_ref[...]                                            # (S, D) f32
    xn = _rmsnorm(x, lnw_ref[...], eps)
    xb = xn.astype(jnp.bfloat16)

    logits = jnp.dot(xb, rw_ref[...], preferred_element_type=jnp.float32)  # (S, E)
    logits_ref[...] = logits
    m = jnp.max(logits, axis=-1, keepdims=True)
    e = jnp.exp(logits - m)
    probs = e / jnp.sum(e, axis=-1, keepdims=True)            # exact softmax (f32)

    # top-k routing weights via rank (ties broken toward lower index, as top_k)
    cols = [probs[:, i:i + 1] for i in range(num_experts)]
    weights = []
    for ei in range(num_experts):
        rank = jnp.zeros_like(cols[ei])
        for ej in range(num_experts):
            if ej == ei:
                continue
            gt = cols[ej] > cols[ei]
            if ej < ei:
                gt = jnp.logical_or(gt, cols[ej] == cols[ei])
            rank = rank + gt.astype(jnp.float32)
        keep = rank < float(top_k)
        weights.append(jnp.where(keep, cols[ei], jnp.float32(0.0)))
    if norm_topk:
        tot = weights[0]
        for wv in weights[1:]:
            tot = tot + wv
        weights = [wv / tot for wv in weights]

    # dense expert compute, zero-weighted for non-selected experts
    # TODO(synk): for large token counts use token-sorted per-expert dispatch
    # (PrefetchScalarGridSpec) instead of dense all-expert compute.
    acc = jnp.zeros_like(x)
    for ei in range(num_experts):
        gu = jnp.dot(xb, wgu_ref[ei], preferred_element_type=jnp.float32)   # (S, 2I)
        g = gu[:, :inter]
        u = gu[:, inter:]
        hidden = jax.nn.silu(g) * u
        y = jnp.dot(hidden.astype(jnp.bfloat16), wd_ref[ei],
                    preferred_element_type=jnp.float32)                      # (S, D)
        acc = acc + weights[ei] * y

    o_ref[...] = x + acc   # reference adds MoE output WITHOUT gamma_ffn


# ------------------------------ kernel wrappers ------------------------------
def sa_qkv_proj(h, lnw, wbig, cos_q, sin_q, cos_k, sin_k):
    B, S, D = h.shape
    W = wbig.shape[1]
    return pl.pallas_call(
        functools.partial(sa_qkv_kernel, eps=NORM_EPS, dq=DQ, dkv=DKV),
        out_shape=(jax.ShapeDtypeStruct((B, S, DQ), jnp.float32),
                   jax.ShapeDtypeStruct((B, S, 2 * DKV), jnp.float32)),
        grid=(B,),
        in_specs=[
            pl.BlockSpec((None, S, D), lambda b: (b, 0, 0)),
            pl.BlockSpec((1, D), lambda b: (0, 0)),
            pl.BlockSpec((D, W), lambda b: (0, 0)),
            pl.BlockSpec((S, DQ), lambda b: (0, 0)),
            pl.BlockSpec((S, DQ), lambda b: (0, 0)),
            pl.BlockSpec((S, DKV), lambda b: (0, 0)),
            pl.BlockSpec((S, DKV), lambda b: (0, 0)),
        ],
        out_specs=(pl.BlockSpec((None, S, DQ), lambda b: (b, 0, 0)),
                   pl.BlockSpec((None, S, 2 * DKV), lambda b: (b, 0, 0))),
        compiler_params=pltpu.CompilerParams(dimension_semantics=("parallel",)),
    )(h, lnw.reshape(1, D), wbig, cos_q, sin_q, cos_k, sin_k)


def ca_proj(h, lnw, wq, context, wkv):
    B, S, D = h.shape
    Sc, Dc = context.shape[1], context.shape[2]
    DKV2 = wkv.shape[1]
    return pl.pallas_call(
        functools.partial(ca_proj_kernel, eps=NORM_EPS),
        out_shape=(jax.ShapeDtypeStruct((B, S, DQ), jnp.float32),
                   jax.ShapeDtypeStruct((B, Sc, DKV2), jnp.float32)),
        grid=(B,),
        in_specs=[
            pl.BlockSpec((None, S, D), lambda b: (b, 0, 0)),
            pl.BlockSpec((1, D), lambda b: (0, 0)),
            pl.BlockSpec((D, DQ), lambda b: (0, 0)),
            pl.BlockSpec((None, Sc, Dc), lambda b: (b, 0, 0)),
            pl.BlockSpec((Dc, DKV2), lambda b: (0, 0)),
        ],
        out_specs=(pl.BlockSpec((None, S, DQ), lambda b: (b, 0, 0)),
                   pl.BlockSpec((None, Sc, DKV2), lambda b: (b, 0, 0))),
        compiler_params=pltpu.CompilerParams(dimension_semantics=("parallel",)),
    )(h, lnw.reshape(1, D), wq, context, wkv)


def fused_attention(q, kv, residual, wo, gamma, *, causal, scale):
    B, S, DQ_ = q.shape
    Skv, DKV2 = kv.shape[1], kv.shape[2]
    D = residual.shape[2]
    return pl.pallas_call(
        functools.partial(attn_kernel, scale=scale, causal=causal,
                          num_heads=NUM_HEADS, num_kv_heads=NUM_KV_HEADS,
                          head_dim=HEAD_DIM),
        out_shape=jax.ShapeDtypeStruct((B, S, D), jnp.float32),
        grid=(B,),
        in_specs=[
            pl.BlockSpec((None, S, DQ_), lambda b: (b, 0, 0)),
            pl.BlockSpec((None, Skv, DKV2), lambda b: (b, 0, 0)),
            pl.BlockSpec((None, S, D), lambda b: (b, 0, 0)),
            pl.BlockSpec((DQ_, D), lambda b: (0, 0)),
            pl.BlockSpec((1, D), lambda b: (0, 0)),
        ],
        out_specs=pl.BlockSpec((None, S, D), lambda b: (b, 0, 0)),
        compiler_params=pltpu.CompilerParams(dimension_semantics=("parallel",)),
    )(q, kv, residual, wo, gamma.reshape(1, D))


def fused_moe(h, lnw, router_w, wgu, wd):
    B, S, D = h.shape
    E = router_w.shape[1]
    I2 = wgu.shape[2]
    I = I2 // 2
    return pl.pallas_call(
        functools.partial(moe_kernel, eps=NORM_EPS, num_experts=E, top_k=TOP_K,
                          inter=I, norm_topk=NORM_TOPK_PROB),
        out_shape=(jax.ShapeDtypeStruct((B, S, D), jnp.float32),
                   jax.ShapeDtypeStruct((B, S, E), jnp.float32)),
        grid=(B,),
        in_specs=[
            pl.BlockSpec((None, S, D), lambda b: (b, 0, 0)),
            pl.BlockSpec((1, D), lambda b: (0, 0)),
            pl.BlockSpec((D, E), lambda b: (0, 0)),
            pl.BlockSpec((E, D, I2), lambda b: (0, 0, 0)),
            pl.BlockSpec((E, I, D), lambda b: (0, 0, 0)),
        ],
        out_specs=(pl.BlockSpec((None, S, D), lambda b: (b, 0, 0)),
                   pl.BlockSpec((None, S, E), lambda b: (b, 0, 0))),
        compiler_params=pltpu.CompilerParams(dimension_semantics=("parallel",)),
    )(h, lnw.reshape(1, D), router_w, wgu, wd)


# ------------------------------ forward pass ---------------------------------
@jax.jit
def decoder_block_forward(p, hidden_states, context, cos, sin):
    B, S, D = hidden_states.shape

    # head-tiled RoPE tables (position-only; broadcast across batch via BlockSpec)
    cos_q = jnp.tile(cos, (1, NUM_HEADS))        # (S, H*Dh)
    sin_q = jnp.tile(sin, (1, NUM_HEADS))
    cos_k = jnp.tile(cos, (1, NUM_KV_HEADS))     # (S, Hkv*Dh)
    sin_k = jnp.tile(sin, (1, NUM_KV_HEADS))

    scale = HEAD_DIM ** -0.5

    # --- self-attention sub-block ---
    q, kv = sa_qkv_proj(hidden_states, p["ln_in_w"], p["w_sa_qkv"],
                        cos_q, sin_q, cos_k, sin_k)
    hidden_states = fused_attention(q, kv, hidden_states, p["o_w"], p["gamma_sa"],
                                    causal=True, scale=scale)

    # --- cross-attention sub-block ---
    qc, kvc = ca_proj(hidden_states, p["ln_ca_w"], p["ca_q_w"], context, p["w_ca_kv"])
    hidden_states = fused_attention(qc, kvc, hidden_states, p["ca_o_w"], p["gamma_ca"],
                                    causal=False, scale=scale)

    # --- MoE FFN sub-block ---
    hidden_states, router_logits = fused_moe(hidden_states, p["ln_post_w"],
                                             p["router_w"], p["wgu"], p["wd"])
    return hidden_states, router_logits.reshape(B * S, NUM_EXPERTS)


# ------------------------------ parameter init -------------------------------
def init_params(key):
    ks = jax.random.split(key, 12)

    def w(k, shape, scale=0.02):
        return scale * jax.random.normal(k, shape, jnp.float32)

    D, Dh, Dc, I = DIM, HEAD_DIM, CONTEXT_DIM, MOE_INTER
    return {
        "ln_in_w": jnp.ones((D,), jnp.float32),
        "ln_ca_w": jnp.ones((D,), jnp.float32),
        "ln_post_w": jnp.ones((D,), jnp.float32),
        "gamma_sa": LAYER_SCALE_INIT * jnp.ones((D,), jnp.float32),
        "gamma_ca": LAYER_SCALE_INIT * jnp.ones((D,), jnp.float32),
        "q_w": w(ks[0], (D, NUM_HEADS * Dh)),
        "k_w": w(ks[1], (D, NUM_KV_HEADS * Dh)),
        "v_w": w(ks[2], (D, NUM_KV_HEADS * Dh)),
        "o_w": w(ks[3], (NUM_HEADS * Dh, D)),
        "ca_q_w": w(ks[4], (D, NUM_HEADS * Dh)),
        "ca_k_w": w(ks[5], (Dc, NUM_KV_HEADS * Dh)),
        "ca_v_w": w(ks[6], (Dc, NUM_KV_HEADS * Dh)),
        "ca_o_w": w(ks[7], (NUM_HEADS * Dh, D)),
        "router_w": w(ks[8], (D, NUM_EXPERTS)),
        "wg": w(ks[9], (NUM_EXPERTS, D, I)),
        "wu": w(ks[10], (NUM_EXPERTS, D, I)),
        "wd": w(ks[11], (NUM_EXPERTS, I, D)),
    }


def rotate_half_matrix(n_heads, dh):
    # block-diagonal +/-1 matrix R such that x @ R == rotate_half(x) per head
    half = dh // 2
    zero = jnp.zeros((half, half), jnp.float32)
    eye = jnp.eye(half, dtype=jnp.float32)
    blk = jnp.concatenate([jnp.concatenate([zero, eye], axis=1),
                           jnp.concatenate([-eye, zero], axis=1)], axis=0)
    return jnp.kron(jnp.eye(n_heads, dtype=jnp.float32), blk)


def prepare_params(p):
    bf16 = jnp.bfloat16
    rq = rotate_half_matrix(NUM_HEADS, HEAD_DIM)        # (DQ, DQ)
    rk = rotate_half_matrix(NUM_KV_HEADS, HEAD_DIM)     # (DKV, DKV)
    # fused self-attn projection: [Wq | Wq@R | Wk | Wk@R | Wv]  -> (D, 2DQ+3DKV)
    w_sa_qkv = jnp.concatenate(
        [p["q_w"], p["q_w"] @ rq, p["k_w"], p["k_w"] @ rk, p["v_w"]],
        axis=1).astype(bf16)
    w_ca_kv = jnp.concatenate([p["ca_k_w"], p["ca_v_w"]], axis=1).astype(bf16)
    wgu = jnp.concatenate([p["wg"], p["wu"]], axis=2).astype(bf16)   # (E, D, 2I)
    return {
        "ln_in_w": p["ln_in_w"], "ln_ca_w": p["ln_ca_w"], "ln_post_w": p["ln_post_w"],
        "gamma_sa": p["gamma_sa"], "gamma_ca": p["gamma_ca"],
        "w_sa_qkv": w_sa_qkv,
        "o_w": p["o_w"].astype(bf16),
        "ca_q_w": p["ca_q_w"].astype(bf16),
        "w_ca_kv": w_ca_kv,
        "ca_o_w": p["ca_o_w"].astype(bf16),
        "router_w": p["router_w"].astype(bf16),
        "wgu": wgu,
        "wd": p["wd"].astype(bf16),
    }


def rope_cos_sin(S, Dh, base=10000.0):
    inv_freq = 1.0 / (base ** (jnp.arange(0, Dh, 2, dtype=jnp.float32) / Dh))
    t = jnp.arange(S, dtype=jnp.float32)
    freqs = jnp.outer(t, inv_freq)                    # (S, Dh/2)
    emb = jnp.concatenate([freqs, freqs], axis=-1)    # (S, Dh)
    return jnp.cos(emb), jnp.sin(emb)


# ---------------------------------- main --------------------------------------
if __name__ == "__main__":
    key = jax.random.PRNGKey(0)
    kp, kx, kc = jax.random.split(key, 3)
    params = prepare_params(init_params(kp))

    B, S, Sc = 2, 8, 8
    hidden = jax.random.normal(kx, (B, S, DIM), jnp.float32)
    context = jax.random.normal(kc, (B, Sc, CONTEXT_DIM), jnp.float32)
    cos, sin = rope_cos_sin(S, HEAD_DIM)

    out, router_logits = decoder_block_forward(params, hidden, context, cos, sin)
    jax.block_until_ready((out, router_logits))
    assert out.shape == (B, S, DIM)
    assert router_logits.shape == (B * S, NUM_EXPERTS)
    print("KERNEL_OK")
</pallas_src>

<mosaic_0001>
module attributes {stable_mosaic.version = 11 : i64} {
  func.func @ca_proj_kernel(%arg0: i32, %arg1: memref<1x8x32xf32, #tpu.memory_space<vmem>>, %arg2: memref<1x32xf32, #tpu.memory_space<vmem>>, %arg3: memref<32x32xbf16, #tpu.memory_space<vmem>>, %arg4: memref<1x8x32xf32, #tpu.memory_space<vmem>>, %arg5: memref<32x32xbf16, #tpu.memory_space<vmem>>, %arg6: memref<1x8x32xf32, #tpu.memory_space<vmem>>, %arg7: memref<1x8x32xf32, #tpu.memory_space<vmem>>) attributes {dimension_semantics = [#tpu.dimension_semantics<parallel>], iteration_bounds = array<i64: 2>, scalar_prefetch = 0 : i64, scratch_operands = 0 : i64, tpu.core_type = #tpu.core_type<tc>, window_params = [{transform_indices = @transform_0, window_bounds = array<i64: 1, 8, 32>}, {pipeline_mode = #tpu.pipeline_mode<synchronous>, transform_indices = @transform_1, window_bounds = array<i64: 1, 32>}, {pipeline_mode = #tpu.pipeline_mode<synchronous>, transform_indices = @transform_2, window_bounds = array<i64: 32, 32>}, {transform_indices = @transform_3, window_bounds = array<i64: 1, 8, 32>}, {pipeline_mode = #tpu.pipeline_mode<synchronous>, transform_indices = @transform_4, window_bounds = array<i64: 32, 32>}, {transform_indices = @transform_5, window_bounds = array<i64: 1, 8, 32>}, {transform_indices = @transform_6, window_bounds = array<i64: 1, 8, 32>}]} {
    %c0 = arith.constant 0 : index
    %c0_0 = arith.constant 0 : index
    %c0_1 = arith.constant 0 : index
    %0 = vector.load %arg1[%c0, %c0_0, %c0_1] : memref<1x8x32xf32, #tpu.memory_space<vmem>>, vector<1x8x32xf32>
    %1 = vector.shape_cast %0 : vector<1x8x32xf32> to vector<8x32xf32>
    %c0_2 = arith.constant 0 : index
    %c0_3 = arith.constant 0 : index
    %2 = vector.load %arg2[%c0_2, %c0_3] : memref<1x32xf32, #tpu.memory_space<vmem>>, vector<1x32xf32>
    %3 = arith.mulf %1, %1 : vector<8x32xf32>
    %cst = arith.constant dense<0.000000e+00> : vector<8xf32>
    %4 = vector.multi_reduction <add>, %3, %cst [1] : vector<8x32xf32> to vector<8xf32>
    %5 = vector.shape_cast %4 : vector<8xf32> to vector<8x1xf32>
    %cst_4 = arith.constant 3.200000e+01 : f32
    %6 = vector.broadcast %cst_4 : f32 to vector<8x1xf32>
    %7 = arith.divf %5, %6 : vector<8x1xf32>
    %cst_5 = arith.constant 9.99999997E-7 : f32
    %8 = vector.broadcast %cst_5 : f32 to vector<8x1xf32>
    %9 = arith.addf %7, %8 : vector<8x1xf32>
    %10 = math.rsqrt %9 : vector<8x1xf32>
    %11 = vector.broadcast %10 : vector<8x1xf32> to vector<8x32xf32>
    %12 = arith.mulf %1, %11 : vector<8x32xf32>
    %13 = vector.broadcast %2 : vector<1x32xf32> to vector<8x32xf32>
    %14 = arith.mulf %12, %13 : vector<8x32xf32>
    %15 = arith.truncf %14 : vector<8x32xf32> to vector<8x32xbf16>
    %c0_6 = arith.constant 0 : index
    %c0_7 = arith.constant 0 : index
    %16 = vector.load %arg3[%c0_6, %c0_7] : memref<32x32xbf16, #tpu.memory_space<vmem>>, vector<32x32xbf16>
    %cst_8 = arith.constant dense<0.000000e+00> : vector<8x32xf32>
    %17 = tpu.matmul %15, %16, %cst_8 {dimension_numbers = #tpu.dot_dimension_numbers<[1], [0], [0], [1], [0, 0, 1, 1], [], []>} : vector<8x32xbf16>, vector<32x32xbf16>, vector<8x32xf32> -> vector<8x32xf32>
    %c0_9 = arith.constant 0 : index
    %c0_10 = arith.constant 0 : index
    %c0_11 = arith.constant 0 : index
    %18 = vector.load %arg6[%c0_9, %c0_10, %c0_11] : memref<1x8x32xf32, #tpu.memory_space<vmem>>, vector<1x8x32xf32>
    %19 = vector.shape_cast %18 : vector<1x8x32xf32> to vector<8x32xf32>
    %20 = vector.shape_cast %17 : vector<8x32xf32> to vector<1x8x32xf32>
    tpu.vector_store %arg6[%c0_9, %c0_10, %c0_11], %20 {strides = array<i32>} : memref<1x8x32xf32, #tpu.memory_space<vmem>>, vector<1x8x32xf32>,
    %c0_12 = arith.constant 0 : index
    %c0_13 = arith.constant 0 : index
    %c0_14 = arith.constant 0 : index
    %21 = vector.load %arg4[%c0_12, %c0_13, %c0_14] : memref<1x8x32xf32, #tpu.memory_space<vmem>>, vector<1x8x32xf32>
    %22 = vector.shape_cast %21 : vector<1x8x32xf32> to vector<8x32xf32>
    %23 = arith.truncf %22 : vector<8x32xf32> to vector<8x32xbf16>
    %c0_15 = arith.constant 0 : index
    %c0_16 = arith.constant 0 : index
    %24 = vector.load %arg5[%c0_15, %c0_16] : memref<32x32xbf16, #tpu.memory_space<vmem>>, vector<32x32xbf16>
    %cst_17 = arith.constant dense<0.000000e+00> : vector<8x32xf32>
    %25 = tpu.matmul %23, %24, %cst_17 {dimension_numbers = #tpu.dot_dimension_numbers<[1], [0], [0], [1], [0, 0, 1, 1], [], []>} : vector<8x32xbf16>, vector<32x32xbf16>, vector<8x32xf32> -> vector<8x32xf32>
    %c0_18 = arith.constant 0 : index
    %c0_19 = arith.constant 0 : index
    %c0_20 = arith.constant 0 : index
    %26 = vector.load %arg7[%c0_18, %c0_19, %c0_20] : memref<1x8x32xf32, #tpu.memory_space<vmem>>, vector<1x8x32xf32>
    %27 = vector.shape_cast %26 : vector<1x8x32xf32> to vector<8x32xf32>
    %28 = vector.shape_cast %25 : vector<8x32xf32> to vector<1x8x32xf32>
    tpu.vector_store %arg7[%c0_18, %c0_19, %c0_20], %28 {strides = array<i32>} : memref<1x8x32xf32, #tpu.memory_space<vmem>>, vector<1x8x32xf32>,
    return
  }
  func.func @transform_0(%arg0: i32) -> (i32, i32, i32) {
    %c0_i32 = arith.constant 0 : i32
    %c0_i32_0 = arith.constant 0 : i32
    %c0_i32_1 = arith.constant 0 : i32
    return %arg0, %c0_i32, %c0_i32_0 : i32, i32, i32
  }
  func.func @transform_1(%arg0: i32) -> (i32, i32) {
    %c0_i32 = arith.constant 0 : i32
    %c0_i32_0 = arith.constant 0 : i32
    %c0_i32_1 = arith.constant 0 : i32
    return %c0_i32, %c0_i32_0 : i32, i32
  }
  func.func @transform_2(%arg0: i32) -> (i32, i32) {
    %c0_i32 = arith.constant 0 : i32
    %c0_i32_0 = arith.constant 0 : i32
    %c0_i32_1 = arith.constant 0 : i32
    return %c0_i32, %c0_i32_0 : i32, i32
  }
  func.func @transform_3(%arg0: i32) -> (i32, i32, i32) {
    %c0_i32 = arith.constant 0 : i32
    %c0_i32_0 = arith.constant 0 : i32
    %c0_i32_1 = arith.constant 0 : i32
    return %arg0, %c0_i32, %c0_i32_0 : i32, i32, i32
  }
  func.func @transform_4(%arg0: i32) -> (i32, i32) {
    %c0_i32 = arith.constant 0 : i32
    %c0_i32_0 = arith.constant 0 : i32
    %c0_i32_1 = arith.constant 0 : i32
    return %c0_i32, %c0_i32_0 : i32, i32
  }
  func.func @transform_5(%arg0: i32) -> (i32, i32, i32) {
    %c0_i32 = arith.constant 0 : i32
    %c0_i32_0 = arith.constant 0 : i32
    %c0_i32_1 = arith.constant 0 : i32
    return %arg0, %c0_i32, %c0_i32_0 : i32, i32, i32
  }
  func.func @transform_6(%arg0: i32) -> (i32, i32, i32) {
    %c0_i32 = arith.constant 0 : i32
    %c0_i32_0 = arith.constant 0 : i32
    %c0_i32_1 = arith.constant 0 : i32
    return %arg0, %c0_i32, %c0_i32_0 : i32, i32, i32
  }
}

module attributes {stable_mosaic.version = 11 : i64} {
  func.func @sa_qkv_kernel(%arg0: i32, %arg1: memref<1x8x32xf32, #tpu.memory_space<vmem>>, %arg2: memref<1x32xf32, #tpu.memory_space<vmem>>, %arg3: memref<32x112xbf16, #tpu.memory_space<vmem>>, %arg4: memref<8x32xf32, #tpu.memory_space<vmem>>, %arg5: memref<8x32xf32, #tpu.memory_space<vmem>>, %arg6: memref<8x16xf32, #tpu.memory_space<vmem>>, %arg7: memref<8x16xf32, #tpu.memory_space<vmem>>, %arg8: memref<1x8x32xf32, #tpu.memory_space<vmem>>, %arg9: memref<1x8x32xf32, #tpu.memory_space<vmem>>) attributes {dimension_semantics = [#tpu.dimension_semantics<parallel>], iteration_bounds = array<i64: 2>, scalar_prefetch = 0 : i64, scratch_operands = 0 : i64, tpu.core_type = #tpu.core_type<tc>, window_params = [{transform_indices = @transform_0, window_bounds = array<i64: 1, 8, 32>}, {pipeline_mode = #tpu.pipeline_mode<synchronous>, transform_indices = @transform_1, window_bounds = array<i64: 1, 32>}, {pipeline_mode = #tpu.pipeline_mode<synchronous>, transform_indices = @transform_2, window_bounds = array<i64: 32, 112>}, {pipeline_mode = #tpu.pipeline_mode<synchronous>, transform_indices = @transform_3, window_bounds = array<i64: 8, 32>}, {pipeline_mode = #tpu.pipeline_mode<synchronous>, transform_indices = @transform_4, window_bounds = array<i64: 8, 32>}, {pipeline_mode = #tpu.pipeline_mode<synchronous>, transform_indices = @transform_5, window_bounds = array<i64: 8, 16>}, {pipeline_mode = #tpu.pipeline_mode<synchronous>, transform_indices = @transform_6, window_bounds = array<i64: 8, 16>}, {transform_indices = @transform_7, window_bounds = array<i64: 1, 8, 32>}, {transform_indices = @transform_8, window_bounds = array<i64: 1, 8, 32>}]} {
    %c0 = arith.constant 0 : index
    %c0_0 = arith.constant 0 : index
    %c0_1 = arith.constant 0 : index
    %0 = vector.load %arg1[%c0, %c0_0, %c0_1] : memref<1x8x32xf32, #tpu.memory_space<vmem>>, vector<1x8x32xf32>
    %1 = vector.shape_cast %0 : vector<1x8x32xf32> to vector<8x32xf32>
    %c0_2 = arith.constant 0 : index
    %c0_3 = arith.constant 0 : index
    %2 = vector.load %arg2[%c0_2, %c0_3] : memref<1x32xf32, #tpu.memory_space<vmem>>, vector<1x32xf32>
    %3 = arith.mulf %1, %1 : vector<8x32xf32>
    %cst = arith.constant dense<0.000000e+00> : vector<8xf32>
    %4 = vector.multi_reduction <add>, %3, %cst [1] : vector<8x32xf32> to vector<8xf32>
    %5 = vector.shape_cast %4 : vector<8xf32> to vector<8x1xf32>
    %cst_4 = arith.constant 3.200000e+01 : f32
    %6 = vector.broadcast %cst_4 : f32 to vector<8x1xf32>
    %7 = arith.divf %5, %6 : vector<8x1xf32>
    %cst_5 = arith.constant 9.99999997E-7 : f32
    %8 = vector.broadcast %cst_5 : f32 to vector<8x1xf32>
    %9 = arith.addf %7, %8 : vector<8x1xf32>
    %10 = math.rsqrt %9 : vector<8x1xf32>
    %11 = vector.broadcast %10 : vector<8x1xf32> to vector<8x32xf32>
    %12 = arith.mulf %1, %11 : vector<8x32xf32>
    %13 = vector.broadcast %2 : vector<1x32xf32> to vector<8x32xf32>
    %14 = arith.mulf %12, %13 : vector<8x32xf32>
    %15 = arith.truncf %14 : vector<8x32xf32> to vector<8x32xbf16>
    %c0_6 = arith.constant 0 : index
    %c0_7 = arith.constant 0 : index
    %16 = vector.load %arg3[%c0_6, %c0_7] : memref<32x112xbf16, #tpu.memory_space<vmem>>, vector<32x112xbf16>
    %cst_8 = arith.constant dense<0.000000e+00> : vector<8x112xf32>
    %17 = tpu.matmul %15, %16, %cst_8 {dimension_numbers = #tpu.dot_dimension_numbers<[1], [0], [0], [1], [0, 0, 1, 1], [], []>} : vector<8x32xbf16>, vector<32x112xbf16>, vector<8x112xf32> -> vector<8x112xf32>
    %18 = vector.extract_strided_slice %17 {offsets = [0, 0], sizes = [8, 32], strides = [1, 1]} : vector<8x112xf32> to vector<8x32xf32>
    %19 = vector.extract_strided_slice %17 {offsets = [0, 32], sizes = [8, 32], strides = [1, 1]} : vector<8x112xf32> to vector<8x32xf32>
    %20 = vector.extract_strided_slice %17 {offsets = [0, 64], sizes = [8, 16], strides = [1, 1]} : vector<8x112xf32> to vector<8x16xf32>
    %21 = vector.extract_strided_slice %17 {offsets = [0, 80], sizes = [8, 16], strides = [1, 1]} : vector<8x112xf32> to vector<8x16xf32>
    %22 = vector.extract_strided_slice %17 {offsets = [0, 96], sizes = [8, 16], strides = [1, 1]} : vector<8x112xf32> to vector<8x16xf32>
    %c0_9 = arith.constant 0 : index
    %c0_10 = arith.constant 0 : index
    %23 = vector.load %arg4[%c0_9, %c0_10] : memref<8x32xf32, #tpu.memory_space<vmem>>, vector<8x32xf32>
    %24 = arith.mulf %18, %23 : vector<8x32xf32>
    %c0_11 = arith.constant 0 : index
    %c0_12 = arith.constant 0 : index
    %25 = vector.load %arg5[%c0_11, %c0_12] : memref<8x32xf32, #tpu.memory_space<vmem>>, vector<8x32xf32>
    %26 = arith.mulf %19, %25 : vector<8x32xf32>
    %27 = arith.addf %24, %26 : vector<8x32xf32>
    %c0_13 = arith.constant 0 : index
    %c0_14 = arith.constant 0 : index
    %c0_15 = arith.constant 0 : index
    %28 = vector.load %arg8[%c0_13, %c0_14, %c0_15] : memref<1x8x32xf32, #tpu.memory_space<vmem>>, vector<1x8x32xf32>
    %29 = vector.shape_cast %28 : vector<1x8x32xf32> to vector<8x32xf32>
    %30 = vector.shape_cast %27 : vector<8x32xf32> to vector<1x8x32xf32>
    tpu.vector_store %arg8[%c0_13, %c0_14, %c0_15], %30 {strides = array<i32>} : memref<1x8x32xf32, #tpu.memory_space<vmem>>, vector<1x8x32xf32>,
    %c0_16 = arith.constant 0 : index
    %c0_17 = arith.constant 0 : index
    %31 = vector.load %arg6[%c0_16, %c0_17] : memref<8x16xf32, #tpu.memory_space<vmem>>, vector<8x16xf32>
    %32 = arith.mulf %20, %31 : vector<8x16xf32>
    %c0_18 = arith.constant 0 : index
    %c0_19 = arith.constant 0 : index
    %33 = vector.load %arg7[%c0_18, %c0_19] : memref<8x16xf32, #tpu.memory_space<vmem>>, vector<8x16xf32>
    %34 = arith.mulf %21, %33 : vector<8x16xf32>
    %35 = arith.addf %32, %34 : vector<8x16xf32>
    %c0_20 = arith.constant 0 : index
    %c0_21 = arith.constant 0 : index
    %c0_22 = arith.constant 0 : index
    %36 = vector.load %arg9[%c0_20, %c0_21, %c0_22] : memref<1x8x32xf32, #tpu.memory_space<vmem>>, vector<1x8x16xf32>
    %37 = vector.shape_cast %36 : vector<1x8x16xf32> to vector<8x16xf32>
    %38 = vector.shape_cast %35 : vector<8x16xf32> to vector<1x8x16xf32>
    tpu.vector_store %arg9[%c0_20, %c0_21, %c0_22], %38 {strides = array<i32>} : memref<1x8x32xf32, #tpu.memory_space<vmem>>, vector<1x8x16xf32>,
    %c0_23 = arith.constant 0 : index
    %c0_24 = arith.constant 0 : index
    %c16 = arith.constant 16 : index
    %39 = vector.load %arg9[%c0_23, %c0_24, %c16] : memref<1x8x32xf32, #tpu.memory_space<vmem>>, vector<1x8x16xf32>
    %40 = vector.shape_cast %39 : vector<1x8x16xf32> to vector<8x16xf32>
    %41 = vector.shape_cast %22 : vector<8x16xf32> to vector<1x8x16xf32>
    tpu.vector_store %arg9[%c0_23, %c0_24, %c16], %41 {strides = array<i32>} : memref<1x8x32xf32, #tpu.memory_space<vmem>>, vector<1x8x16xf32>,
    return
  }
  func.func @transform_0(%arg0: i32) -> (i32, i32, i32) {
    %c0_i32 = arith.constant 0 : i32
    %c0_i32_0 = arith.constant 0 : i32
    %c0_i32_1 = arith.constant 0 : i32
    return %arg0, %c0_i32, %c0_i32_0 : i32, i32, i32
  }
  func.func @transform_1(%arg0: i32) -> (i32, i32) {
    %c0_i32 = arith.constant 0 : i32
    %c0_i32_0 = arith.constant 0 : i32
    %c0_i32_1 = arith.constant 0 : i32
    return %c0_i32, %c0_i32_0 : i32, i32
  }
  func.func @transform_2(%arg0: i32) -> (i32, i32) {
    %c0_i32 = arith.constant 0 : i32
    %c0_i32_0 = arith.constant 0 : i32
    %c0_i32_1 = arith.constant 0 : i32
    return %c0_i32, %c0_i32_0 : i32, i32
  }
  func.func @transform_3(%arg0: i32) -> (i32, i32) {
    %c0_i32 = arith.constant 0 : i32
    %c0_i32_0 = arith.constant 0 : i32
    %c0_i32_1 = arith.constant 0 : i32
    return %c0_i32, %c0_i32_0 : i32, i32
  }
  func.func @transform_4(%arg0: i32) -> (i32, i32) {
    %c0_i32 = arith.constant 0 : i32
    %c0_i32_0 = arith.constant 0 : i32
    %c0_i32_1 = arith.constant 0 : i32
    return %c0_i32, %c0_i32_0 : i32, i32
  }
  func.func @transform_5(%arg0: i32) -> (i32, i32) {
    %c0_i32 = arith.constant 0 : i32
    %c0_i32_0 = arith.constant 0 : i32
    %c0_i32_1 = arith.constant 0 : i32
    return %c0_i32, %c0_i32_0 : i32, i32
  }
  func.func @transform_6(%arg0: i32) -> (i32, i32) {
    %c0_i32 = arith.constant 0 : i32
    %c0_i32_0 = arith.constant 0 : i32
    %c0_i32_1 = arith.constant 0 : i32
    return %c0_i32, %c0_i32_0 : i32, i32
  }
  func.func @transform_7(%arg0: i32) -> (i32, i32, i32) {
    %c0_i32 = arith.constant 0 : i32
    %c0_i32_0 = arith.constant 0 : i32
    %c0_i32_1 = arith.constant 0 : i32
    return %arg0, %c0_i32, %c0_i32_0 : i32, i32, i32
  }
  func.func @transform_8(%arg0: i32) -> (i32, i32, i32) {
    %c0_i32 = arith.constant 0 : i32
    %c0_i32_0 = arith.constant 0 : i32
    %c0_i32_1 = arith.constant 0 : i32
    return %arg0, %c0_i32, %c0_i32_0 : i32, i32, i32
  }
}

module attributes {stable_mosaic.version = 11 : i64} {
  func.func @attn_kernel(%arg0: i32, %arg1: memref<1x8x32xf32, #tpu.memory_space<vmem>>, %arg2: memref<1x8x32xf32, #tpu.memory_space<vmem>>, %arg3: memref<1x8x32xf32, #tpu.memory_space<vmem>>, %arg4: memref<32x32xbf16, #tpu.memory_space<vmem>>, %arg5: memref<1x32xf32, #tpu.memory_space<vmem>>, %arg6: memref<1x8x32xf32, #tpu.memory_space<vmem>>) attributes {dimension_semantics = [#tpu.dimension_semantics<parallel>], iteration_bounds = array<i64: 2>, scalar_prefetch = 0 : i64, scratch_operands = 0 : i64, tpu.core_type = #tpu.core_type<tc>, window_params = [{transform_indices = @transform_0, window_bounds = array<i64: 1, 8, 32>}, {transform_indices = @transform_1, window_bounds = array<i64: 1, 8, 32>}, {transform_indices = @transform_2, window_bounds = array<i64: 1, 8, 32>}, {pipeline_mode = #tpu.pipeline_mode<synchronous>, transform_indices = @transform_3, window_bounds = array<i64: 32, 32>}, {pipeline_mode = #tpu.pipeline_mode<synchronous>, transform_indices = @transform_4, window_bounds = array<i64: 1, 32>}, {transform_indices = @transform_5, window_bounds = array<i64: 1, 8, 32>}]} {
    %c0 = arith.constant 0 : index
    %c0_0 = arith.constant 0 : index
    %c0_1 = arith.constant 0 : index
    %0 = vector.load %arg1[%c0, %c0_0, %c0_1] : memref<1x8x32xf32, #tpu.memory_space<vmem>>, vector<1x8x32xf32>
    %1 = vector.shape_cast %0 : vector<1x8x32xf32> to vector<8x32xf32>
    %2 = arith.truncf %1 : vector<8x32xf32> to vector<8x32xbf16>
    %c0_2 = arith.constant 0 : index
    %c0_3 = arith.constant 0 : index
    %c0_4 = arith.constant 0 : index
    %3 = vector.load %arg2[%c0_2, %c0_3, %c0_4] : memref<1x8x32xf32, #tpu.memory_space<vmem>>, vector<1x8x32xf32>
    %4 = vector.shape_cast %3 : vector<1x8x32xf32> to vector<8x32xf32>
    %5 = arith.truncf %4 : vector<8x32xf32> to vector<8x32xbf16>
    %c0_5 = arith.constant 0 : index
    %c0_6 = arith.constant 0 : index
    %6 = vector.load %arg4[%c0_5, %c0_6] : memref<32x32xbf16, #tpu.memory_space<vmem>>, vector<32x32xbf16>
    %7 = tpu.iota {dimensions = array<i32: 0>} : vector<8x8xi32>
    %8 = tpu.iota {dimensions = array<i32: 1>} : vector<8x8xi32>
    %9 = arith.cmpi sle, %8, %7 : vector<8x8xi32>
    %cst = arith.constant 0.000000e+00 : f32
    %cst_7 = arith.constant -1.000000e+09 : f32
    %10 = vector.broadcast %cst : f32 to vector<8x8xf32>
    %11 = vector.broadcast %cst_7 : f32 to vector<8x8xf32>
    %12 = arith.select %9, %10, %11 : vector<8x8xi1>, vector<8x8xf32>
    %cst_8 = arith.constant 0.000000e+00 : f32
    %13 = vector.broadcast %cst_8 : f32 to vector<8x32xf32>
    %14 = vector.extract_strided_slice %2 {offsets = [0, 0], sizes = [8, 8], strides = [1, 1]} : vector<8x32xbf16> to vector<8x8xbf16>
    %15 = vector.extract_strided_slice %5 {offsets = [0, 0], sizes = [8, 8], strides = [1, 1]} : vector<8x32xbf16> to vector<8x8xbf16>
    %16 = vector.extract_strided_slice %5 {offsets = [0, 16], sizes = [8, 8], strides = [1, 1]} : vector<8x32xbf16> to vector<8x8xbf16>
    %cst_9 = arith.constant dense<0.000000e+00> : vector<8x8xf32>
    %17 = tpu.matmul %14, %15, %cst_9 {dimension_numbers = #tpu.dot_dimension_numbers<[1], [1], [0], [0], [0, 0, 1, 0], [], []>} : vector<8x8xbf16>, vector<8x8xbf16>, vector<8x8xf32> -> vector<8x8xf32>
    %cst_10 = arith.constant 0.353553385 : f32
    %18 = vector.broadcast %cst_10 : f32 to vector<8x8xf32>
    %19 = arith.mulf %17, %18 : vector<8x8xf32>
    %20 = arith.addf %19, %12 : vector<8x8xf32>
    %cst_11 = arith.constant dense<0xFF800000> : vector<8xf32>
    %21 = vector.multi_reduction <maximumf>, %20, %cst_11 [1] : vector<8x8xf32> to vector<8xf32>
    %22 = vector.shape_cast %21 : vector<8xf32> to vector<8x1xf32>
    %23 = vector.broadcast %22 : vector<8x1xf32> to vector<8x8xf32>
    %24 = arith.subf %20, %23 : vector<8x8xf32>
    %25 = math.exp %24 : vector<8x8xf32>
    %cst_12 = arith.constant dense<0.000000e+00> : vector<8xf32>
    %26 = vector.multi_reduction <add>, %25, %cst_12 [1] : vector<8x8xf32> to vector<8xf32>
    %27 = vector.shape_cast %26 : vector<8xf32> to vector<8x1xf32>
    %28 = tpu.reciprocal %27 {approx = true} : vector<8x1xf32> -> vector<8x1xf32>
    %29 = vector.broadcast %28 : vector<8x1xf32> to vector<8x8xf32>
    %30 = arith.mulf %25, %29 : vector<8x8xf32>
    %31 = arith.truncf %30 : vector<8x8xf32> to vector<8x8xbf16>
    %cst_13 = arith.constant dense<0.000000e+00> : vector<8x8xf32>
    %32 = tpu.matmul %31, %16, %cst_13 {dimension_numbers = #tpu.dot_dimension_numbers<[1], [0], [0], [1], [0, 0, 1, 1], [], []>} : vector<8x8xbf16>, vector<8x8xbf16>, vector<8x8xf32> -> vector<8x8xf32>
    %33 = arith.truncf %32 : vector<8x8xf32> to vector<8x8xbf16>
    %34 = vector.extract_strided_slice %6 {offsets = [0, 0], sizes = [8, 32], strides = [1, 1]} : vector<32x32xbf16> to vector<8x32xbf16>
    %cst_14 = arith.constant dense<0.000000e+00> : vector<8x32xf32>
    %35 = tpu.matmul %33, %34, %cst_14 {dimension_numbers = #tpu.dot_dimension_numbers<[1], [0], [0], [1], [0, 0, 1, 1], [], []>} : vector<8x8xbf16>, vector<8x32xbf16>, vector<8x32xf32> -> vector<8x32xf32>
    %36 = arith.addf %13, %35 : vector<8x32xf32>
    %37 = vector.extract_strided_slice %2 {offsets = [0, 8], sizes = [8, 8], strides = [1, 1]} : vector<8x32xbf16> to vector<8x8xbf16>
    %38 = vector.extract_strided_slice %5 {offsets = [0, 0], sizes = [8, 8], strides = [1, 1]} : vector<8x32xbf16> to vector<8x8xbf16>
    %39 = vector.extract_strided_slice %5 {offsets = [0, 16], sizes = [8, 8], strides = [1, 1]} : vector<8x32xbf16> to vector<8x8xbf16>
    %cst_15 = arith.constant dense<0.000000e+00> : vector<8x8xf32>
    %40 = tpu.matmul %37, %38, %cst_15 {dimension_numbers = #tpu.dot_dimension_numbers<[1], [1], [0], [0], [0, 0, 1, 0], [], []>} : vector<8x8xbf16>, vector<8x8xbf16>, vector<8x8xf32> -> vector<8x8xf32>
    %cst_16 = arith.constant 0.353553385 : f32
    %41 = vector.broadcast %cst_16 : f32 to vector<8x8xf32>
    %42 = arith.mulf %40, %41 : vector<8x8xf32>
    %43 = arith.addf %42, %12 : vector<8x8xf32>
    %cst_17 = arith.constant dense<0xFF800000> : vector<8xf32>
    %44 = vector.multi_reduction <maximumf>, %43, %cst_17 [1] : vector<8x8xf32> to vector<8xf32>
    %45 = vector.shape_cast %44 : vector<8xf32> to vector<8x1xf32>
    %46 = vector.broadcast %45 : vector<8x1xf32> to vector<8x8xf32>
    %47 = arith.subf %43, %46 : vector<8x8xf32>
    %48 = math.exp %47 : vector<8x8xf32>
    %cst_18 = arith.constant dense<0.000000e+00> : vector<8xf32>
    %49 = vector.multi_reduction <add>, %48, %cst_18 [1] : vector<8x8xf32> to vector<8xf32>
    %50 = vector.shape_cast %49 : vector<8xf32> to vector<8x1xf32>
    %51 = tpu.reciprocal %50 {approx = true} : vector<8x1xf32> -> vector<8x1xf32>
    %52 = vector.broadcast %51 : vector<8x1xf32> to vector<8x8xf32>
    %53 = arith.mulf %48, %52 : vector<8x8xf32>
    %54 = arith.truncf %53 : vector<8x8xf32> to vector<8x8xbf16>
    %cst_19 = arith.constant dense<0.000000e+00> : vector<8x8xf32>
    %55 = tpu.matmul %54, %39, %cst_19 {dimension_numbers = #tpu.dot_dimension_numbers<[1], [0], [0], [1], [0, 0, 1, 1], [], []>} : vector<8x8xbf16>, vector<8x8xbf16>, vector<8x8xf32> -> vector<8x8xf32>
    %56 = arith.truncf %55 : vector<8x8xf32> to vector<8x8xbf16>
    %57 = vector.extract_strided_slice %6 {offsets = [8, 0], sizes = [8, 32], strides = [1, 1]} : vector<32x32xbf16> to vector<8x32xbf16>
    %cst_20 = arith.constant dense<0.000000e+00> : vector<8x32xf32>
    %58 = tpu.matmul %56, %57, %cst_20 {dimension_numbers = #tpu.dot_dimension_numbers<[1], [0], [0], [1], [0, 0, 1, 1], [], []>} : vector<8x8xbf16>, vector<8x32xbf16>, vector<8x32xf32> -> vector<8x32xf32>
    %59 = arith.addf %36, %58 : vector<8x32xf32>
    %60 = vector.extract_strided_slice %2 {offsets = [0, 16], sizes = [8, 8], strides = [1, 1]} : vector<8x32xbf16> to vector<8x8xbf16>
    %61 = vector.extract_strided_slice %5 {offsets = [0, 8], sizes = [8, 8], strides = [1, 1]} : vector<8x32xbf16> to vector<8x8xbf16>
    %62 = vector.extract_strided_slice %5 {offsets = [0, 24], sizes = [8, 8], strides = [1, 1]} : vector<8x32xbf16> to vector<8x8xbf16>
    %cst_21 = arith.constant dense<0.000000e+00> : vector<8x8xf32>
    %63 = tpu.matmul %60, %61, %cst_21 {dimension_numbers = #tpu.dot_dimension_numbers<[1], [1], [0], [0], [0, 0, 1, 0], [], []>} : vector<8x8xbf16>, vector<8x8xbf16>, vector<8x8xf32> -> vector<8x8xf32>
    %cst_22 = arith.constant 0.353553385 : f32
    %64 = vector.broadcast %cst_22 : f32 to vector<8x8xf32>
    %65 = arith.mulf %63, %64 : vector<8x8xf32>
    %66 = arith.addf %65, %12 : vector<8x8xf32>
    %cst_23 = arith.constant dense<0xFF800000> : vector<8xf32>
    %67 = vector.multi_reduction <maximumf>, %66, %cst_23 [1] : vector<8x8xf32> to vector<8xf32>
    %68 = vector.shape_cast %67 : vector<8xf32> to vector<8x1xf32>
    %69 = vector.broadcast %68 : vector<8x1xf32> to vector<8x8xf32>
    %70 = arith.subf %66, %69 : vector<8x8xf32>
    %71 = math.exp %70 : vector<8x8xf32>
    %cst_24 = arith.constant dense<0.000000e+00> : vector<8xf32>
    %72 = vector.multi_reduction <add>, %71, %cst_24 [1] : vector<8x8xf32> to vector<8xf32>
    %73 = vector.shape_cast %72 : vector<8xf32> to vector<8x1xf32>
    %74 = tpu.reciprocal %73 {approx = true} : vector<8x1xf32> -> vector<8x1xf32>
    %75 = vector.broadcast %74 : vector<8x1xf32> to vector<8x8xf32>
    %76 = arith.mulf %71, %75 : vector<8x8xf32>
    %77 = arith.truncf %76 : vector<8x8xf32> to vector<8x8xbf16>
    %cst_25 = arith.constant dense<0.000000e+00> : vector<8x8xf32>
    %78 = tpu.matmul %77, %62, %cst_25 {dimension_numbers = #tpu.dot_dimension_numbers<[1], [0], [0], [1], [0, 0, 1, 1], [], []>} : vector<8x8xbf16>, vector<8x8xbf16>, vector<8x8xf32> -> vector<8x8xf32>
    %79 = arith.truncf %78 : vector<8x8xf32> to vector<8x8xbf16>
    %80 = vector.extract_strided_slice %6 {offsets = [16, 0], sizes = [8, 32], strides = [1, 1]} : vector<32x32xbf16> to vector<8x32xbf16>
    %cst_26 = arith.constant dense<0.000000e+00> : vector<8x32xf32>
    %81 = tpu.matmul %79, %80, %cst_26 {dimension_numbers = #tpu.dot_dimension_numbers<[1], [0], [0], [1], [0, 0, 1, 1], [], []>} : vector<8x8xbf16>, vector<8x32xbf16>, vector<8x32xf32> -> vector<8x32xf32>
    %82 = arith.addf %59, %81 : vector<8x32xf32>
    %83 = vector.extract_strided_slice %2 {offsets = [0, 24], sizes = [8, 8], strides = [1, 1]} : vector<8x32xbf16> to vector<8x8xbf16>
    %84 = vector.extract_strided_slice %5 {offsets = [0, 8], sizes = [8, 8], strides = [1, 1]} : vector<8x32xbf16> to vector<8x8xbf16>
    %85 = vector.extract_strided_slice %5 {offsets = [0, 24], sizes = [8, 8], strides = [1, 1]} : vector<8x32xbf16> to vector<8x8xbf16>
    %cst_27 = arith.constant dense<0.000000e+00> : vector<8x8xf32>
    %86 = tpu.matmul %83, %84, %cst_27 {dimension_numbers = #tpu.dot_dimension_numbers<[1], [1], [0], [0], [0, 0, 1, 0], [], []>} : vector<8x8xbf16>, vector<8x8xbf16>, vector<8x8xf32> -> vector<8x8xf32>
    %cst_28 = arith.constant 0.353553385 : f32
    %87 = vector.broadcast %cst_28 : f32 to vector<8x8xf32>
    %88 = arith.mulf %86, %87 : vector<8x8xf32>
    %89 = arith.addf %88, %12 : vector<8x8xf32>
    %cst_29 = arith.constant dense<0xFF800000> : vector<8xf32>
    %90 = vector.multi_reduction <maximumf>, %89, %cst_29 [1] : vector<8x8xf32> to vector<8xf32>
    %91 = vector.shape_cast %90 : vector<8xf32> to vector<8x1xf32>
    %92 = vector.broadcast %91 : vector<8x1xf32> to vector<8x8xf32>
    %93 = arith.subf %89, %92 : vector<8x8xf32>
    %94 = math.exp %93 : vector<8x8xf32>
    %cst_30 = arith.constant dense<0.000000e+00> : vector<8xf32>
    %95 = vector.multi_reduction <add>, %94, %cst_30 [1] : vector<8x8xf32> to vector<8xf32>
    %96 = vector.shape_cast %95 : vector<8xf32> to vector<8x1xf32>
    %97 = tpu.reciprocal %96 {approx = true} : vector<8x1xf32> -> vector<8x1xf32>
    %98 = vector.broadcast %97 : vector<8x1xf32> to vector<8x8xf32>
    %99 = arith.mulf %94, %98 : vector<8x8xf32>
    %100 = arith.truncf %99 : vector<8x8xf32> to vector<8x8xbf16>
    %cst_31 = arith.constant dense<0.000000e+00> : vector<8x8xf32>
    %101 = tpu.matmul %100, %85, %cst_31 {dimension_numbers = #tpu.dot_dimension_numbers<[1], [0], [0], [1], [0, 0, 1, 1], [], []>} : vector<8x8xbf16>, vector<8x8xbf16>, vector<8x8xf32> -> vector<8x8xf32>
    %102 = arith.truncf %101 : vector<8x8xf32> to vector<8x8xbf16>
    %103 = vector.extract_strided_slice %6 {offsets = [24, 0], sizes = [8, 32], strides = [1, 1]} : vector<32x32xbf16> to vector<8x32xbf16>
    %cst_32 = arith.constant dense<0.000000e+00> : vector<8x32xf32>
    %104 = tpu.matmul %102, %103, %cst_32 {dimension_numbers = #tpu.dot_dimension_numbers<[1], [0], [0], [1], [0, 0, 1, 1], [], []>} : vector<8x8xbf16>, vector<8x32xbf16>, vector<8x32xf32> -> vector<8x32xf32>
    %105 = arith.addf %82, %104 : vector<8x32xf32>
    %c0_33 = arith.constant 0 : index
    %c0_34 = arith.constant 0 : index
    %c0_35 = arith.constant 0 : index
    %106 = vector.load %arg3[%c0_33, %c0_34, %c0_35] : memref<1x8x32xf32, #tpu.memory_space<vmem>>, vector<1x8x32xf32>
    %107 = vector.shape_cast %106 : vector<1x8x32xf32> to vector<8x32xf32>
    %c0_36 = arith.constant 0 : index
    %c0_37 = arith.constant 0 : index
    %108 = vector.load %arg5[%c0_36, %c0_37] : memref<1x32xf32, #tpu.memory_space<vmem>>, vector<1x32xf32>
    %109 = vector.broadcast %108 : vector<1x32xf32> to vector<8x32xf32>
    %110 = arith.mulf %109, %105 : vector<8x32xf32>
    %111 = arith.addf %107, %110 : vector<8x32xf32>
    %c0_38 = arith.constant 0 : index
    %c0_39 = arith.constant 0 : index
    %c0_40 = arith.constant 0 : index
    %112 = vector.load %arg6[%c0_38, %c0_39, %c0_40] : memref<1x8x32xf32, #tpu.memory_space<vmem>>, vector<1x8x32xf32>
    %113 = vector.shape_cast %112 : vector<1x8x32xf32> to vector<8x32xf32>
    %114 = vector.shape_cast %111 : vector<8x32xf32> to vector<1x8x32xf32>
    tpu.vector_store %arg6[%c0_38, %c0_39, %c0_40], %114 {strides = array<i32>} : memref<1x8x32xf32, #tpu.memory_space<vmem>>, vector<1x8x32xf32>,
    return
  }
  func.func @transform_0(%arg0: i32) -> (i32, i32, i32) {
    %c0_i32 = arith.constant 0 : i32
    %c0_i32_0 = arith.constant 0 : i32
    %c0_i32_1 = arith.constant 0 : i32
    return %arg0, %c0_i32, %c0_i32_0 : i32, i32, i32
  }
  func.func @transform_1(%arg0: i32) -> (i32, i32, i32) {
    %c0_i32 = arith.constant 0 : i32
    %c0_i32_0 = arith.constant 0 : i32
    %c0_i32_1 = arith.constant 0 : i32
    return %arg0, %c0_i32, %c0_i32_0 : i32, i32, i32
  }
  func.func @transform_2(%arg0: i32) -> (i32, i32, i32) {
    %c0_i32 = arith.constant 0 : i32
    %c0_i32_0 = arith.constant 0 : i32
    %c0_i32_1 = arith.constant 0 : i32
    return %arg0, %c0_i32, %c0_i32_0 : i32, i32, i32
  }
  func.func @transform_3(%arg0: i32) -> (i32, i32) {
    %c0_i32 = arith.constant 0 : i32
    %c0_i32_0 = arith.constant 0 : i32
    %c0_i32_1 = arith.constant 0 : i32
    return %c0_i32, %c0_i32_0 : i32, i32
  }
  func.func @transform_4(%arg0: i32) -> (i32, i32) {
    %c0_i32 = arith.constant 0 : i32
    %c0_i32_0 = arith.constant 0 : i32
    %c0_i32_1 = arith.constant 0 : i32
    return %c0_i32, %c0_i32_0 : i32, i32
  }
  func.func @transform_5(%arg0: i32) -> (i32, i32, i32) {
    %c0_i32 = arith.constant 0 : i32
    %c0_i32_0 = arith.constant 0 : i32
    %c0_i32_1 = arith.constant 0 : i32
    return %arg0, %c0_i32, %c0_i32_0 : i32, i32, i32
  }
}

module attributes {stable_mosaic.version = 11 : i64} {
  func.func @attn_kernel(%arg0: i32, %arg1: memref<1x8x32xf32, #tpu.memory_space<vmem>>, %arg2: memref<1x8x32xf32, #tpu.memory_space<vmem>>, %arg3: memref<1x8x32xf32, #tpu.memory_space<vmem>>, %arg4: memref<32x32xbf16, #tpu.memory_space<vmem>>, %arg5: memref<1x32xf32, #tpu.memory_space<vmem>>, %arg6: memref<1x8x32xf32, #tpu.memory_space<vmem>>) attributes {dimension_semantics = [#tpu.dimension_semantics<parallel>], iteration_bounds = array<i64: 2>, scalar_prefetch = 0 : i64, scratch_operands = 0 : i64, tpu.core_type = #tpu.core_type<tc>, window_params = [{transform_indices = @transform_0, window_bounds = array<i64: 1, 8, 32>}, {transform_indices = @transform_1, window_bounds = array<i64: 1, 8, 32>}, {transform_indices = @transform_2, window_bounds = array<i64: 1, 8, 32>}, {pipeline_mode = #tpu.pipeline_mode<synchronous>, transform_indices = @transform_3, window_bounds = array<i64: 32, 32>}, {pipeline_mode = #tpu.pipeline_mode<synchronous>, transform_indices = @transform_4, window_bounds = array<i64: 1, 32>}, {transform_indices = @transform_5, window_bounds = array<i64: 1, 8, 32>}]} {
    %c0 = arith.constant 0 : index
    %c0_0 = arith.constant 0 : index
    %c0_1 = arith.constant 0 : index
    %0 = vector.load %arg1[%c0, %c0_0, %c0_1] : memref<1x8x32xf32, #tpu.memory_space<vmem>>, vector<1x8x32xf32>
    %1 = vector.shape_cast %0 : vector<1x8x32xf32> to vector<8x32xf32>
    %2 = arith.truncf %1 : vector<8x32xf32> to vector<8x32xbf16>
    %c0_2 = arith.constant 0 : index
    %c0_3 = arith.constant 0 : index
    %c0_4 = arith.constant 0 : index
    %3 = vector.load %arg2[%c0_2, %c0_3, %c0_4] : memref<1x8x32xf32, #tpu.memory_space<vmem>>, vector<1x8x32xf32>
    %4 = vector.shape_cast %3 : vector<1x8x32xf32> to vector<8x32xf32>
    %5 = arith.truncf %4 : vector<8x32xf32> to vector<8x32xbf16>
    %c0_5 = arith.constant 0 : index
    %c0_6 = arith.constant 0 : index
    %6 = vector.load %arg4[%c0_5, %c0_6] : memref<32x32xbf16, #tpu.memory_space<vmem>>, vector<32x32xbf16>
    %cst = arith.constant 0.000000e+00 : f32
    %7 = vector.broadcast %cst : f32 to vector<8x32xf32>
    %8 = vector.extract_strided_slice %2 {offsets = [0, 0], sizes = [8, 8], strides = [1, 1]} : vector<8x32xbf16> to vector<8x8xbf16>
    %9 = vector.extract_strided_slice %5 {offsets = [0, 0], sizes = [8, 8], strides = [1, 1]} : vector<8x32xbf16> to vector<8x8xbf16>
    %10 = vector.extract_strided_slice %5 {offsets = [0, 16], sizes = [8, 8], strides = [1, 1]} : vector<8x32xbf16> to vector<8x8xbf16>
    %cst_7 = arith.constant dense<0.000000e+00> : vector<8x8xf32>
    %11 = tpu.matmul %8, %9, %cst_7 {dimension_numbers = #tpu.dot_dimension_numbers<[1], [1], [0], [0], [0, 0, 1, 0], [], []>} : vector<8x8xbf16>, vector<8x8xbf16>, vector<8x8xf32> -> vector<8x8xf32>
    %cst_8 = arith.constant 0.353553385 : f32
    %12 = vector.broadcast %cst_8 : f32 to vector<8x8xf32>
    %13 = arith.mulf %11, %12 : vector<8x8xf32>
    %cst_9 = arith.constant dense<0xFF800000> : vector<8xf32>
    %14 = vector.multi_reduction <maximumf>, %13, %cst_9 [1] : vector<8x8xf32> to vector<8xf32>
    %15 = vector.shape_cast %14 : vector<8xf32> to vector<8x1xf32>
    %16 = vector.broadcast %15 : vector<8x1xf32> to vector<8x8xf32>
    %17 = arith.subf %13, %16 : vector<8x8xf32>
    %18 = math.exp %17 : vector<8x8xf32>
    %cst_10 = arith.constant dense<0.000000e+00> : vector<8xf32>
    %19 = vector.multi_reduction <add>, %18, %cst_10 [1] : vector<8x8xf32> to vector<8xf32>
    %20 = vector.shape_cast %19 : vector<8xf32> to vector<8x1xf32>
    %21 = tpu.reciprocal %20 {approx = true} : vector<8x1xf32> -> vector<8x1xf32>
    %22 = vector.broadcast %21 : vector<8x1xf32> to vector<8x8xf32>
    %23 = arith.mulf %18, %22 : vector<8x8xf32>
    %24 = arith.truncf %23 : vector<8x8xf32> to vector<8x8xbf16>
    %cst_11 = arith.constant dense<0.000000e+00> : vector<8x8xf32>
    %25 = tpu.matmul %24, %10, %cst_11 {dimension_numbers = #tpu.dot_dimension_numbers<[1], [0], [0], [1], [0, 0, 1, 1], [], []>} : vector<8x8xbf16>, vector<8x8xbf16>, vector<8x8xf32> -> vector<8x8xf32>
    %26 = arith.truncf %25 : vector<8x8xf32> to vector<8x8xbf16>
    %27 = vector.extract_strided_slice %6 {offsets = [0, 0], sizes = [8, 32], strides = [1, 1]} : vector<32x32xbf16> to vector<8x32xbf16>
    %cst_12 = arith.constant dense<0.000000e+00> : vector<8x32xf32>
    %28 = tpu.matmul %26, %27, %cst_12 {dimension_numbers = #tpu.dot_dimension_numbers<[1], [0], [0], [1], [0, 0, 1, 1], [], []>} : vector<8x8xbf16>, vector<8x32xbf16>, vector<8x32xf32> -> vector<8x32xf32>
    %29 = arith.addf %7, %28 : vector<8x32xf32>
    %30 = vector.extract_strided_slice %2 {offsets = [0, 8], sizes = [8, 8], strides = [1, 1]} : vector<8x32xbf16> to vector<8x8xbf16>
    %31 = vector.extract_strided_slice %5 {offsets = [0, 0], sizes = [8, 8], strides = [1, 1]} : vector<8x32xbf16> to vector<8x8xbf16>
    %32 = vector.extract_strided_slice %5 {offsets = [0, 16], sizes = [8, 8], strides = [1, 1]} : vector<8x32xbf16> to vector<8x8xbf16>
    %cst_13 = arith.constant dense<0.000000e+00> : vector<8x8xf32>
    %33 = tpu.matmul %30, %31, %cst_13 {dimension_numbers = #tpu.dot_dimension_numbers<[1], [1], [0], [0], [0, 0, 1, 0], [], []>} : vector<8x8xbf16>, vector<8x8xbf16>, vector<8x8xf32> -> vector<8x8xf32>
    %cst_14 = arith.constant 0.353553385 : f32
    %34 = vector.broadcast %cst_14 : f32 to vector<8x8xf32>
    %35 = arith.mulf %33, %34 : vector<8x8xf32>
    %cst_15 = arith.constant dense<0xFF800000> : vector<8xf32>
    %36 = vector.multi_reduction <maximumf>, %35, %cst_15 [1] : vector<8x8xf32> to vector<8xf32>
    %37 = vector.shape_cast %36 : vector<8xf32> to vector<8x1xf32>
    %38 = vector.broadcast %37 : vector<8x1xf32> to vector<8x8xf32>
    %39 = arith.subf %35, %38 : vector<8x8xf32>
    %40 = math.exp %39 : vector<8x8xf32>
    %cst_16 = arith.constant dense<0.000000e+00> : vector<8xf32>
    %41 = vector.multi_reduction <add>, %40, %cst_16 [1] : vector<8x8xf32> to vector<8xf32>
    %42 = vector.shape_cast %41 : vector<8xf32> to vector<8x1xf32>
    %43 = tpu.reciprocal %42 {approx = true} : vector<8x1xf32> -> vector<8x1xf32>
    %44 = vector.broadcast %43 : vector<8x1xf32> to vector<8x8xf32>
    %45 = arith.mulf %40, %44 : vector<8x8xf32>
    %46 = arith.truncf %45 : vector<8x8xf32> to vector<8x8xbf16>
    %cst_17 = arith.constant dense<0.000000e+00> : vector<8x8xf32>
    %47 = tpu.matmul %46, %32, %cst_17 {dimension_numbers = #tpu.dot_dimension_numbers<[1], [0], [0], [1], [0, 0, 1, 1], [], []>} : vector<8x8xbf16>, vector<8x8xbf16>, vector<8x8xf32> -> vector<8x8xf32>
    %48 = arith.truncf %47 : vector<8x8xf32> to vector<8x8xbf16>
    %49 = vector.extract_strided_slice %6 {offsets = [8, 0], sizes = [8, 32], strides = [1, 1]} : vector<32x32xbf16> to vector<8x32xbf16>
    %cst_18 = arith.constant dense<0.000000e+00> : vector<8x32xf32>
    %50 = tpu.matmul %48, %49, %cst_18 {dimension_numbers = #tpu.dot_dimension_numbers<[1], [0], [0], [1], [0, 0, 1, 1], [], []>} : vector<8x8xbf16>, vector<8x32xbf16>, vector<8x32xf32> -> vector<8x32xf32>
    %51 = arith.addf %29, %50 : vector<8x32xf32>
    %52 = vector.extract_strided_slice %2 {offsets = [0, 16], sizes = [8, 8], strides = [1, 1]} : vector<8x32xbf16> to vector<8x8xbf16>
    %53 = vector.extract_strided_slice %5 {offsets = [0, 8], sizes = [8, 8], strides = [1, 1]} : vector<8x32xbf16> to vector<8x8xbf16>
    %54 = vector.extract_strided_slice %5 {offsets = [0, 24], sizes = [8, 8], strides = [1, 1]} : vector<8x32xbf16> to vector<8x8xbf16>
    %cst_19 = arith.constant dense<0.000000e+00> : vector<8x8xf32>
    %55 = tpu.matmul %52, %53, %cst_19 {dimension_numbers = #tpu.dot_dimension_numbers<[1], [1], [0], [0], [0, 0, 1, 0], [], []>} : vector<8x8xbf16>, vector<8x8xbf16>, vector<8x8xf32> -> vector<8x8xf32>
    %cst_20 = arith.constant 0.353553385 : f32
    %56 = vector.broadcast %cst_20 : f32 to vector<8x8xf32>
    %57 = arith.mulf %55, %56 : vector<8x8xf32>
    %cst_21 = arith.constant dense<0xFF800000> : vector<8xf32>
    %58 = vector.multi_reduction <maximumf>, %57, %cst_21 [1] : vector<8x8xf32> to vector<8xf32>
    %59 = vector.shape_cast %58 : vector<8xf32> to vector<8x1xf32>
    %60 = vector.broadcast %59 : vector<8x1xf32> to vector<8x8xf32>
    %61 = arith.subf %57, %60 : vector<8x8xf32>
    %62 = math.exp %61 : vector<8x8xf32>
    %cst_22 = arith.constant dense<0.000000e+00> : vector<8xf32>
    %63 = vector.multi_reduction <add>, %62, %cst_22 [1] : vector<8x8xf32> to vector<8xf32>
    %64 = vector.shape_cast %63 : vector<8xf32> to vector<8x1xf32>
    %65 = tpu.reciprocal %64 {approx = true} : vector<8x1xf32> -> vector<8x1xf32>
    %66 = vector.broadcast %65 : vector<8x1xf32> to vector<8x8xf32>
    %67 = arith.mulf %62, %66 : vector<8x8xf32>
    %68 = arith.truncf %67 : vector<8x8xf32> to vector<8x8xbf16>
    %cst_23 = arith.constant dense<0.000000e+00> : vector<8x8xf32>
    %69 = tpu.matmul %68, %54, %cst_23 {dimension_numbers = #tpu.dot_dimension_numbers<[1], [0], [0], [1], [0, 0, 1, 1], [], []>} : vector<8x8xbf16>, vector<8x8xbf16>, vector<8x8xf32> -> vector<8x8xf32>
    %70 = arith.truncf %69 : vector<8x8xf32> to vector<8x8xbf16>
    %71 = vector.extract_strided_slice %6 {offsets = [16, 0], sizes = [8, 32], strides = [1, 1]} : vector<32x32xbf16> to vector<8x32xbf16>
    %cst_24 = arith.constant dense<0.000000e+00> : vector<8x32xf32>
    %72 = tpu.matmul %70, %71, %cst_24 {dimension_numbers = #tpu.dot_dimension_numbers<[1], [0], [0], [1], [0, 0, 1, 1], [], []>} : vector<8x8xbf16>, vector<8x32xbf16>, vector<8x32xf32> -> vector<8x32xf32>
    %73 = arith.addf %51, %72 : vector<8x32xf32>
    %74 = vector.extract_strided_slice %2 {offsets = [0, 24], sizes = [8, 8], strides = [1, 1]} : vector<8x32xbf16> to vector<8x8xbf16>
    %75 = vector.extract_strided_slice %5 {offsets = [0, 8], sizes = [8, 8], strides = [1, 1]} : vector<8x32xbf16> to vector<8x8xbf16>
    %76 = vector.extract_strided_slice %5 {offsets = [0, 24], sizes = [8, 8], strides = [1, 1]} : vector<8x32xbf16> to vector<8x8xbf16>
    %cst_25 = arith.constant dense<0.000000e+00> : vector<8x8xf32>
    %77 = tpu.matmul %74, %75, %cst_25 {dimension_numbers = #tpu.dot_dimension_numbers<[1], [1], [0], [0], [0, 0, 1, 0], [], []>} : vector<8x8xbf16>, vector<8x8xbf16>, vector<8x8xf32> -> vector<8x8xf32>
    %cst_26 = arith.constant 0.353553385 : f32
    %78 = vector.broadcast %cst_26 : f32 to vector<8x8xf32>
    %79 = arith.mulf %77, %78 : vector<8x8xf32>
    %cst_27 = arith.constant dense<0xFF800000> : vector<8xf32>
    %80 = vector.multi_reduction <maximumf>, %79, %cst_27 [1] : vector<8x8xf32> to vector<8xf32>
    %81 = vector.shape_cast %80 : vector<8xf32> to vector<8x1xf32>
    %82 = vector.broadcast %81 : vector<8x1xf32> to vector<8x8xf32>
    %83 = arith.subf %79, %82 : vector<8x8xf32>
    %84 = math.exp %83 : vector<8x8xf32>
    %cst_28 = arith.constant dense<0.000000e+00> : vector<8xf32>
    %85 = vector.multi_reduction <add>, %84, %cst_28 [1] : vector<8x8xf32> to vector<8xf32>
    %86 = vector.shape_cast %85 : vector<8xf32> to vector<8x1xf32>
    %87 = tpu.reciprocal %86 {approx = true} : vector<8x1xf32> -> vector<8x1xf32>
    %88 = vector.broadcast %87 : vector<8x1xf32> to vector<8x8xf32>
    %89 = arith.mulf %84, %88 : vector<8x8xf32>
    %90 = arith.truncf %89 : vector<8x8xf32> to vector<8x8xbf16>
    %cst_29 = arith.constant dense<0.000000e+00> : vector<8x8xf32>
    %91 = tpu.matmul %90, %76, %cst_29 {dimension_numbers = #tpu.dot_dimension_numbers<[1], [0], [0], [1], [0, 0, 1, 1], [], []>} : vector<8x8xbf16>, vector<8x8xbf16>, vector<8x8xf32> -> vector<8x8xf32>
    %92 = arith.truncf %91 : vector<8x8xf32> to vector<8x8xbf16>
    %93 = vector.extract_strided_slice %6 {offsets = [24, 0], sizes = [8, 32], strides = [1, 1]} : vector<32x32xbf16> to vector<8x32xbf16>
    %cst_30 = arith.constant dense<0.000000e+00> : vector<8x32xf32>
    %94 = tpu.matmul %92, %93, %cst_30 {dimension_numbers = #tpu.dot_dimension_numbers<[1], [0], [0], [1], [0, 0, 1, 1], [], []>} : vector<8x8xbf16>, vector<8x32xbf16>, vector<8x32xf32> -> vector<8x32xf32>
    %95 = arith.addf %73, %94 : vector<8x32xf32>
    %c0_31 = arith.constant 0 : index
    %c0_32 = arith.constant 0 : index
    %c0_33 = arith.constant 0 : index
    %96 = vector.load %arg3[%c0_31, %c0_32, %c0_33] : memref<1x8x32xf32, #tpu.memory_space<vmem>>, vector<1x8x32xf32>
    %97 = vector.shape_cast %96 : vector<1x8x32xf32> to vector<8x32xf32>
    %c0_34 = arith.constant 0 : index
    %c0_35 = arith.constant 0 : index
    %98 = vector.load %arg5[%c0_34, %c0_35] : memref<1x32xf32, #tpu.memory_space<vmem>>, vector<1x32xf32>
    %99 = vector.broadcast %98 : vector<1x32xf32> to vector<8x32xf32>
    %100 = arith.mulf %99, %95 : vector<8x32xf32>
    %101 = arith.addf %97, %100 : vector<8x32xf32>
    %c0_36 = arith.constant 0 : index
    %c0_37 = arith.constant 0 : index
    %c0_38 = arith.constant 0 : index
    %102 = vector.load %arg6[%c0_36, %c0_37, %c0_38] : memref<1x8x32xf32, #tpu.memory_space<vmem>>, vector<1x8x32xf32>
    %103 = vector.shape_cast %102 : vector<1x8x32xf32> to vector<8x32xf32>
    %104 = vector.shape_cast %101 : vector<8x32xf32> to vector<1x8x32xf32>
    tpu.vector_store %arg6[%c0_36, %c0_37, %c0_38], %104 {strides = array<i32>} : memref<1x8x32xf32, #tpu.memory_space<vmem>>, vector<1x8x32xf32>,
    return
  }
  func.func @transform_0(%arg0: i32) -> (i32, i32, i32) {
    %c0_i32 = arith.constant 0 : i32
    %c0_i32_0 = arith.constant 0 : i32
    %c0_i32_1 = arith.constant 0 : i32
    return %arg0, %c0_i32, %c0_i32_0 : i32, i32, i32
  }
  func.func @transform_1(%arg0: i32) -> (i32, i32, i32) {
    %c0_i32 = arith.constant 0 : i32
    %c0_i32_0 = arith.constant 0 : i32
    %c0_i32_1 = arith.constant 0 : i32
    return %arg0, %c0_i32, %c0_i32_0 : i32, i32, i32
  }
  func.func @transform_2(%arg0: i32) -> (i32, i32, i32) {
    %c0_i32 = arith.constant 0 : i32
    %c0_i32_0 = arith.constant 0 : i32
    %c0_i32_1 = arith.constant 0 : i32
    return %arg0, %c0_i32, %c0_i32_0 : i32, i32, i32
  }
  func.func @transform_3(%arg0: i32) -> (i32, i32) {
    %c0_i32 = arith.constant 0 : i32
    %c0_i32_0 = arith.constant 0 : i32
    %c0_i32_1 = arith.constant 0 : i32
    return %c0_i32, %c0_i32_0 : i32, i32
  }
  func.func @transform_4(%arg0: i32) -> (i32, i32) {
    %c0_i32 = arith.constant 0 : i32
    %c0_i32_0 = arith.constant 0 : i32
    %c0_i32_1 = arith.constant 0 : i32
    return %c0_i32, %c0_i32_0 : i32, i32
  }
  func.func @transform_5(%arg0: i32) -> (i32, i32, i32) {
    %c0_i32 = arith.constant 0 : i32
    %c0_i32_0 = arith.constant 0 : i32
    %c0_i32_1 = arith.constant 0 : i32
    return %arg0, %c0_i32, %c0_i32_0 : i32, i32, i32
  }
}

module attributes {stable_mosaic.version = 11 : i64} {
  func.func @moe_kernel(%arg0: i32, %arg1: memref<1x8x32xf32, #tpu.memory_space<vmem>>, %arg2: memref<1x32xf32, #tpu.memory_space<vmem>>, %arg3: memref<32x4xbf16, #tpu.memory_space<vmem>>, %arg4: memref<4x32x256xbf16, #tpu.memory_space<vmem>>, %arg5: memref<4x128x32xbf16, #tpu.memory_space<vmem>>, %arg6: memref<1x8x32xf32, #tpu.memory_space<vmem>>, %arg7: memref<1x8x4xf32, #tpu.memory_space<vmem>>) attributes {dimension_semantics = [#tpu.dimension_semantics<parallel>], iteration_bounds = array<i64: 2>, scalar_prefetch = 0 : i64, scratch_operands = 0 : i64, tpu.core_type = #tpu.core_type<tc>, window_params = [{transform_indices = @transform_0, window_bounds = array<i64: 1, 8, 32>}, {pipeline_mode = #tpu.pipeline_mode<synchronous>, transform_indices = @transform_1, window_bounds = array<i64: 1, 32>}, {pipeline_mode = #tpu.pipeline_mode<synchronous>, transform_indices = @transform_2, window_bounds = array<i64: 32, 4>}, {pipeline_mode = #tpu.pipeline_mode<synchronous>, transform_indices = @transform_3, window_bounds = array<i64: 4, 32, 256>}, {pipeline_mode = #tpu.pipeline_mode<synchronous>, transform_indices = @transform_4, window_bounds = array<i64: 4, 128, 32>}, {transform_indices = @transform_5, window_bounds = array<i64: 1, 8, 32>}, {transform_indices = @transform_6, window_bounds = array<i64: 1, 8, 4>}]} {
    %c0 = arith.constant 0 : index
    %c0_0 = arith.constant 0 : index
    %c0_1 = arith.constant 0 : index
    %0 = vector.load %arg1[%c0, %c0_0, %c0_1] : memref<1x8x32xf32, #tpu.memory_space<vmem>>, vector<1x8x32xf32>
    %1 = vector.shape_cast %0 : vector<1x8x32xf32> to vector<8x32xf32>
    %c0_2 = arith.constant 0 : index
    %c0_3 = arith.constant 0 : index
    %2 = vector.load %arg2[%c0_2, %c0_3] : memref<1x32xf32, #tpu.memory_space<vmem>>, vector<1x32xf32>
    %3 = arith.mulf %1, %1 : vector<8x32xf32>
    %cst = arith.constant dense<0.000000e+00> : vector<8xf32>
    %4 = vector.multi_reduction <add>, %3, %cst [1] : vector<8x32xf32> to vector<8xf32>
    %5 = vector.shape_cast %4 : vector<8xf32> to vector<8x1xf32>
    %cst_4 = arith.constant 3.200000e+01 : f32
    %6 = vector.broadcast %cst_4 : f32 to vector<8x1xf32>
    %7 = arith.divf %5, %6 : vector<8x1xf32>
    %cst_5 = arith.constant 9.99999997E-7 : f32
    %8 = vector.broadcast %cst_5 : f32 to vector<8x1xf32>
    %9 = arith.addf %7, %8 : vector<8x1xf32>
    %10 = math.rsqrt %9 : vector<8x1xf32>
    %11 = vector.broadcast %10 : vector<8x1xf32> to vector<8x32xf32>
    %12 = arith.mulf %1, %11 : vector<8x32xf32>
    %13 = vector.broadcast %2 : vector<1x32xf32> to vector<8x32xf32>
    %14 = arith.mulf %12, %13 : vector<8x32xf32>
    %15 = arith.truncf %14 : vector<8x32xf32> to vector<8x32xbf16>
    %c0_6 = arith.constant 0 : index
    %c0_7 = arith.constant 0 : index
    %16 = vector.load %arg3[%c0_6, %c0_7] : memref<32x4xbf16, #tpu.memory_space<vmem>>, vector<32x4xbf16>
    %cst_8 = arith.constant dense<0.000000e+00> : vector<8x4xf32>
    %17 = tpu.matmul %15, %16, %cst_8 {dimension_numbers = #tpu.dot_dimension_numbers<[1], [0], [0], [1], [0, 0, 1, 1], [], []>} : vector<8x32xbf16>, vector<32x4xbf16>, vector<8x4xf32> -> vector<8x4xf32>
    %c0_9 = arith.constant 0 : index
    %c0_10 = arith.constant 0 : index
    %c0_11 = arith.constant 0 : index
    %18 = vector.load %arg7[%c0_9, %c0_10, %c0_11] : memref<1x8x4xf32, #tpu.memory_space<vmem>>, vector<1x8x4xf32>
    %19 = vector.shape_cast %18 : vector<1x8x4xf32> to vector<8x4xf32>
    %20 = vector.shape_cast %17 : vector<8x4xf32> to vector<1x8x4xf32>
    tpu.vector_store %arg7[%c0_9, %c0_10, %c0_11], %20 {strides = array<i32>} : memref<1x8x4xf32, #tpu.memory_space<vmem>>, vector<1x8x4xf32>,
    %cst_12 = arith.constant dense<0xFF800000> : vector<8xf32>
    %21 = vector.multi_reduction <maximumf>, %17, %cst_12 [1] : vector<8x4xf32> to vector<8xf32>
    %22 = vector.shape_cast %21 : vector<8xf32> to vector<8x1xf32>
    %23 = vector.broadcast %22 : vector<8x1xf32> to vector<8x4xf32>
    %24 = arith.subf %17, %23 : vector<8x4xf32>
    %25 = math.exp %24 : vector<8x4xf32>
    %cst_13 = arith.constant dense<0.000000e+00> : vector<8xf32>
    %26 = vector.multi_reduction <add>, %25, %cst_13 [1] : vector<8x4xf32> to vector<8xf32>
    %27 = vector.shape_cast %26 : vector<8xf32> to vector<8x1xf32>
    %28 = vector.broadcast %27 : vector<8x1xf32> to vector<8x4xf32>
    %29 = arith.divf %25, %28 : vector<8x4xf32>
    %30 = vector.extract_strided_slice %29 {offsets = [0, 0], sizes = [8, 1], strides = [1, 1]} : vector<8x4xf32> to vector<8x1xf32>
    %31 = vector.extract_strided_slice %29 {offsets = [0, 1], sizes = [8, 1], strides = [1, 1]} : vector<8x4xf32> to vector<8x1xf32>
    %32 = vector.extract_strided_slice %29 {offsets = [0, 2], sizes = [8, 1], strides = [1, 1]} : vector<8x4xf32> to vector<8x1xf32>
    %33 = vector.extract_strided_slice %29 {offsets = [0, 3], sizes = [8, 1], strides = [1, 1]} : vector<8x4xf32> to vector<8x1xf32>
    %cst_14 = arith.constant 0.000000e+00 : f32
    %34 = vector.broadcast %cst_14 : f32 to vector<8x1xf32>
    %35 = arith.cmpf ogt, %31, %30 : vector<8x1xf32>
    %36 = arith.extui %35 : vector<8x1xi1> to vector<8x1xi32>
    %37 = arith.sitofp %36 : vector<8x1xi32> to vector<8x1xf32>
    %38 = arith.addf %34, %37 : vector<8x1xf32>
    %39 = arith.cmpf ogt, %32, %30 : vector<8x1xf32>
    %40 = arith.extui %39 : vector<8x1xi1> to vector<8x1xi32>
    %41 = arith.sitofp %40 : vector<8x1xi32> to vector<8x1xf32>
    %42 = arith.addf %38, %41 : vector<8x1xf32>
    %43 = arith.cmpf ogt, %33, %30 : vector<8x1xf32>
    %44 = arith.extui %43 : vector<8x1xi1> to vector<8x1xi32>
    %45 = arith.sitofp %44 : vector<8x1xi32> to vector<8x1xf32>
    %46 = arith.addf %42, %45 : vector<8x1xf32>
    %cst_15 = arith.constant 2.000000e+00 : f32
    %47 = vector.broadcast %cst_15 : f32 to vector<8x1xf32>
    %48 = arith.cmpf olt, %46, %47 : vector<8x1xf32>
    %cst_16 = arith.constant 0.000000e+00 : f32
    %49 = vector.broadcast %cst_16 : f32 to vector<8x1xf32>
    %50 = arith.select %48, %30, %49 : vector<8x1xi1>, vector<8x1xf32>
    %cst_17 = arith.constant 0.000000e+00 : f32
    %51 = vector.broadcast %cst_17 : f32 to vector<8x1xf32>
    %52 = arith.cmpf ogt, %30, %31 : vector<8x1xf32>
    %53 = arith.cmpf oeq, %30, %31 : vector<8x1xf32>
    %54 = arith.ori %52, %53 : vector<8x1xi1>
    %55 = arith.extui %54 : vector<8x1xi1> to vector<8x1xi32>
    %56 = arith.sitofp %55 : vector<8x1xi32> to vector<8x1xf32>
    %57 = arith.addf %51, %56 : vector<8x1xf32>
    %58 = arith.cmpf ogt, %32, %31 : vector<8x1xf32>
    %59 = arith.extui %58 : vector<8x1xi1> to vector<8x1xi32>
    %60 = arith.sitofp %59 : vector<8x1xi32> to vector<8x1xf32>
    %61 = arith.addf %57, %60 : vector<8x1xf32>
    %62 = arith.cmpf ogt, %33, %31 : vector<8x1xf32>
    %63 = arith.extui %62 : vector<8x1xi1> to vector<8x1xi32>
    %64 = arith.sitofp %63 : vector<8x1xi32> to vector<8x1xf32>
    %65 = arith.addf %61, %64 : vector<8x1xf32>
    %cst_18 = arith.constant 2.000000e+00 : f32
    %66 = vector.broadcast %cst_18 : f32 to vector<8x1xf32>
    %67 = arith.cmpf olt, %65, %66 : vector<8x1xf32>
    %cst_19 = arith.constant 0.000000e+00 : f32
    %68 = vector.broadcast %cst_19 : f32 to vector<8x1xf32>
    %69 = arith.select %67, %31, %68 : vector<8x1xi1>, vector<8x1xf32>
    %cst_20 = arith.constant 0.000000e+00 : f32
    %70 = vector.broadcast %cst_20 : f32 to vector<8x1xf32>
    %71 = arith.cmpf ogt, %30, %32 : vector<8x1xf32>
    %72 = arith.cmpf oeq, %30, %32 : vector<8x1xf32>
    %73 = arith.ori %71, %72 : vector<8x1xi1>
    %74 = arith.extui %73 : vector<8x1xi1> to vector<8x1xi32>
    %75 = arith.sitofp %74 : vector<8x1xi32> to vector<8x1xf32>
    %76 = arith.addf %70, %75 : vector<8x1xf32>
    %77 = arith.cmpf ogt, %31, %32 : vector<8x1xf32>
    %78 = arith.cmpf oeq, %31, %32 : vector<8x1xf32>
    %79 = arith.ori %77, %78 : vector<8x1xi1>
    %80 = arith.extui %79 : vector<8x1xi1> to vector<8x1xi32>
    %81 = arith.sitofp %80 : vector<8x1xi32> to vector<8x1xf32>
    %82 = arith.addf %76, %81 : vector<8x1xf32>
    %83 = arith.cmpf ogt, %33, %32 : vector<8x1xf32>
    %84 = arith.extui %83 : vector<8x1xi1> to vector<8x1xi32>
    %85 = arith.sitofp %84 : vector<8x1xi32> to vector<8x1xf32>
    %86 = arith.addf %82, %85 : vector<8x1xf32>
    %cst_21 = arith.constant 2.000000e+00 : f32
    %87 = vector.broadcast %cst_21 : f32 to vector<8x1xf32>
    %88 = arith.cmpf olt, %86, %87 : vector<8x1xf32>
    %cst_22 = arith.constant 0.000000e+00 : f32
    %89 = vector.broadcast %cst_22 : f32 to vector<8x1xf32>
    %90 = arith.select %88, %32, %89 : vector<8x1xi1>, vector<8x1xf32>
    %cst_23 = arith.constant 0.000000e+00 : f32
    %91 = vector.broadcast %cst_23 : f32 to vector<8x1xf32>
    %92 = arith.cmpf ogt, %30, %33 : vector<8x1xf32>
    %93 = arith.cmpf oeq, %30, %33 : vector<8x1xf32>
    %94 = arith.ori %92, %93 : vector<8x1xi1>
    %95 = arith.extui %94 : vector<8x1xi1> to vector<8x1xi32>
    %96 = arith.sitofp %95 : vector<8x1xi32> to vector<8x1xf32>
    %97 = arith.addf %91, %96 : vector<8x1xf32>
    %98 = arith.cmpf ogt, %31, %33 : vector<8x1xf32>
    %99 = arith.cmpf oeq, %31, %33 : vector<8x1xf32>
    %100 = arith.ori %98, %99 : vector<8x1xi1>
    %101 = arith.extui %100 : vector<8x1xi1> to vector<8x1xi32>
    %102 = arith.sitofp %101 : vector<8x1xi32> to vector<8x1xf32>
    %103 = arith.addf %97, %102 : vector<8x1xf32>
    %104 = arith.cmpf ogt, %32, %33 : vector<8x1xf32>
    %105 = arith.cmpf oeq, %32, %33 : vector<8x1xf32>
    %106 = arith.ori %104, %105 : vector<8x1xi1>
    %107 = arith.extui %106 : vector<8x1xi1> to vector<8x1xi32>
    %108 = arith.sitofp %107 : vector<8x1xi32> to vector<8x1xf32>
    %109 = arith.addf %103, %108 : vector<8x1xf32>
    %cst_24 = arith.constant 2.000000e+00 : f32
    %110 = vector.broadcast %cst_24 : f32 to vector<8x1xf32>
    %111 = arith.cmpf olt, %109, %110 : vector<8x1xf32>
    %cst_25 = arith.constant 0.000000e+00 : f32
    %112 = vector.broadcast %cst_25 : f32 to vector<8x1xf32>
    %113 = arith.select %111, %33, %112 : vector<8x1xi1>, vector<8x1xf32>
    %cst_26 = arith.constant 0.000000e+00 : f32
    %114 = vector.broadcast %cst_26 : f32 to vector<8x32xf32>
    %c0_27 = arith.constant 0 : index
    %c0_28 = arith.constant 0 : index
    %c0_29 = arith.constant 0 : index
    %115 = vector.load %arg4[%c0_27, %c0_28, %c0_29] : memref<4x32x256xbf16, #tpu.memory_space<vmem>>, vector<1x32x256xbf16>
    %116 = vector.shape_cast %115 : vector<1x32x256xbf16> to vector<32x256xbf16>
    %cst_30 = arith.constant dense<0.000000e+00> : vector<8x256xf32>
    %117 = tpu.matmul %15, %116, %cst_30 {dimension_numbers = #tpu.dot_dimension_numbers<[1], [0], [0], [1], [0, 0, 1, 1], [], []>} : vector<8x32xbf16>, vector<32x256xbf16>, vector<8x256xf32> -> vector<8x256xf32>
    %118 = vector.extract_strided_slice %117 {offsets = [0, 0], sizes = [8, 128], strides = [1, 1]} : vector<8x256xf32> to vector<8x128xf32>
    %119 = vector.extract_strided_slice %117 {offsets = [0, 128], sizes = [8, 128], strides = [1, 1]} : vector<8x256xf32> to vector<8x128xf32>
    %120 = arith.negf %118 : vector<8x128xf32>
    %121 = math.exp %120 : vector<8x128xf32>
    %cst_31 = arith.constant 1.000000e+00 : f32
    %122 = vector.broadcast %cst_31 : f32 to vector<8x128xf32>
    %123 = arith.addf %122, %121 : vector<8x128xf32>
    %124 = arith.divf %122, %123 : vector<8x128xf32>
    %125 = arith.mulf %118, %124 : vector<8x128xf32>
    %126 = arith.mulf %125, %119 : vector<8x128xf32>
    %127 = arith.truncf %126 : vector<8x128xf32> to vector<8x128xbf16>
    %c0_32 = arith.constant 0 : index
    %c0_33 = arith.constant 0 : index
    %c0_34 = arith.constant 0 : index
    %128 = vector.load %arg5[%c0_32, %c0_33, %c0_34] : memref<4x128x32xbf16, #tpu.memory_space<vmem>>, vector<1x128x32xbf16>
    %129 = vector.shape_cast %128 : vector<1x128x32xbf16> to vector<128x32xbf16>
    %cst_35 = arith.constant dense<0.000000e+00> : vector<8x32xf32>
    %130 = tpu.matmul %127, %129, %cst_35 {dimension_numbers = #tpu.dot_dimension_numbers<[1], [0], [0], [1], [0, 0, 1, 1], [], []>} : vector<8x128xbf16>, vector<128x32xbf16>, vector<8x32xf32> -> vector<8x32xf32>
    %131 = vector.broadcast %50 : vector<8x1xf32> to vector<8x32xf32>
    %132 = arith.mulf %131, %130 : vector<8x32xf32>
    %133 = arith.addf %114, %132 : vector<8x32xf32>
    %c1 = arith.constant 1 : index
    %c0_36 = arith.constant 0 : index
    %c0_37 = arith.constant 0 : index
    %134 = vector.load %arg4[%c1, %c0_36, %c0_37] : memref<4x32x256xbf16, #tpu.memory_space<vmem>>, vector<1x32x256xbf16>
    %135 = vector.shape_cast %134 : vector<1x32x256xbf16> to vector<32x256xbf16>
    %cst_38 = arith.constant dense<0.000000e+00> : vector<8x256xf32>
    %136 = tpu.matmul %15, %135, %cst_38 {dimension_numbers = #tpu.dot_dimension_numbers<[1], [0], [0], [1], [0, 0, 1, 1], [], []>} : vector<8x32xbf16>, vector<32x256xbf16>, vector<8x256xf32> -> vector<8x256xf32>
    %137 = vector.extract_strided_slice %136 {offsets = [0, 0], sizes = [8, 128], strides = [1, 1]} : vector<8x256xf32> to vector<8x128xf32>
    %138 = vector.extract_strided_slice %136 {offsets = [0, 128], sizes = [8, 128], strides = [1, 1]} : vector<8x256xf32> to vector<8x128xf32>
    %139 = arith.negf %137 : vector<8x128xf32>
    %140 = math.exp %139 : vector<8x128xf32>
    %cst_39 = arith.constant 1.000000e+00 : f32
    %141 = vector.broadcast %cst_39 : f32 to vector<8x128xf32>
    %142 = arith.addf %141, %140 : vector<8x128xf32>
    %143 = arith.divf %141, %142 : vector<8x128xf32>
    %144 = arith.mulf %137, %143 : vector<8x128xf32>
    %145 = arith.mulf %144, %138 : vector<8x128xf32>
    %146 = arith.truncf %145 : vector<8x128xf32> to vector<8x128xbf16>
    %c1_40 = arith.constant 1 : index
    %c0_41 = arith.constant 0 : index
    %c0_42 = arith.constant 0 : index
    %147 = vector.load %arg5[%c1_40, %c0_41, %c0_42] : memref<4x128x32xbf16, #tpu.memory_space<vmem>>, vector<1x128x32xbf16>
    %148 = vector.shape_cast %147 : vector<1x128x32xbf16> to vector<128x32xbf16>
    %cst_43 = arith.constant dense<0.000000e+00> : vector<8x32xf32>
    %149 = tpu.matmul %146, %148, %cst_43 {dimension_numbers = #tpu.dot_dimension_numbers<[1], [0], [0], [1], [0, 0, 1, 1], [], []>} : vector<8x128xbf16>, vector<128x32xbf16>, vector<8x32xf32> -> vector<8x32xf32>
    %150 = vector.broadcast %69 : vector<8x1xf32> to vector<8x32xf32>
    %151 = arith.mulf %150, %149 : vector<8x32xf32>
    %152 = arith.addf %133, %151 : vector<8x32xf32>
    %c2 = arith.constant 2 : index
    %c0_44 = arith.constant 0 : index
    %c0_45 = arith.constant 0 : index
    %153 = vector.load %arg4[%c2, %c0_44, %c0_45] : memref<4x32x256xbf16, #tpu.memory_space<vmem>>, vector<1x32x256xbf16>
    %154 = vector.shape_cast %153 : vector<1x32x256xbf16> to vector<32x256xbf16>
    %cst_46 = arith.constant dense<0.000000e+00> : vector<8x256xf32>
    %155 = tpu.matmul %15, %154, %cst_46 {dimension_numbers = #tpu.dot_dimension_numbers<[1], [0], [0], [1], [0, 0, 1, 1], [], []>} : vector<8x32xbf16>, vector<32x256xbf16>, vector<8x256xf32> -> vector<8x256xf32>
    %156 = vector.extract_strided_slice %155 {offsets = [0, 0], sizes = [8, 128], strides = [1, 1]} : vector<8x256xf32> to vector<8x128xf32>
    %157 = vector.extract_strided_slice %155 {offsets = [0, 128], sizes = [8, 128], strides = [1, 1]} : vector<8x256xf32> to vector<8x128xf32>
    %158 = arith.negf %156 : vector<8x128xf32>
    %159 = math.exp %158 : vector<8x128xf32>
    %cst_47 = arith.constant 1.000000e+00 : f32
    %160 = vector.broadcast %cst_47 : f32 to vector<8x128xf32>
    %161 = arith.addf %160, %159 : vector<8x128xf32>
    %162 = arith.divf %160, %161 : vector<8x128xf32>
    %163 = arith.mulf %156, %162 : vector<8x128xf32>
    %164 = arith.mulf %163, %157 : vector<8x128xf32>
    %165 = arith.truncf %164 : vector<8x128xf32> to vector<8x128xbf16>
    %c2_48 = arith.constant 2 : index
    %c0_49 = arith.constant 0 : index
    %c0_50 = arith.constant 0 : index
    %166 = vector.load %arg5[%c2_48, %c0_49, %c0_50] : memref<4x128x32xbf16, #tpu.memory_space<vmem>>, vector<1x128x32xbf16>
    %167 = vector.shape_cast %166 : vector<1x128x32xbf16> to vector<128x32xbf16>
    %cst_51 = arith.constant dense<0.000000e+00> : vector<8x32xf32>
    %168 = tpu.matmul %165, %167, %cst_51 {dimension_numbers = #tpu.dot_dimension_numbers<[1], [0], [0], [1], [0, 0, 1, 1], [], []>} : vector<8x128xbf16>, vector<128x32xbf16>, vector<8x32xf32> -> vector<8x32xf32>
    %169 = vector.broadcast %90 : vector<8x1xf32> to vector<8x32xf32>
    %170 = arith.mulf %169, %168 : vector<8x32xf32>
    %171 = arith.addf %152, %170 : vector<8x32xf32>
    %c3 = arith.constant 3 : index
    %c0_52 = arith.constant 0 : index
    %c0_53 = arith.constant 0 : index
    %172 = vector.load %arg4[%c3, %c0_52, %c0_53] : memref<4x32x256xbf16, #tpu.memory_space<vmem>>, vector<1x32x256xbf16>
    %173 = vector.shape_cast %172 : vector<1x32x256xbf16> to vector<32x256xbf16>
    %cst_54 = arith.constant dense<0.000000e+00> : vector<8x256xf32>
    %174 = tpu.matmul %15, %173, %cst_54 {dimension_numbers = #tpu.dot_dimension_numbers<[1], [0], [0], [1], [0, 0, 1, 1], [], []>} : vector<8x32xbf16>, vector<32x256xbf16>, vector<8x256xf32> -> vector<8x256xf32>
    %175 = vector.extract_strided_slice %174 {offsets = [0, 0], sizes = [8, 128], strides = [1, 1]} : vector<8x256xf32> to vector<8x128xf32>
    %176 = vector.extract_strided_slice %174 {offsets = [0, 128], sizes = [8, 128], strides = [1, 1]} : vector<8x256xf32> to vector<8x128xf32>
    %177 = arith.negf %175 : vector<8x128xf32>
    %178 = math.exp %177 : vector<8x128xf32>
    %cst_55 = arith.constant 1.000000e+00 : f32
    %179 = vector.broadcast %cst_55 : f32 to vector<8x128xf32>
    %180 = arith.addf %179, %178 : vector<8x128xf32>
    %181 = arith.divf %179, %180 : vector<8x128xf32>
    %182 = arith.mulf %175, %181 : vector<8x128xf32>
    %183 = arith.mulf %182, %176 : vector<8x128xf32>
    %184 = arith.truncf %183 : vector<8x128xf32> to vector<8x128xbf16>
    %c3_56 = arith.constant 3 : index
    %c0_57 = arith.constant 0 : index
    %c0_58 = arith.constant 0 : index
    %185 = vector.load %arg5[%c3_56, %c0_57, %c0_58] : memref<4x128x32xbf16, #tpu.memory_space<vmem>>, vector<1x128x32xbf16>
    %186 = vector.shape_cast %185 : vector<1x128x32xbf16> to vector<128x32xbf16>
    %cst_59 = arith.constant dense<0.000000e+00> : vector<8x32xf32>
    %187 = tpu.matmul %184, %186, %cst_59 {dimension_numbers = #tpu.dot_dimension_numbers<[1], [0], [0], [1], [0, 0, 1, 1], [], []>} : vector<8x128xbf16>, vector<128x32xbf16>, vector<8x32xf32> -> vector<8x32xf32>
    %188 = vector.broadcast %113 : vector<8x1xf32> to vector<8x32xf32>
    %189 = arith.mulf %188, %187 : vector<8x32xf32>
    %190 = arith.addf %171, %189 : vector<8x32xf32>
    %191 = arith.addf %1, %190 : vector<8x32xf32>
    %c0_60 = arith.constant 0 : index
    %c0_61 = arith.constant 0 : index
    %c0_62 = arith.constant 0 : index
    %192 = vector.load %arg6[%c0_60, %c0_61, %c0_62] : memref<1x8x32xf32, #tpu.memory_space<vmem>>, vector<1x8x32xf32>
    %193 = vector.shape_cast %192 : vector<1x8x32xf32> to vector<8x32xf32>
    %194 = vector.shape_cast %191 : vector<8x32xf32> to vector<1x8x32xf32>
    tpu.vector_store %arg6[%c0_60, %c0_61, %c0_62], %194 {strides = array<i32>} : memref<1x8x32xf32, #tpu.memory_space<vmem>>, vector<1x8x32xf32>,
    return
  }
  func.func @transform_0(%arg0: i32) -> (i32, i32, i32) {
    %c0_i32 = arith.constant 0 : i32
    %c0_i32_0 = arith.constant 0 : i32
    %c0_i32_1 = arith.constant 0 : i32
    return %arg0, %c0_i32, %c0_i32_0 : i32, i32, i32
  }
  func.func @transform_1(%arg0: i32) -> (i32, i32) {
    %c0_i32 = arith.constant 0 : i32
    %c0_i32_0 = arith.constant 0 : i32
    %c0_i32_1 = arith.constant 0 : i32
    return %c0_i32, %c0_i32_0 : i32, i32
  }
  func.func @transform_2(%arg0: i32) -> (i32, i32) {
    %c0_i32 = arith.constant 0 : i32
    %c0_i32_0 = arith.constant 0 : i32
    %c0_i32_1 = arith.constant 0 : i32
    return %c0_i32, %c0_i32_0 : i32, i32
  }
  func.func @transform_3(%arg0: i32) -> (i32, i32, i32) {
    %c0_i32 = arith.constant 0 : i32
    %c0_i32_0 = arith.constant 0 : i32
    %c0_i32_1 = arith.constant 0 : i32
    %c0_i32_2 = arith.constant 0 : i32
    return %c0_i32, %c0_i32_0, %c0_i32_1 : i32, i32, i32
  }
  func.func @transform_4(%arg0: i32) -> (i32, i32, i32) {
    %c0_i32 = arith.constant 0 : i32
    %c0_i32_0 = arith.constant 0 : i32
    %c0_i32_1 = arith.constant 0 : i32
    %c0_i32_2 = arith.constant 0 : i32
    return %c0_i32, %c0_i32_0, %c0_i32_1 : i32, i32, i32
  }
  func.func @transform_5(%arg0: i32) -> (i32, i32, i32) {
    %c0_i32 = arith.constant 0 : i32
    %c0_i32_0 = arith.constant 0 : i32
    %c0_i32_1 = arith.constant 0 : i32
    return %arg0, %c0_i32, %c0_i32_0 : i32, i32, i32
  }
  func.func @transform_6(%arg0: i32) -> (i32, i32, i32) {
    %c0_i32 = arith.constant 0 : i32
    %c0_i32_0 = arith.constant 0 : i32
    %c0_i32_1 = arith.constant 0 : i32
    return %arg0, %c0_i32, %c0_i32_0 : i32, i32, i32
  }
}

</mosaic_0001>

<bundles_post_ra>
// kernel: tile.34
= control target key start
LH: loop header
LB: loop body
LE: loop exit
PB: predicated region body
PF: predicated region fallthrough
CT: control target
= control target key end

     0   :  { %vm36_vm0 = vcmask 1047556   ;;  %vm38_vm1 = vcmask 64512   ;;  %vm48_vm2 = vcmask 130112   ;;  %s99_s0 = inlined_call_operand.vmem [shape: f32[8,2,8], index: 0, kind: input, shape index: {}]   ;;  %s100_s1 = inlined_call_operand.vmem [shape: f32[8,16], index: 1, kind: output, shape index: {}]  }
   0x1   :  { %v50_v0 = vld [vmem:[%s99_s0 + $0xe] sm:$0x3]  ;;  %v51_v1 = vld [vmem:[%s99_s0 + $0xc] sm:$0x3]  ;;  %v52_v2 = vld [vmem:[%s99_s0 + $0xa] sm:$0x3] }
   0x2   :  { %7 = vst [vmem:[#allocation0 + $0x38] sm:$0x3] %v50_v0  ;;  %v53_v3 = vld [vmem:[%s99_s0 + $0x8] sm:$0x3]  ;;  %v54_v4 = vld [vmem:[%s99_s0 + $0x6] sm:$0x3] }
   0x3   :  { %11 = vst [vmem:[#allocation0 + $0x30] sm:$0x3] %v51_v1  ;;  %v55_v5 = vld [vmem:[%s99_s0 + $0x4] sm:$0x3]  ;;  %v56_v6 = vld [vmem:[%s99_s0 + $0x2] sm:$0x3] }
   0x4   :  { %15 = vst [vmem:[#allocation0 + $0x28] sm:$0x3] %v52_v2  ;;  %v32_v7 = vld [vmem:[%s99_s0] sm:$0x3]  ;;  %s58_s0 = smov 8  }
   0x5   :  { %19 = vst [vmem:[#allocation0 + $0x20] sm:$0x3] %v53_v3 }
   0x6   :  { %23 = vst [vmem:[#allocation0 + $0x18] sm:$0x3] %v54_v4 }
   0x7   :  { %27 = vst [vmem:[#allocation0 + $0x10] sm:$0x3] %v55_v5 }
   0x8   :  { %31 = vst [vmem:[#allocation0 + $0x8] sm:$0x3] %v56_v6 }
   0x9   :  { %33 = vst [vmem:[#allocation0] sm:$0x3] %v32_v7 }
   0xc   :  { %v35_v8 = vld [vmem:[#allocation0] ss:$8 sm:$0xf0]   ;;  %v43_v9 = vld [vmem:[#allocation0 + $0x1] ss:$8 sm:$0xf0]  }
  0x10   :  { %v34_v10 = vld [vmem:[#allocation0] ss:$8 sm:$0xf]   ;;  %v41_v11 = vld [vmem:[#allocation0 + $0x1] ss:$8 sm:$0xf]  }
  0x11   :  { %v37_v12 = vsel %vm36_vm0, %v35_v8, %v34_v10  ;;  %v45_v13 = vsel %vm36_vm0, %v43_v9, %v41_v11 }
  0x12   :  { %46 = vrot.lane.b32.xlu0 %v45_v13, %s58_s0  ;;  %39 = vst.msk [vmem:[%s100_s1] sm:$0xff] %vm38_vm1, %v37_v12  }
  0x84   :  { %v47_v14 = vpop.permute.xlu0 %46  }
  0x85   :  { %49 = vst.msk [vmem:[%s100_s1] sm:$0xff] %vm48_vm2, %v47_v14  }

// kernel: tile.24
= control target key start
LH: loop header
LB: loop body
LE: loop exit
PB: predicated region body
PF: predicated region fallthrough
CT: control target
= control target key end

     0   :  { %vm36_vm0 = vcmask 1047556   ;;  %s81_s22 = smov 8   ;;  %s82_s23 = smov 16   ;;  %vm38_vm1 = vcmask 64512   ;;  %vm48_vm2 = vcmask 261312   ;;  %vm58_vm3 = vcmask 195712   ;;  %s133_s0 = inlined_call_operand.vmem [shape: f32[8,4,8], index: 0, kind: input, shape index: {}]   ;;  %s134_s1 = inlined_call_operand.vmem [shape: f32[8,32], index: 1, kind: output, shape index: {}]  }
   0x1   :  { %v70_v0 = vld [vmem:[%s133_s0 + $0x1c] sm:$0xf]  ;;  %v71_v1 = vld [vmem:[%s133_s0 + $0x18] sm:$0xf]  ;;  %v72_v2 = vld [vmem:[%s133_s0 + $0x14] sm:$0xf] }
   0x2   :  { %7 = vst [vmem:[#allocation0 + $0x38] sm:$0xf] %v70_v0  ;;  %v73_v3 = vld [vmem:[%s133_s0 + $0x10] sm:$0xf]  ;;  %v74_v4 = vld [vmem:[%s133_s0 + $0xc] sm:$0xf] }
   0x3   :  { %11 = vst [vmem:[#allocation0 + $0x30] sm:$0xf] %v71_v1  ;;  %v75_v5 = vld [vmem:[%s133_s0 + $0x8] sm:$0xf]  ;;  %v76_v6 = vld [vmem:[%s133_s0 + $0x4] sm:$0xf] }
   0x4   :  { %15 = vst [vmem:[#allocation0 + $0x28] sm:$0xf] %v72_v2  ;;  %v32_v7 = vld [vmem:[%s133_s0] sm:$0xf]  ;;  %s80_s0 = smov 24   ;;  %vm68_vm4 = vcmask 130112  }
   0x5   :  { %19 = vst [vmem:[#allocation0 + $0x20] sm:$0xf] %v73_v3 }
   0x6   :  { %23 = vst [vmem:[#allocation0 + $0x18] sm:$0xf] %v74_v4 }
   0x7   :  { %27 = vst [vmem:[#allocation0 + $0x10] sm:$0xf] %v75_v5 }
   0x8   :  { %31 = vst [vmem:[#allocation0 + $0x8] sm:$0xf] %v76_v6 }
   0x9   :  { %33 = vst [vmem:[#allocation0] sm:$0xf] %v32_v7 }
   0xc   :  { %v43_v8 = vld [vmem:[#allocation0 + $0x3] ss:$8 sm:$0xf0]   ;;  %v63_v9 = vld [vmem:[#allocation0 + $0x1] ss:$8 sm:$0xf0]  }
   0xd   :  { %v53_v15 = vld [vmem:[#allocation0 + $0x2] ss:$8 sm:$0xf0]   ;;  %v35_v18 = vld [vmem:[#allocation0] ss:$8 sm:$0xf0]  }
  0x10   :  { %v41_v10 = vld [vmem:[#allocation0 + $0x3] ss:$8 sm:$0xf]   ;;  %v61_v12 = vld [vmem:[#allocation0 + $0x1] ss:$8 sm:$0xf]  }
  0x11   :  { %v45_v11 = vsel %vm36_vm0, %v43_v8, %v41_v10  ;;  %v65_v13 = vsel %vm36_vm0, %v63_v9, %v61_v12  ;;  %v51_v14 = vld [vmem:[#allocation0 + $0x2] ss:$8 sm:$0xf]   ;;  %v34_v17 = vld [vmem:[#allocation0] ss:$8 sm:$0xf]  }
  0x12   :  { %46 = vrot.lane.b32.xlu0 %v45_v11, %s80_s0  ;;  %66 = vrot.lane.b32.xlu1 %v65_v13, %s81_s22  ;;  %v55_v16 = vsel %vm36_vm0, %v53_v15, %v51_v14  ;;  %v37_v19 = vsel %vm36_vm0, %v35_v18, %v34_v17 }
  0x13   :  { %39 = vst.msk [vmem:[%s134_s1] sm:$0xff] %vm38_vm1, %v37_v19  }
  0x1a   :  { %56 = vrot.lane.b32.xlu0 %v55_v16, %s82_s23 }
  0x84   :  { %v47_v20 = vpop.permute.xlu0 %46   ;;  %v67_v21 = vpop.permute.xlu1 %66  }
  0x85   :  { %49 = vst.msk [vmem:[%s134_s1] sm:$0xff] %vm48_vm2, %v47_v20  }
  0x8c   :  { %v57_v22 = vpop.permute.xlu0 %56  }
  0x8d   :  { %59 = vst.msk [vmem:[%s134_s1] sm:$0xff] %vm58_vm3, %v57_v22  }
  0x8e   :  { %69 = vst.msk [vmem:[%s134_s1] sm:$0xff] %vm68_vm4, %v67_v21  }

// kernel: decoder_block_forward.7
= control target key start
LH: loop header
LB: loop body
LE: loop exit
PB: predicated region body
PF: predicated region fallthrough
CT: control target
= control target key end

     0   :  { %s563_s21 = smov 0   ;;  %s612_s0 = inlined_call_operand.vmem [shape: f32[2,8,32], index: 0, kind: input, shape index: {}]   ;;  %s613_s1 = inlined_call_operand.vmem [shape: f32[1,32], index: 1, kind: input, shape index: {}]   ;;  %s614_s2 = inlined_call_operand.vmem [shape: bf16[32,32], index: 2, kind: input, shape index: {}]   ;;  %s615_s3 = inlined_call_operand.vmem [shape: f32[2,8,32], index: 3, kind: input, shape index: {}]   ;;  %s616_s4 = inlined_call_operand.vmem [shape: bf16[32,32], index: 4, kind: input, shape index: {}]   ;;  %s617_s5 = inlined_call_operand.vmem [shape: f32[2,8,32], index: 5, kind: output, shape index: {0}]   ;;  %s618_s6 = inlined_call_operand.vmem [shape: f32[2,8,32], index: 6, kind: output, shape index: {1}]  }
   0x1 LB: > { %s472_s22 = sadd.s32 4294967295, %s525_s21   ;;  %p476_p0 = scmp.ge.s32.totalorder %s525_s21, 1  ;;  %s525_s21 = sphi %s563_s21, %s17_s21  }
   0x2   : > { %p223_p1 = scmp.lt.s32.totalorder %s525_s21, 3 }
   0x4   : > { %p224_p2 = pnand %p476_p0, %p223_p1 }
   0x5   : > { %p259_p3 = scmp.lt.s32.totalorder (!%p224_p2), %s472_s22, 1 }
   0x6   : > { %227 = sbr.rel (%p224_p2) target bundleno = 296 (0x128), region = 40 }
   0xb   : > { %s620_s22 = smov (!%p259_p3, %s472_s22), 1  ;;  %vm279_vm0 = vcmask 261120   ;;  %v527_v3 = vmov 32.0   ;;  %v504_v5 = vld [vmem:[%s616_s4 + $0x8] sm:$0xff]  ;;  %v503_v7 = vld [vmem:[%s616_s4] sm:$0xff] }
   0xc   : > { %s571_s23 = sshll.u32 %s620_s22, 3  ;;  %515 = vrcp.f32 %v527_v3  ;;  %368 = vmatpush.bf16.msra.mxu1 %v504_v5  ;;  %v502_v11 = vld [vmem:[%s614_s2 + $0x8] sm:$0xff]  ;;  %v501_v13 = vld [vmem:[%s614_s2] sm:$0xff] }
   0xd   : > { %s262_s26 = scalar_lea.vmem %s612_s0, %s571_s23  ;;  %s266_s7 = scalar_lea.vmem %s615_s3, %s571_s23  ;;  %333 = vmatpush.bf16.msra.mxu0 %v502_v11  ;;  %v514_v25 = vld [vmem:[%s613_s1] ss:$0 sm:$0xff] }
   0xe   : > { %v276_v0 = vld [vmem:[%s262_s26] sm:$0xff]  ;;  %s274_s18 = scalar_lea.vmem %s618_s6, %s571_s23  ;;  %s270_s22 = scalar_lea.vmem %s617_s5, %s571_s23 }
   0xf   : > { %v278_v1 = vmul.f32 %v276_v0, %v276_v0  ;;  %v341_v9 = vld [vmem:[%s266_s7] sm:$0xff] }
  0x10   : > { %369 = vmatpush.bf16.msra.mxu1 %v503_v7  ;;  %v342_v10 = vpack.c.bf16 %v341_v9, %v341_v9 }
  0x11   : > { %v280_v2 = vsel %vm279_vm0, %v278_v1, 0.0  ;;  %334 = vmatpush.bf16.msra.mxu0 %v501_v13 }
  0x12   : > { %281 = vadd.xlane.f32.xlu0 %v280_v2  ;;  %v516_v4 = vpop.eup %515 }
  0x13   : > { %v284_v6 = vmul.f32 32.0, %v516_v4  ;;  %498 = vmatmul.msk.bf16.vlgmr.msra.gmra.mxu1 %vm279_vm0, %v342_v10  ;;  %vm288_vm1 = vweird.f32 %v516_v4 }
  0x15   : > { %v285_v8 = vsub.f32 1.0, %v284_v6 }
  0x17   : > { %v286_v12 = vmul.f32 %v516_v4, %v285_v8 }
  0x19   : > { %v287_v14 = vadd.f32 %v516_v4, %v286_v12 }
  0x1b   : > { %v289_v15 = vsel %vm288_vm1, %v516_v4, %v287_v14 }
  0x85   : > { %v282_v16 = vpop.xlane.xlu0 %281 }
  0x86   : > { %v290_v17 = vmul.f32 %v289_v15, %v282_v16 }
  0x88   : > { %v291_v18 = vadd.f32 1e-06, %v290_v17 }
  0x8a   : > { %517 = vrsqrt.f32 %v291_v18  ;;  %vm298_vm3 = vweird.f32 %v291_v18 }
  0x90   : > { %v518_v19 = vpop.eup %517  ;;  %v371_v30 = vpop.f32.mrf.mxu1 }
  0x91   : > { %v293_v20 = vmul.f32 %v518_v19, %v291_v18  ;;  %vm299_vm2 = vweird.f32 %v518_v19  ;;  %375 = vst.msk [vmem:[%s274_s18] sm:$0xff] %vm279_vm0, %v371_v30 }
  0x92   : > { %vm300_vm4 = vmor %vm298_vm3, %vm299_vm2 }
  0x93   : > { %v294_v21 = vmul.f32 %v518_v19, %v293_v20 }
  0x95   : > { %v295_v22 = vmul.f32 0.5, %v294_v21 }
  0x97   : > { %v296_v23 = vsub.f32 1.5, %v295_v22 }
  0x98   : > { %v373_v31 = vpop.f32.mrf.mxu1 }
  0x99   : > { %v297_v24 = vmul.f32 %v518_v19, %v296_v23 }
  0x9b   : > { %v301_v26 = vsel %vm300_vm4, %v518_v19, %v297_v24 }
  0x9c   : > { %v302_v27 = vmul.f32 %v301_v26, %v276_v0 }
  0x9e   : > { %v306_v28 = vmul.f32 %v514_v25, %v302_v27 }
  0xa0   : > { %v307_v29 = vpack.c.bf16 %v306_v28, %v306_v28 }
  0xa2   : > { %489 = vmatmul.msk.bf16.vlgmr.msra.gmra.mxu0 %vm279_vm0, %v307_v29 }
 0x11f   : > { %v336_v32 = vpop.f32.mrf.mxu0 }
 0x120   : > { %340 = vst.msk [vmem:[%s270_s22] sm:$0xff] %vm279_vm0, %v336_v32 }
 0x127   : > { %v338_v33 = vpop.f32.mrf.mxu0 }
 0x128 PF: > { %s17_s21 = sadd.s32 1, %s525_s21  }
 0x129   : > { %p14_p4 = scmp.ge.s32.totalorder %s17_s21, 4  }
 0x12b   :  { %16 = sbr.rel (!%p14_p4) target bundleno = 1 (0x1), region = 85 }

// kernel: decoder_block_forward.5
= control target key start
LH: loop header
LB: loop body
LE: loop exit
PB: predicated region body
PF: predicated region fallthrough
CT: control target
= control target key end

     0   :  { %s605_s27 = smov 0   ;;  %s656_s0 = inlined_call_operand.vmem [shape: f32[2,8,32], index: 0, kind: input, shape index: {}]   ;;  %s657_s1 = inlined_call_operand.vmem [shape: f32[1,32], index: 1, kind: input, shape index: {}]   ;;  %s658_s2 = inlined_call_operand.vmem [shape: bf16[32,112], index: 2, kind: input, shape index: {}]   ;;  %s659_s3 = inlined_call_operand.vmem [shape: f32[8,32], index: 3, kind: input, shape index: {}]   ;;  %s660_s4 = inlined_call_operand.vmem [shape: f32[8,32], index: 4, kind: input, shape index: {}]   ;;  %s661_s5 = inlined_call_operand.vmem [shape: f32[8,16], index: 5, kind: input, shape index: {}]   ;;  %s662_s6 = inlined_call_operand.vmem [shape: f32[8,16], index: 6, kind: input, shape index: {}]   ;;  %s663_s7 = inlined_call_operand.vmem [shape: f32[2,8,32], index: 7, kind: output, shape index: {0}]   ;;  %s664_s8 = inlined_call_operand.vmem [shape: f32[2,8,32], index: 8, kind: output, shape index: {1}]  }
   0x1 LB: > { %s504_s28 = sadd.s32 4294967295, %s551_s27   ;;  %p508_p0 = scmp.ge.s32.totalorder %s551_s27, 1  ;;  %s551_s27 = sphi %s605_s27, %s19_s27  }
   0x2   : > { %p264_p1 = scmp.lt.s32.totalorder %s551_s27, 3 }
   0x4   : > { %p265_p2 = pnand %p508_p0, %p264_p1 }
   0x5   : > { %p300_p3 = scmp.lt.s32.totalorder (!%p265_p2), %s504_s28, 1  ;;  %s554_s19 = smov (!%p265_p2), 64  }
   0x6   : > { %268 = sbr.rel (%p265_p2) target bundleno = 500 (0x1f4), region = 48  ;;  %s555_s20 = smov (!%p265_p2), 80  }
   0x7   : > { %s556_s23 = smov (!%p265_p2), 32   ;;  %s557_s26 = smov (!%p265_p2), 112  }
   0x8   : > { %s559_s30 = smov (!%p265_p2), 48  }
   0xb   : > { %s666_s28 = smov (!%p300_p3, %s504_s28), 1  ;;  %vm316_vm0 = vcmask 261120   ;;  %v553_v3 = vmov 32.0   ;;  %v524_v7 = vld [vmem:[%s658_s2 + $0x8] sm:$0xff]  ;;  %v523_v9 = vld [vmem:[%s658_s2] sm:$0xff]  ;;  %vm412_vm5 = vcmask 130048  }
   0xc   : > { %s613_s29 = sshll.u32 %s666_s28, 3  ;;  %541 = vrcp.f32 %v553_v3  ;;  %370 = vmatpush.bf16.msra.mxu0 %v524_v7  ;;  %v391_v11 = vld [vmem:[%s661_s5] sm:$0xff]  ;;  %s558_s28 = smov 96   ;;  %vm418_vm6 = vcmask 261248  }
   0xd   : > { %s303_s10 = scalar_lea.vmem %s656_s0, %s613_s29  ;;  %v397_v12 = vld [vmem:[%s662_s6] sm:$0xff]  ;;  %393 = vrot.lane.b32.xlu1 %v391_v11, %s554_s19  ;;  %s307_s13 = scalar_lea.vmem %s663_s7, %s613_s29 }
   0xe   : > { %v313_v0 = vld [vmem:[%s303_s10] sm:$0xff]  ;;  %s311_s16 = scalar_lea.vmem %s664_s8, %s613_s29 }
   0xf   : > { %v315_v1 = vmul.f32 %v313_v0, %v313_v0  ;;  %v379_v17 = vld [vmem:[%s660_s4] sm:$0xff] }
  0x10   : > { %371 = vmatpush.bf16.msra.mxu0 %v523_v9  ;;  %v540_v24 = vld [vmem:[%s657_s1] ss:$0 sm:$0xff] }
  0x11   : > { %v317_v2 = vsel %vm316_vm0, %v315_v1, 0.0  ;;  %v377_v39 = vld [vmem:[%s659_s3] sm:$0xff] }
  0x12   : > { %318 = vadd.xlane.f32.xlu0 %v317_v2  ;;  %v542_v4 = vpop.eup %541 }
  0x13   : > { %v321_v5 = vmul.f32 32.0, %v542_v4  ;;  %vm325_vm1 = vweird.f32 %v542_v4 }
  0x15   : > { %v322_v6 = vsub.f32 1.0, %v321_v5  ;;  %381 = vrot.lane.b32.xlu1 %v379_v17, %s556_s23 }
  0x17   : > { %v323_v8 = vmul.f32 %v542_v4, %v322_v6 }
  0x19   : > { %v324_v10 = vadd.f32 %v542_v4, %v323_v8 }
  0x1b   : > { %v326_v13 = vsel %vm325_vm1, %v542_v4, %v324_v10 }
  0x26   : > { %399 = vrot.lane.b32.xlu0 %v397_v12, %s555_s20 }
  0x7f   : > { %v394_v29 = vpop.permute.xlu1 %393 }
  0x85   : > { %v319_v14 = vpop.xlane.xlu0 %318 }
  0x86   : > { %v327_v15 = vmul.f32 %v326_v13, %v319_v14 }
  0x87   : > { %v382_v34 = vpop.permute.xlu1 %381 }
  0x88   : > { %v328_v16 = vadd.f32 1e-06, %v327_v15 }
  0x8a   : > { %543 = vrsqrt.f32 %v328_v16  ;;  %vm335_vm3 = vweird.f32 %v328_v16 }
  0x90   : > { %v544_v18 = vpop.eup %543 }
  0x91   : > { %v330_v19 = vmul.f32 %v544_v18, %v328_v16  ;;  %vm336_vm2 = vweird.f32 %v544_v18 }
  0x92   : > { %vm337_vm4 = vmor %vm335_vm3, %vm336_vm2 }
  0x93   : > { %v331_v20 = vmul.f32 %v544_v18, %v330_v19 }
  0x95   : > { %v332_v21 = vmul.f32 0.5, %v331_v20 }
  0x97   : > { %v333_v22 = vsub.f32 1.5, %v332_v21 }
  0x98   : > { %v400_v30 = vpop.permute.xlu0 %399 }
  0x99   : > { %v334_v23 = vmul.f32 %v544_v18, %v333_v22 }
  0x9b   : > { %v338_v25 = vsel %vm337_vm4, %v544_v18, %v334_v23 }
  0x9c   : > { %v339_v26 = vmul.f32 %v338_v25, %v313_v0 }
  0x9e   : > { %v343_v27 = vmul.f32 %v540_v24, %v339_v26 }
  0xa0   : > { %v344_v28 = vpack.c.bf16 %v343_v27, %v343_v27 }
  0xa2   : > { %520 = vmatmul.msk.bf16.vlgmr.msra.gmra.mxu0 %vm316_vm0, %v344_v28 }
 0x11f   : > { %v373_v31 = vpop.f32.mrf.mxu0 }
 0x120   : > { %v402_v32 = vmul.f32 %v400_v30, %v373_v31  ;;  %v396_v33 = vmul.f32 %v394_v29, %v373_v31  ;;  %v384_v36 = vmul.f32 %v382_v34, %v373_v31  ;;  %v378_v40 = vmul.f32 %v377_v39, %v373_v31 }
 0x122   : > { %404 = vrot.lane.b32.xlu2 %v402_v32, %s557_s26 }
 0x127   : > { %v375_v35 = vpop.f32.mrf.mxu0 }
 0x12a   : > { %386 = vrot.lane.b32.xlu2 %v384_v36, %s558_s28 }
 0x132   : > { %415 = vrot.lane.b32.xlu2 %v373_v31, %s559_s30 }
 0x17c   : > { %v405_v37 = vpop.permute.xlu2 %404 }
 0x17d   : > { %v407_v38 = vadd.f32 %v405_v37, %v396_v33 }
 0x17f   : > { %409 = vrot.lane.b32.xlu1 %v407_v38, %s554_s19 }
 0x184   : > { %v387_v41 = vpop.permute.xlu2 %386 }
 0x185   : > { %v389_v42 = vadd.f32 %v387_v41, %v378_v40 }
 0x187   : > { %390 = vst.msk [vmem:[%s307_s13] sm:$0xff] %vm316_vm0, %v389_v42 }
 0x18c   : > { %v416_v44 = vpop.permute.xlu2 %415 }
 0x1f1   : > { %v410_v43 = vpop.permute.xlu1 %409 }
 0x1f2   : > { %413 = vst.msk [vmem:[%s311_s16] sm:$0xff] %vm412_vm5, %v410_v43 }
 0x1f3   : > { %419 = vst.msk [vmem:[%s311_s16] sm:$0xff] %vm418_vm6, %v416_v44 }
 0x1f4 PF: > { %s19_s27 = sadd.s32 1, %s551_s27  }
 0x1f5   : > { %p16_p4 = scmp.ge.s32.totalorder %s19_s27, 4  }
 0x1f7   :  { %18 = sbr.rel (!%p16_p4) target bundleno = 1 (0x1), region = 90 }

// kernel: decoder_block_forward.8
= control target key start
LH: loop header
LB: loop body
LE: loop exit
PB: predicated region body
PF: predicated region fallthrough
CT: control target
= control target key end

     0   :  { %s735_s18 = smov 0   ;;  %s816_s0 = inlined_call_operand.vmem [shape: f32[2,8,32], index: 0, kind: input, shape index: {}]   ;;  %s817_s1 = inlined_call_operand.vmem [shape: f32[2,8,32], index: 1, kind: input, shape index: {}]   ;;  %s818_s2 = inlined_call_operand.vmem [shape: f32[2,8,32], index: 2, kind: input, shape index: {}]   ;;  %s819_s3 = inlined_call_operand.vmem [shape: bf16[32,32], index: 3, kind: input, shape index: {}]   ;;  %s820_s4 = inlined_call_operand.vmem [shape: f32[1,32], index: 4, kind: input, shape index: {}]   ;;  %s821_s5 = inlined_call_operand.vmem [shape: f32[2,8,32], index: 5, kind: output, shape index: {}]  }
   0x1 LB: > { %s643_s19 = sadd.s32 4294967295, %s700_s18   ;;  %p647_p0 = scmp.ge.s32.totalorder %s700_s18, 1  ;;  %s700_s18 = sphi %s735_s18, %s15_s18  }
   0x2   : > { %p204_p1 = scmp.lt.s32.totalorder %s700_s18, 3 }
   0x4   : > { %p205_p2 = pnand %p647_p0, %p204_p1 }
   0x5   : > { %p238_p3 = scmp.lt.s32.totalorder (!%p205_p2), %s643_s19, 1  ;;  %s702_s27 = smov (!%p205_p2), 120  }
   0x6   : > { %208 = sbr.rel (%p205_p2) target bundleno = 1241 (0x4d9), region = 40  ;;  %s703_s28 = smov (!%p205_p2), 112  }
   0x7   : > { %s704_s29 = smov (!%p205_p2), 104  }
   0xb   : > { %s823_s19 = smov (!%p238_p3, %s643_s19), 1  ;;  %vm263_vm0 = vcmask 64512   ;;  %vm304_vm1 = vcmask 1043456   ;;  %v259_v35 = vld [vmem:[%s819_s3] sm:$0xf]  ;;  %vm564_vm2 = vcmask 261120  }
   0xc   : > { %s743_s20 = sshll.u32 %s823_s19, 3  ;;  %v396_v36 = vsel %vm304_vm1, %v259_v35, 0  ;;  %v260_v47 = vld [vmem:[%s819_s3 + $0x4] sm:$0xf] }
   0xd   : > { %s245_s23 = scalar_lea.vmem %s817_s1, %s743_s20  ;;  %s241_s26 = scalar_lea.vmem %s816_s0, %s743_s20  ;;  %v377_v48 = vsel %vm304_vm1, %v260_v47, 0 }
   0xe   : > { %v257_v0 = vld [vmem:[%s245_s23] sm:$0xff]  ;;  %s249_s15 = scalar_lea.vmem %s818_s2, %s743_s20  ;;  %s253_s22 = scalar_lea.vmem %s821_s5, %s743_s20 }
   0xf   : > { %v258_v1 = vpack.c.bf16 %v257_v0, %v257_v0  ;;  %v255_v2 = vld [vmem:[%s241_s26] sm:$0xff] }
  0x10   : > { %v256_v3 = vpack.c.bf16 %v255_v2, %v255_v2 }
  0x11   : > { %v268_v4 = vsel %vm263_vm0, %v258_v1, 0  ;;  %v297_v21 = vunpack.c.l.b16 %v258_v1 }
  0x12   : > { %277 = vmatpush.bf16.xpose.msra.mxu0 %v268_v4  ;;  %v323_v5 = vunpack.c.l.b16 %v256_v3  ;;  %337 = vmatpush.bf16.xpose.msra.mxu2 %v268_v4 }
  0x13   : > { %v760_v22 = vpack.c.b16 %v297_v21, %v297_v21 }
  0x14   : > { %v324_v6 = vpack.c.b16 %v323_v5, %v323_v5 }
  0x16   : > { %325 = vrot.lane.b32.xlu0 %v324_v6, %s702_s27 }
  0x19   : > { %652 = vmatmul.msk.bf16.vlgmr.msra.gmra.mxu0 %vm263_vm0, %v256_v3 }
  0x88   : > { %v326_v7 = vpop.permute.xlu0 %325 }
  0x89   : > { %654 = vmatmul.msk.bf16.vlgmr.msra.gmra.mxu2 %vm263_vm0, %v326_v7 }
  0x96   : > { %v279_v8 = vpop.f32.mrf.mxu0 }
  0x97   : > { %v283_v9 = vmul.f32 0.35355338, %v279_v8 }
  0x99   : > { %v284_v10 = vsel %vm263_vm0, %v283_v9, -inf }
  0x9a   : > { %285 = vmax.xlane.f32.xlu0 %v284_v10 }
  0x9e   : > { %v281_v11 = vpop.f32.mrf.mxu0 }
 0x10c   : > { %v339_v12 = vpop.f32.mrf.mxu2 }
 0x10d   : > { %v343_v13 = vmul.f32 0.35355338, %v339_v12  ;;  %v286_v14 = vpop.xlane.xlu0 %285 }
 0x10e   : > { %v287_v15 = vsub.f32 %v283_v9, %v286_v14 }
 0x10f   : > { %v344_v16 = vsel %vm263_vm0, %v343_v13, -inf }
 0x110   : > { %v288_v17 = vmul.f32 1.442695, %v287_v15  ;;  %345 = vmax.xlane.f32.xlu2 %v344_v16 }
 0x112   : > { %678 = vpow2.f32 %v288_v17 }
 0x114   : > { %v341_v18 = vpop.f32.mrf.mxu2 }
 0x118   : > { %v679_v19 = vpop.eup %678 }
 0x119   : > { %v290_v20 = vsel %vm263_vm0, %v679_v19, 0.0 }
 0x11a   : > { %291 = vadd.xlane.f32.xlu1 %v290_v20  ;;  %v262_v20 = vld [vmem:[%s819_s3 + $0xc] sm:$0xf] }
 0x11b   : > { %v541_v21 = vsel %vm304_vm1, %v262_v20, 0 }
 0x133   : > { %299 = vrot.lane.b32.xlu1 %v760_v22, %s703_s28 }
 0x13b   : > { %489 = vrot.lane.b32.xlu1 %v324_v6, %s704_s29 }
 0x183   : > { %v346_v23 = vpop.xlane.xlu2 %345 }
 0x184   : > { %v347_v24 = vsub.f32 %v343_v13, %v346_v23 }
 0x186   : > { %v348_v25 = vmul.f32 1.442695, %v347_v24 }
 0x188   : > { %680 = vpow2.f32 %v348_v25 }
 0x18d   : > { %v292_v28 = vpop.xlane.xlu1 %291 }
 0x18e   : > { %v681_v26 = vpop.eup %680  ;;  %682 = vrcp.f32 %v292_v28 }
 0x18f   : > { %v350_v27 = vsel %vm263_vm0, %v681_v26, 0.0 }
 0x190   : > { %351 = vadd.xlane.f32.xlu2 %v350_v27 }
 0x194   : > { %v683_v29 = vpop.eup %682 }
 0x195   : > { %v294_v30 = vmul.f32 %v683_v29, %v679_v19 }
 0x197   : > { %v295_v33 = vpack.c.bf16 %v294_v30, %v294_v30 }
 0x1a5   : > { %v300_v31 = vpop.permute.xlu1 %299 }
 0x1a6   : > { %v306_v32 = vsel %vm304_vm1, %v300_v31, 0 }
 0x1a7   : > { %315 = vmatpush.bf16.msra.mxu1 %v306_v32  ;;  %366 = vmatpush.bf16.msra.mxu3 %v306_v32 }
 0x1a8   : > { %413 = vrot.lane.b32.xlu2 %v760_v22, %s702_s27 }
 0x1aa   : > { %653 = vmatmul.msk.bf16.vlgmr.msra.gmra.mxu1 %vm263_vm0, %v295_v33 }
 0x1ab   : > { %405 = vmatpush.bf16.msrb.mxu3 %v396_v36  ;;  %386 = vmatpush.bf16.msrb.mxu1 %v377_v48  ;;  %v557_v36 = vld [vmem:[%s249_s15] sm:$0xff] }
 0x1ad   : > { %v490_v46 = vpop.permute.xlu1 %489 }
 0x1b0   : > { %411 = vrot.lane.b32.xlu2 %v324_v6, %s703_s28 }
 0x203   : > { %v352_v34 = vpop.xlane.xlu2 %351 }
 0x204   : > { %684 = vrcp.f32 %v352_v34  ;;  %v677_v34 = vld [vmem:[%s820_s4] ss:$0 sm:$0xff] }
 0x20a   : > { %v685_v37 = vpop.eup %684 }
 0x20b   : > { %v414_v38 = vpop.permute.xlu2 %413  ;;  %v354_v39 = vmul.f32 %v685_v37, %v681_v26 }
 0x20c   : > { %v419_v40 = vsel %vm263_vm0, %v414_v38, 0 }
 0x20d   : > { %428 = vmatpush.bf16.xpose.msrb.mxu0 %v419_v40  ;;  %v355_v41 = vpack.c.bf16 %v354_v39, %v354_v39 }
 0x20f   : > { %655 = vmatmul.msk.bf16.vlgmr.msra.gmra.mxu3 %vm263_vm0, %v355_v41 }
 0x210   : > { %501 = vmatpush.bf16.xpose.msra.mxu3 %v419_v40 }
 0x213   : > { %v412_v42 = vpop.permute.xlu2 %411 }
 0x214   : > { %658 = vmatmul.msk.bf16.vlgmr.msrb.gmra.mxu0 %vm263_vm0, %v412_v42 }
 0x227   : > { %v317_v43 = vpop.f32.mrf.mxu1 }
 0x228   : > { %v321_v44 = vpack.c.bf16 %v317_v43, %v317_v43 }
 0x22a   : > { %657 = vmatmul.msk.bf16.vlgmr.msrb.gmra.mxu3 %vm263_vm0, %v321_v44 }
 0x22f   : > { %v319_v45 = vpop.f32.mrf.mxu1 }
 0x23a   : > { %661 = vmatmul.msk.bf16.vlgmr.msra.gmra.mxu3 %vm263_vm0, %v490_v46 }
 0x291   : > { %v430_v49 = vpop.f32.mrf.mxu0 }
 0x292   : > { %v434_v50 = vmul.f32 0.35355338, %v430_v49  ;;  %v368_v51 = vpop.f32.mrf.mxu3 }
 0x293   : > { %v372_v52 = vpack.c.bf16 %v368_v51, %v368_v51 }
 0x294   : > { %v435_v53 = vsel %vm263_vm0, %v434_v50, -inf }
 0x295   : > { %656 = vmatmul.msk.bf16.vlgmr.msrb.gmra.mxu1 %vm263_vm0, %v372_v52  ;;  %436 = vmax.xlane.f32.xlu1 %v435_v53 }
 0x299   : > { %v432_v54 = vpop.f32.mrf.mxu0 }
 0x29a   : > { %v370_v55 = vpop.f32.mrf.mxu3 }
 0x2ad   : > { %v407_v56 = vpop.f32.mrf.mxu3 }
 0x2b5   : > { %v409_v57 = vpop.f32.mrf.mxu3 }
 0x2bd   : > { %v503_v58 = vpop.f32.mrf.mxu3 }
 0x2be   : > { %v507_v59 = vmul.f32 0.35355338, %v503_v58 }
 0x2c0   : > { %v508_v60 = vsel %vm263_vm0, %v507_v59, -inf }
 0x2c1   : > { %509 = vmax.xlane.f32.xlu2 %v508_v60 }
 0x2c5   : > { %v505_v61 = vpop.f32.mrf.mxu3 }
 0x308   : > { %v437_v62 = vpop.xlane.xlu1 %436 }
 0x309   : > { %v438_v63 = vsub.f32 %v434_v50, %v437_v62 }
 0x30b   : > { %v439_v0 = vmul.f32 1.442695, %v438_v63 }
 0x30d   : > { %686 = vpow2.f32 %v439_v0 }
 0x312   : > { %v388_v1 = vpop.f32.mrf.mxu1 }
 0x313   : > { %v687_v2 = vpop.eup %686  ;;  %v408_v30 = vadd.f32 %v407_v56, %v388_v1 }
 0x314   : > { %v441_v3 = vsel %vm263_vm0, %v687_v2, 0.0 }
 0x315   : > { %442 = vadd.xlane.f32.xlu0 %v441_v3 }
 0x31a   : > { %v390_v4 = vpop.f32.mrf.mxu1 }
 0x334   : > { %v510_v5 = vpop.xlane.xlu2 %509 }
 0x335   : > { %v511_v6 = vsub.f32 %v507_v59, %v510_v5 }
 0x337   : > { %v512_v7 = vmul.f32 1.442695, %v511_v6 }
 0x339   : > { %688 = vpow2.f32 %v512_v7 }
 0x33f   : > { %v689_v8 = vpop.eup %688 }
 0x340   : > { %v514_v9 = vsel %vm263_vm0, %v689_v8, 0.0 }
 0x341   : > { %515 = vadd.xlane.f32.xlu0 %v514_v9 }
 0x355   : > { %447 = vrot.lane.b32.xlu0 %v760_v22, %s704_s29  ;;  %v261_v22 = vld [vmem:[%s819_s3 + $0x8] sm:$0xf] }
 0x356   : > { %v473_v23 = vsel %vm304_vm1, %v261_v22, 0 }
 0x357   : > { %482 = vmatpush.bf16.msra.mxu1 %v473_v23 }
 0x388   : > { %v443_v10 = vpop.xlane.xlu0 %442 }
 0x389   : > { %690 = vrcp.f32 %v443_v10 }
 0x38f   : > { %v691_v12 = vpop.eup %690 }
 0x390   : > { %v445_v14 = vmul.f32 %v691_v12, %v687_v2 }
 0x392   : > { %v446_v19 = vpack.c.bf16 %v445_v14, %v445_v14 }
 0x3b4   : > { %v516_v11 = vpop.xlane.xlu0 %515 }
 0x3b5   : > { %692 = vrcp.f32 %v516_v11 }
 0x3bb   : > { %v693_v13 = vpop.eup %692 }
 0x3bc   : > { %v518_v15 = vmul.f32 %v693_v13, %v689_v8 }
 0x3be   : > { %v519_v18 = vpack.c.bf16 %v518_v15, %v518_v15 }
 0x3c7   : > { %v448_v16 = vpop.permute.xlu0 %447 }
 0x3c8   : > { %v453_v17 = vsel %vm304_vm1, %v448_v16, 0 }
 0x3c9   : > { %462 = vmatpush.bf16.msrb.mxu2 %v453_v17  ;;  %530 = vmatpush.bf16.msra.mxu0 %v453_v17 }
 0x3cc   : > { %659 = vmatmul.msk.bf16.vlgmr.msrb.gmra.mxu2 %vm263_vm0, %v446_v19  ;;  %662 = vmatmul.msk.bf16.vlgmr.msra.gmra.mxu0 %vm263_vm0, %v519_v18 }
 0x3cd   : > { %550 = vmatpush.bf16.msra.mxu2 %v541_v21 }
 0x449   : > { %v532_v24 = vpop.f32.mrf.mxu0 }
 0x44a   : > { %v536_v25 = vpack.c.bf16 %v532_v24, %v532_v24 }
 0x44c   : > { %663 = vmatmul.msk.bf16.vlgmr.msra.gmra.mxu2 %vm263_vm0, %v536_v25 }
 0x44f   : > { %v464_v26 = vpop.f32.mrf.mxu2 }
 0x450   : > { %v468_v27 = vpack.c.bf16 %v464_v26, %v464_v26 }
 0x451   : > { %v534_v28 = vpop.f32.mrf.mxu0 }
 0x452   : > { %660 = vmatmul.msk.bf16.vlgmr.msra.gmra.mxu1 %vm263_vm0, %v468_v27 }
 0x457   : > { %v466_v29 = vpop.f32.mrf.mxu2 }
 0x4cf   : > { %v484_v31 = vpop.f32.mrf.mxu1  ;;  %v552_v32 = vpop.f32.mrf.mxu2 }
 0x4d0   : > { %v488_v33 = vadd.f32 %v484_v31, %v408_v30 }
 0x4d2   : > { %v556_v35 = vadd.f32 %v552_v32, %v488_v33 }
 0x4d4   : > { %v562_v37 = vmul.f32 %v677_v34, %v556_v35 }
 0x4d6   : > { %v563_v38 = vadd.f32 %v562_v37, %v557_v36 }
 0x4d7   : > { %v486_v39 = vpop.f32.mrf.mxu1  ;;  %v554_v40 = vpop.f32.mrf.mxu2 }
 0x4d8   : > { %565 = vst.msk [vmem:[%s253_s22] sm:$0xff] %vm564_vm2, %v563_v38 }
 0x4d9 PF: > { %s15_s18 = sadd.s32 1, %s700_s18  }
 0x4da   : > { %p12_p4 = scmp.ge.s32.totalorder %s15_s18, 4  }
 0x4dc   :  { %14 = sbr.rel (!%p12_p4) target bundleno = 1 (0x1), region = 76 }

// kernel: decoder_block_forward.6
= control target key start
LH: loop header
LB: loop body
LE: loop exit
PB: predicated region body
PF: predicated region fallthrough
CT: control target
= control target key end

     0   :  { %s747_s18 = smov 0   ;;  %s834_s0 = inlined_call_operand.vmem [shape: f32[2,8,32], index: 0, kind: input, shape index: {}]   ;;  %s835_s1 = inlined_call_operand.vmem [shape: f32[2,8,32], index: 1, kind: input, shape index: {}]   ;;  %s836_s2 = inlined_call_operand.vmem [shape: f32[2,8,32], index: 2, kind: input, shape index: {}]   ;;  %s837_s3 = inlined_call_operand.vmem [shape: bf16[32,32], index: 3, kind: input, shape index: {}]   ;;  %s838_s4 = inlined_call_operand.vmem [shape: f32[1,32], index: 4, kind: input, shape index: {}]   ;;  %s839_s5 = inlined_call_operand.vmem [shape: f32[2,8,32], index: 5, kind: output, shape index: {}]  }
   0x1 LB: > { %s653_s19 = sadd.s32 4294967295, %s711_s18   ;;  %p657_p0 = scmp.ge.s32.totalorder %s711_s18, 1  ;;  %s711_s18 = sphi %s747_s18, %s15_s18  }
   0x2   : > { %p204_p1 = scmp.lt.s32.totalorder %s711_s18, 3 }
   0x4   : > { %p205_p2 = pnand %p657_p0, %p204_p1 }
   0x5   : > { %p238_p3 = scmp.lt.s32.totalorder (!%p205_p2), %s653_s19, 1  ;;  %s713_s27 = smov (!%p205_p2), 120  }
   0x6   : > { %208 = sbr.rel (%p205_p2) target bundleno = 1245 (0x4dd), region = 40  ;;  %s715_s28 = smov (!%p205_p2), 112  }
   0x7   : > { %s716_s29 = smov (!%p205_p2), 104  }
   0xb   : > { %s841_s19 = smov (!%p238_p3, %s653_s19), 1  ;;  %vm269_vm0 = vcmask 64512   ;;  %v263_v8 = vlaneseq  ;;  %v714_v12 = vmov -1e+09   ;;  %vm311_vm2 = vcmask 1043456  }
   0xc   : > { %s755_s20 = sshll.u32 %s841_s19, 3  ;;  %v259_v42 = vld [vmem:[%s837_s3] sm:$0xf]  ;;  %v260_v54 = vld [vmem:[%s837_s3 + $0x4] sm:$0xf]  ;;  %vm574_vm3 = vcmask 261120  }
   0xd   : > { %s245_s23 = scalar_lea.vmem %s835_s1, %s755_s20  ;;  %s241_s26 = scalar_lea.vmem %s834_s0, %s755_s20  ;;  %v264_v9 = vshrl.u32 %v263_v8, 7  ;;  %v266_v10 = vand.u32 127, %v263_v8  ;;  %v404_v43 = vsel %vm311_vm2, %v259_v42, 0  ;;  %v385_v55 = vsel %vm311_vm2, %v260_v54, 0 }
   0xe   : > { %v257_v0 = vld [vmem:[%s245_s23] sm:$0xff]  ;;  %s249_s15 = scalar_lea.vmem %s836_s2, %s755_s20  ;;  %s253_s22 = scalar_lea.vmem %s839_s5, %s755_s20 }
   0xf   : > { %v258_v1 = vpack.c.bf16 %v257_v0, %v257_v0  ;;  %v255_v2 = vld [vmem:[%s241_s26] sm:$0xff]  ;;  %vm267_vm1 = vcmp.le.s32.totalorder %v266_v10, %v264_v9 }
  0x10   : > { %v256_v3 = vpack.c.bf16 %v255_v2, %v255_v2  ;;  %v769_v13 = vsel %vm267_vm1, 0.0, %v714_v12 }
  0x11   : > { %v274_v4 = vsel %vm269_vm0, %v258_v1, 0  ;;  %v304_v28 = vunpack.c.l.b16 %v258_v1 }
  0x12   : > { %283 = vmatpush.bf16.xpose.msra.mxu0 %v274_v4  ;;  %v330_v5 = vunpack.c.l.b16 %v256_v3  ;;  %344 = vmatpush.bf16.xpose.msra.mxu2 %v274_v4 }
  0x13   : > { %v776_v29 = vpack.c.b16 %v304_v28, %v304_v28 }
  0x14   : > { %v331_v6 = vpack.c.b16 %v330_v5, %v330_v5 }
  0x16   : > { %332 = vrot.lane.b32.xlu0 %v331_v6, %s713_s27 }
  0x19   : > { %662 = vmatmul.msk.bf16.vlgmr.msra.gmra.mxu0 %vm269_vm0, %v256_v3 }
  0x88   : > { %v333_v7 = vpop.permute.xlu0 %332 }
  0x89   : > { %664 = vmatmul.msk.bf16.vlgmr.msra.gmra.mxu2 %vm269_vm0, %v333_v7 }
  0x96   : > { %v285_v11 = vpop.f32.mrf.mxu0 }
  0x97   : > { %v289_v14 = vmul.f32 0.35355338, %v285_v11 }
  0x99   : > { %v290_v15 = vadd.f32 %v289_v14, %v769_v13 }
  0x9b   : > { %v291_v16 = vsel %vm269_vm0, %v290_v15, -inf }
  0x9c   : > { %292 = vmax.xlane.f32.xlu0 %v291_v16 }
  0x9e   : > { %v287_v17 = vpop.f32.mrf.mxu0 }
 0x10c   : > { %v346_v18 = vpop.f32.mrf.mxu2 }
 0x10d   : > { %v350_v19 = vmul.f32 0.35355338, %v346_v18 }
 0x10f   : > { %v293_v20 = vpop.xlane.xlu0 %292  ;;  %v351_v21 = vadd.f32 %v350_v19, %v769_v13 }
 0x110   : > { %v294_v22 = vsub.f32 %v290_v15, %v293_v20 }
 0x111   : > { %v352_v23 = vsel %vm269_vm0, %v351_v21, -inf }
 0x112   : > { %v295_v24 = vmul.f32 1.442695, %v294_v22  ;;  %353 = vmax.xlane.f32.xlu2 %v352_v23 }
 0x114   : > { %689 = vpow2.f32 %v295_v24  ;;  %v348_v25 = vpop.f32.mrf.mxu2 }
 0x11a   : > { %v690_v26 = vpop.eup %689 }
 0x11b   : > { %v297_v27 = vsel %vm269_vm0, %v690_v26, 0.0 }
 0x11c   : > { %298 = vadd.xlane.f32.xlu1 %v297_v27 }
 0x135   : > { %306 = vrot.lane.b32.xlu1 %v776_v29, %s715_s28 }
 0x13d   : > { %498 = vrot.lane.b32.xlu1 %v331_v6, %s716_s29 }
 0x185   : > { %v354_v30 = vpop.xlane.xlu2 %353 }
 0x186   : > { %v355_v31 = vsub.f32 %v351_v21, %v354_v30 }
 0x188   : > { %v356_v32 = vmul.f32 1.442695, %v355_v31  ;;  %v261_v31 = vld [vmem:[%s837_s3 + $0x8] sm:$0xf] }
 0x18a   : > { %691 = vpow2.f32 %v356_v32  ;;  %v482_v32 = vsel %vm311_vm2, %v261_v31, 0 }
 0x18f   : > { %v299_v35 = vpop.xlane.xlu1 %298 }
 0x190   : > { %v692_v33 = vpop.eup %691  ;;  %693 = vrcp.f32 %v299_v35 }
 0x191   : > { %v358_v34 = vsel %vm269_vm0, %v692_v33, 0.0 }
 0x192   : > { %359 = vadd.xlane.f32.xlu2 %v358_v34 }
 0x196   : > { %v694_v36 = vpop.eup %693 }
 0x197   : > { %v301_v37 = vmul.f32 %v694_v36, %v690_v26 }
 0x199   : > { %v302_v40 = vpack.c.bf16 %v301_v37, %v301_v37 }
 0x1a7   : > { %v307_v38 = vpop.permute.xlu1 %306 }
 0x1a8   : > { %v313_v39 = vsel %vm311_vm2, %v307_v38, 0 }
 0x1a9   : > { %322 = vmatpush.bf16.msra.mxu1 %v313_v39  ;;  %374 = vmatpush.bf16.msra.mxu3 %v313_v39 }
 0x1aa   : > { %421 = vrot.lane.b32.xlu2 %v776_v29, %s713_s27 }
 0x1ac   : > { %663 = vmatmul.msk.bf16.vlgmr.msra.gmra.mxu1 %vm269_vm0, %v302_v40 }
 0x1ad   : > { %413 = vmatpush.bf16.msrb.mxu3 %v404_v43  ;;  %394 = vmatpush.bf16.msrb.mxu1 %v385_v55  ;;  %v688_v43 = vld [vmem:[%s838_s4] ss:$0 sm:$0xff] }
 0x1af   : > { %v499_v53 = vpop.permute.xlu1 %498 }
 0x1b1   : > { %491 = vmatpush.bf16.msra.mxu1 %v482_v32 }
 0x1b2   : > { %419 = vrot.lane.b32.xlu2 %v331_v6, %s715_s28 }
 0x205   : > { %v360_v41 = vpop.xlane.xlu2 %359 }
 0x206   : > { %695 = vrcp.f32 %v360_v41 }
 0x20c   : > { %v696_v44 = vpop.eup %695 }
 0x20d   : > { %v422_v45 = vpop.permute.xlu2 %421  ;;  %v362_v46 = vmul.f32 %v696_v44, %v692_v33 }
 0x20e   : > { %v427_v47 = vsel %vm269_vm0, %v422_v45, 0  ;;  %v567_v45 = vld [vmem:[%s249_s15] sm:$0xff] }
 0x20f   : > { %436 = vmatpush.bf16.xpose.msrb.mxu0 %v427_v47  ;;  %v363_v48 = vpack.c.bf16 %v362_v46, %v362_v46 }
 0x211   : > { %665 = vmatmul.msk.bf16.vlgmr.msra.gmra.mxu3 %vm269_vm0, %v363_v48 }
 0x212   : > { %510 = vmatpush.bf16.xpose.msra.mxu3 %v427_v47 }
 0x215   : > { %v420_v49 = vpop.permute.xlu2 %419 }
 0x216   : > { %668 = vmatmul.msk.bf16.vlgmr.msrb.gmra.mxu0 %vm269_vm0, %v420_v49 }
 0x229   : > { %v324_v50 = vpop.f32.mrf.mxu1 }
 0x22a   : > { %v328_v51 = vpack.c.bf16 %v324_v50, %v324_v50 }
 0x22c   : > { %667 = vmatmul.msk.bf16.vlgmr.msrb.gmra.mxu3 %vm269_vm0, %v328_v51 }
 0x231   : > { %v326_v52 = vpop.f32.mrf.mxu1 }
 0x23c   : > { %671 = vmatmul.msk.bf16.vlgmr.msra.gmra.mxu3 %vm269_vm0, %v499_v53 }
 0x293   : > { %v438_v56 = vpop.f32.mrf.mxu0 }
 0x294   : > { %v442_v57 = vmul.f32 0.35355338, %v438_v56  ;;  %v376_v58 = vpop.f32.mrf.mxu3 }
 0x295   : > { %v380_v59 = vpack.c.bf16 %v376_v58, %v376_v58 }
 0x296   : > { %v443_v60 = vadd.f32 %v442_v57, %v769_v13 }
 0x297   : > { %666 = vmatmul.msk.bf16.vlgmr.msrb.gmra.mxu1 %vm269_vm0, %v380_v59 }
 0x298   : > { %v444_v61 = vsel %vm269_vm0, %v443_v60, -inf }
 0x299   : > { %445 = vmax.xlane.f32.xlu1 %v444_v61 }
 0x29b   : > { %v440_v62 = vpop.f32.mrf.mxu0 }
 0x29c   : > { %v378_v63 = vpop.f32.mrf.mxu3 }
 0x2af   : > { %v415_v0 = vpop.f32.mrf.mxu3 }
 0x2b7   : > { %v417_v1 = vpop.f32.mrf.mxu3 }
 0x2bf   : > { %v512_v2 = vpop.f32.mrf.mxu3 }
 0x2c0   : > { %v516_v3 = vmul.f32 0.35355338, %v512_v2 }
 0x2c2   : > { %v517_v4 = vadd.f32 %v516_v3, %v769_v13 }
 0x2c4   : > { %v518_v5 = vsel %vm269_vm0, %v517_v4, -inf }
 0x2c5   : > { %519 = vmax.xlane.f32.xlu2 %v518_v5 }
 0x2c7   : > { %v514_v6 = vpop.f32.mrf.mxu3 }
 0x30c   : > { %v446_v7 = vpop.xlane.xlu1 %445 }
 0x30d   : > { %v447_v8 = vsub.f32 %v443_v60, %v446_v7 }
 0x30f   : > { %v448_v9 = vmul.f32 1.442695, %v447_v8 }
 0x311   : > { %697 = vpow2.f32 %v448_v9 }
 0x314   : > { %v396_v10 = vpop.f32.mrf.mxu1 }
 0x315   : > { %v416_v39 = vadd.f32 %v415_v0, %v396_v10 }
 0x317   : > { %v698_v11 = vpop.eup %697 }
 0x318   : > { %v450_v12 = vsel %vm269_vm0, %v698_v11, 0.0 }
 0x319   : > { %451 = vadd.xlane.f32.xlu0 %v450_v12 }
 0x31c   : > { %v398_v14 = vpop.f32.mrf.mxu1 }
 0x338   : > { %v520_v15 = vpop.xlane.xlu2 %519 }
 0x339   : > { %v521_v16 = vsub.f32 %v517_v4, %v520_v15 }
 0x33b   : > { %v522_v17 = vmul.f32 1.442695, %v521_v16 }
 0x33d   : > { %699 = vpow2.f32 %v522_v17 }
 0x343   : > { %v700_v18 = vpop.eup %699 }
 0x344   : > { %v524_v13 = vsel %vm269_vm0, %v700_v18, 0.0 }
 0x345   : > { %525 = vadd.xlane.f32.xlu0 %v524_v13 }
 0x359   : > { %456 = vrot.lane.b32.xlu0 %v776_v29, %s716_s29  ;;  %v262_v29 = vld [vmem:[%s837_s3 + $0xc] sm:$0xf] }
 0x35a   : > { %v551_v30 = vsel %vm311_vm2, %v262_v29, 0 }
 0x38c   : > { %v452_v19 = vpop.xlane.xlu0 %451 }
 0x38d   : > { %701 = vrcp.f32 %v452_v19 }
 0x393   : > { %v702_v21 = vpop.eup %701 }
 0x394   : > { %v454_v23 = vmul.f32 %v702_v21, %v698_v11 }
 0x396   : > { %v455_v28 = vpack.c.bf16 %v454_v23, %v454_v23 }
 0x3b8   : > { %v526_v20 = vpop.xlane.xlu0 %525 }
 0x3b9   : > { %703 = vrcp.f32 %v526_v20 }
 0x3bf   : > { %v704_v22 = vpop.eup %703 }
 0x3c0   : > { %v528_v24 = vmul.f32 %v704_v22, %v700_v18 }
 0x3c2   : > { %v529_v27 = vpack.c.bf16 %v528_v24, %v528_v24 }
 0x3cb   : > { %v457_v25 = vpop.permute.xlu0 %456 }
 0x3cc   : > { %v462_v26 = vsel %vm311_vm2, %v457_v25, 0 }
 0x3cd   : > { %471 = vmatpush.bf16.msrb.mxu2 %v462_v26  ;;  %540 = vmatpush.bf16.msra.mxu0 %v462_v26 }
 0x3d0   : > { %669 = vmatmul.msk.bf16.vlgmr.msrb.gmra.mxu2 %vm269_vm0, %v455_v28  ;;  %672 = vmatmul.msk.bf16.vlgmr.msra.gmra.mxu0 %vm269_vm0, %v529_v27 }
 0x3d1   : > { %560 = vmatpush.bf16.msra.mxu2 %v551_v30 }
 0x44d   : > { %v542_v33 = vpop.f32.mrf.mxu0 }
 0x44e   : > { %v546_v34 = vpack.c.bf16 %v542_v33, %v542_v33 }
 0x450   : > { %673 = vmatmul.msk.bf16.vlgmr.msra.gmra.mxu2 %vm269_vm0, %v546_v34 }
 0x453   : > { %v473_v35 = vpop.f32.mrf.mxu2 }
 0x454   : > { %v477_v36 = vpack.c.bf16 %v473_v35, %v473_v35 }
 0x455   : > { %v544_v37 = vpop.f32.mrf.mxu0 }
 0x456   : > { %670 = vmatmul.msk.bf16.vlgmr.msra.gmra.mxu1 %vm269_vm0, %v477_v36 }
 0x45b   : > { %v475_v38 = vpop.f32.mrf.mxu2 }
 0x4d3   : > { %v493_v40 = vpop.f32.mrf.mxu1  ;;  %v562_v41 = vpop.f32.mrf.mxu2 }
 0x4d4   : > { %v497_v42 = vadd.f32 %v493_v40, %v416_v39 }
 0x4d6   : > { %v566_v44 = vadd.f32 %v562_v41, %v497_v42 }
 0x4d8   : > { %v572_v46 = vmul.f32 %v688_v43, %v566_v44 }
 0x4da   : > { %v573_v47 = vadd.f32 %v572_v46, %v567_v45 }
 0x4db   : > { %v495_v48 = vpop.f32.mrf.mxu1  ;;  %v564_v49 = vpop.f32.mrf.mxu2 }
 0x4dc   : > { %575 = vst.msk [vmem:[%s253_s22] sm:$0xff] %vm574_vm3, %v573_v47 }
 0x4dd PF: > { %s15_s18 = sadd.s32 1, %s711_s18  }
 0x4de   : > { %p12_p4 = scmp.ge.s32.totalorder %s15_s18, 4  }
 0x4e0   :  { %14 = sbr.rel (!%p12_p4) target bundleno = 1 (0x1), region = 76 }

// kernel: decoder_block_forward.9
= control target key start
LH: loop header
LB: loop body
LE: loop exit
PB: predicated region body
PF: predicated region fallthrough
CT: control target
= control target key end

     0   :  { %12 = vsyncpa [#allocation3], 0  ;;  %s2068_s0 = inlined_call_operand.vmem [shape: f32[2,8,32], index: 0, kind: input, shape index: {}]   ;;  %s2069_s1 = inlined_call_operand.vmem [shape: f32[1,32], index: 1, kind: input, shape index: {}]   ;;  %s2070_s2 = inlined_call_operand.vmem [shape: bf16[32,4], index: 2, kind: input, shape index: {}]   ;;  %s2071_s3 = inlined_call_operand.vmem [shape: bf16[4,32,256], index: 3, kind: input, shape index: {}]   ;;  %s2072_s4 = inlined_call_operand.vmem [shape: bf16[4,128,32], index: 4, kind: input, shape index: {}]   ;;  %s2073_s5 = inlined_call_operand.hbm [shape: f32[2,8,32], index: 5, kind: output, shape index: {0}]   ;;  %s2074_s6 = inlined_call_operand.vmem [shape: f32[2,8,4], index: 6, kind: output, shape index: {1}]  }
   0x1   :  { %14 = vsyncpa [#allocation3 + $0x1], 0  ;;  %s1721_s21 = smov 0   ;;  %s1723_s22 = smov 0  }
   0x2   :  { %s1725_s23 = smov 0   ;;  %s1727_s24 = smov 0  }
   0x3 LB: > { %s1742_s25 = sadd.s32 4294967295, %s1674_s24   ;;  %s1179_s26 = sadd.s32 4294967294, %s1674_s24   ;;  %s1674_s24 = sphi %s1727_s24, %s2080_s24   ;;  %s1670_s23 = sphi %s1725_s23, %s2079_s23   ;;  %s1666_s22 = sphi %s1723_s22, %s2078_s22   ;;  %s1662_s21 = sphi %s1721_s21, %s2077_s21  }
   0x4   : > { %s1746_s27 = sadd.s32 1, %s1674_s24   ;;  %s137_s28 = sadd.s32 1, %s1670_s23 }
   0x5   : > { %s134_s29 = ssub.s32 %s1674_s24, %s1746_s27  ;;  %p147_p0 = scmp.ne.s32.totalorder %s1670_s23, %s1666_s22 }
   0x6   : > { %p135_p1 = scmp.eq.s32.totalorder %s134_s29, 0  ;;  %p148_p2 = scmp.eq.s32.totalorder %s1742_s25, 1 }
   0x7   : > { %p153_p3 = scmp.ne.s32.totalorder %s1666_s22, %s1662_s21  ;;  %p154_p4 = scmp.eq.s32.totalorder %s1179_s26, 1 }
   0x8   : > { %s1757_s30 = scalar_select %p135_p1, %s1670_s23, %s137_s28  }
   0x9   : > { %p1759_p5 = por %p148_p2, %p147_p0  ;;  %p1763_p6 = por %p154_p4, %p153_p3 }
   0xa   : > { %p1182_p7 = scmp.ge.s32.totalorder %s1674_s24, 1  ;;  %p217_p8 = scmp.lt.s32.totalorder %s1674_s24, 3 }
   0xc   : > { %p218_p9 = pnand %p1182_p7, %p217_p8 }
   0xd   : > { %p250_p10 = scmp.lt.s32.totalorder (!%p218_p9), %s1742_s25, 1  ;;  %s1678_s16 = smov (!%p218_p9), 2  }
   0xe   : > { %221 = sbr.rel (%p218_p9) target bundleno = 928 (0x3a0), region = 40  ;;  %s1679_s17 = smov (!%p218_p9), 1  }
   0xf   : > { %s1680_s18 = smov (!%p218_p9), 127   ;;  %s1681_s19 = smov (!%p218_p9), 125  }
  0x10   : > { %s1466_s26 = sshll.u32 (!%p218_p9), %s1742_s25, 3 }
  0x11   : > { %s1088_s11 = scalar_lea.hbm (!%p218_p9), %s2073_s5, %s1466_s26 }
  0x12   : > { %s1092_s14 = sshll.u32 (!%p218_p9), %s1088_s11, 4  ;;  %s1093_s14 = int_to_ptr.hbm [resolvable:$true] %s1092_s14 }
  0x13   : > { %s1771_s9 = scalar_select %p250_p10, %s1742_s25, 1  ;;  %vm262_vm0 = vcmask 261120   ;;  %v1676_v3 = vmov 32.0   ;;  %v1211_v7 = vld [vmem:[%s2071_s3 + $0x10] sm:$0xf]  ;;  %v1470_v10 = vld [vmem:[%s2070_s2 + $0x8] sm:$0xff] }
  0x14   : > { %1588 = vrcp.f32 %v1676_v3  ;;  %v1474_v8 = vld [vmem:[%s2071_s3 + $0x14] sm:$0xf0]  ;;  %v1473_v9 = vld [vmem:[%s2071_s3 + $0x14] sm:$0xf]  ;;  %v1213_v12 = vld [vmem:[%s2071_s3 + $0x18] sm:$0xf0]  ;;  %316 = vmatpush.bf16.msra.mxu0 %v1470_v10 }
  0x15   : > { %s1184_s10 = sshll.u32 %s1771_s9, 3  ;;  %v1212_v11 = vor.u32 %v1474_v8, %v1211_v7  ;;  %v1216_v13 = vor.u32 %v1473_v9, %v1213_v12  ;;  %v1203_v15 = vld [vmem:[%s2071_s3] sm:$0xf]  ;;  %v1472_v16 = vld [vmem:[%s2071_s3 + $0x4] sm:$0xf0]  ;;  %v1481_v12 = vld [vmem:[%s2072_s4 + $0x30] sm:$0xff] }
  0x16   : > { %s253_s13 = scalar_lea.vmem %s2068_s0, %s1184_s10  ;;  %v1471_v17 = vld [vmem:[%s2071_s3 + $0x4] sm:$0xf]  ;;  %v1204_v19 = vor.u32 %v1472_v16, %v1203_v15  ;;  %v1205_v20 = vld [vmem:[%s2071_s3 + $0x8] sm:$0xf0]  ;;  %v1266_v24 = vld [vmem:[%s2071_s3 + $0x30] sm:$0xf]  ;;  %s257_s15 = scalar_lea.vmem %s2074_s6, %s1184_s10 }
  0x17   : > { %v1779_v0 = vld [vmem:[%s253_s13] sm:$0xff]  ;;  %471 = vmatpush.bf16.msra.mxu1 %v1212_v11  ;;  %484 = vmatpush.bf16.msra.mxu2 %v1216_v13  ;;  %v1208_v21 = vor.u32 %v1471_v17, %v1205_v20  ;;  %v1486_v25 = vld [vmem:[%s2071_s3 + $0x34] sm:$0xf0]  ;;  %v1485_v26 = vld [vmem:[%s2071_s3 + $0x34] sm:$0xf]  ;;  %vm323_vm5 = vcmask 31744  }
  0x18   : > { %v261_v1 = vmul.f32 %v1779_v0, %v1779_v0  ;;  %v1469_v18 = vld [vmem:[%s2070_s2] sm:$0xff]  ;;  %v1267_v27 = vor.u32 %v1486_v25, %v1266_v24  ;;  %v1268_v28 = vld [vmem:[%s2071_s3 + $0x38] sm:$0xf0]  ;;  %v1484_v30 = vld [vmem:[%s2071_s3 + $0x24] sm:$0xf0]  ;;  %s1682_s9 = smov 126  }
  0x19   : > { %317 = vmatpush.bf16.msra.mxu0 %v1469_v18  ;;  %v1258_v29 = vld [vmem:[%s2071_s3 + $0x20] sm:$0xf]  ;;  %v1271_v32 = vor.u32 %v1485_v26, %v1268_v28  ;;  %v1483_v33 = vld [vmem:[%s2071_s3 + $0x24] sm:$0xf]  ;;  %v1260_v34 = vld [vmem:[%s2071_s3 + $0x28] sm:$0xf0] }
  0x1a   : > { %v263_v2 = vsel %vm262_vm0, %v261_v1, 0.0  ;;  %v1589_v4 = vpop.eup %1588  ;;  %v1259_v36 = vor.u32 %v1484_v30, %v1258_v29  ;;  %v1263_v37 = vor.u32 %v1483_v33, %v1260_v34  ;;  %v1587_v45 = vld [vmem:[%s2069_s1] ss:$0 sm:$0xff]  ;;  %v1337_v48 = vld [vmem:[%s2071_s3 + $0x50] sm:$0xf]  ;;  %v1482_v11 = vld [vmem:[%s2072_s4 + $0x38] sm:$0xff] }
  0x1b   : > { %264 = vadd.xlane.f32.xlu0 %v263_v2  ;;  %v267_v5 = vmul.f32 32.0, %v1589_v4  ;;  %472 = vmatpush.bf16.msra.mxu1 %v1204_v19  ;;  %vm271_vm1 = vweird.f32 %v1589_v4  ;;  %v1498_v49 = vld [vmem:[%s2071_s3 + $0x54] sm:$0xf0]  ;;  %v1497_v50 = vld [vmem:[%s2071_s3 + $0x54] sm:$0xf]  ;;  %v1480_v13 = vld [vmem:[%s2072_s4 + $0x28] sm:$0xff] }
  0x1c   : > { %485 = vmatpush.bf16.msra.mxu2 %v1208_v21  ;;  %v1339_v51 = vld [vmem:[%s2071_s3 + $0x58] sm:$0xf0]  ;;  %v1338_v53 = vor.u32 %v1498_v49, %v1337_v48  ;;  %v1329_v56 = vld [vmem:[%s2071_s3 + $0x40] sm:$0xf]  ;;  %v1496_v57 = vld [vmem:[%s2071_s3 + $0x44] sm:$0xf0]  ;;  %577 = vmatpush.bf16.msra.mxu3 %v1482_v11 }
  0x1d   : > { %v268_v6 = vsub.f32 1.0, %v267_v5  ;;  %628 = vmatpush.bf16.msrb.mxu0 %v1267_v27  ;;  %v1342_v55 = vor.u32 %v1497_v50, %v1339_v51  ;;  %v1495_v58 = vld [vmem:[%s2071_s3 + $0x44] sm:$0xf]  ;;  %v1331_v59 = vld [vmem:[%s2071_s3 + $0x48] sm:$0xf0]  ;;  %v1330_v60 = vor.u32 %v1496_v57, %v1329_v56  ;;  %v1478_v15 = vld [vmem:[%s2072_s4 + $0x18] sm:$0xff] }
  0x1e   : > { %v1334_v61 = vor.u32 %v1495_v58, %v1331_v59  ;;  %v1408_v62 = vld [vmem:[%s2071_s3 + $0x70] sm:$0xf]  ;;  %v1510_v63 = vld [vmem:[%s2071_s3 + $0x74] sm:$0xf0]  ;;  %v1509_v1 = vld [vmem:[%s2071_s3 + $0x74] sm:$0xf] }
  0x1f   : > { %v269_v14 = vmul.f32 %v1589_v4, %v268_v6  ;;  %641 = vmatpush.bf16.msrb.mxu1 %v1271_v32  ;;  %v1410_v2 = vld [vmem:[%s2071_s3 + $0x78] sm:$0xf0]  ;;  %v1409_v3 = vor.u32 %v1510_v63, %v1408_v62  ;;  %v1400_v5 = vld [vmem:[%s2071_s3 + $0x60] sm:$0xf]  ;;  %v1508_v6 = vld [vmem:[%s2071_s3 + $0x64] sm:$0xf0] }
  0x20   : > { %v1507_v7 = vld [vmem:[%s2071_s3 + $0x64] sm:$0xf]  ;;  %v1402_v8 = vld [vmem:[%s2071_s3 + $0x68] sm:$0xf0]  ;;  %v1401_v9 = vor.u32 %v1508_v6, %v1400_v5  ;;  %578 = vmatpush.bf16.msra.mxu3 %v1481_v12  ;;  %v1494_v16 = vld [vmem:[%s2072_s4 + $0x78] sm:$0xff]  ;;  %s241_s10 = sand.u32 1, %s1666_s22  }
  0x21   : > { %v270_v22 = vadd.f32 %v1589_v4, %v269_v14  ;;  %629 = vmatpush.bf16.msrb.mxu0 %v1259_v36  ;;  %v1405_v10 = vor.u32 %v1507_v7, %v1402_v8  ;;  %v1479_v14 = vld [vmem:[%s2072_s4 + $0x20] sm:$0xff]  ;;  %735 = vmatpush.bf16.msrb.mxu2 %v1494_v16  ;;  %v1477_v17 = vld [vmem:[%s2072_s4 + $0x10] sm:$0xff]  ;;  %v1476_v19 = vld [vmem:[%s2072_s4 + $0x8] sm:$0xff]  ;;  %s1183_s20 = sshll.u32 %s241_s10, 3  ;;  %s1074_s25 = scalar_lea.sflag [#allocation3], %s241_s10 }
  0x22   : > { %v1493_v18 = vld [vmem:[%s2072_s4 + $0x70] sm:$0xff]  ;;  %v1492_v20 = vld [vmem:[%s2072_s4 + $0x68] sm:$0xff]  ;;  %v1475_v21 = vld [vmem:[%s2072_s4] sm:$0xff]  ;;  %s243_s12 = scalar_lea.vmem [#allocation2], %s1183_s20 }
  0x23   : > { %v272_v23 = vsel %vm271_vm1, %v1589_v4, %v270_v22  ;;  %642 = vmatpush.bf16.msrb.mxu1 %v1263_v37  ;;  %v1413_v4 = vor.u32 %v1509_v1, %v1410_v2  ;;  %v1491_v22 = vld [vmem:[%s2072_s4 + $0x60] sm:$0xff]  ;;  %v1490_v27 = vld [vmem:[%s2072_s4 + $0x58] sm:$0xff]  ;;  %v1489_v30 = vld [vmem:[%s2072_s4 + $0x50] sm:$0xff]  ;;  %s1090_s13 = sshll.u32 %s243_s12, 4  ;;  %s1091_s13 = int_to_ptr.vmem [resolvable:$true] %s1090_s13 }
  0x24   : > { %579 = vmatpush.bf16.msra.mxu3 %v1480_v13  ;;  %v1506_v28 = vld [vmem:[%s2072_s4 + $0xb8] sm:$0xff]  ;;  %v1488_v36 = vld [vmem:[%s2072_s4 + $0x48] sm:$0xff]  ;;  %v1513_v16 = vld [vmem:[%s2072_s4 + $0xd0] sm:$0xff] }
  0x25   : > { %736 = vmatpush.bf16.msrb.mxu2 %v1493_v18  ;;  %v1504_v37 = vld [vmem:[%s2072_s4 + $0xa8] sm:$0xff]  ;;  %v1514_v11 = vld [vmem:[%s2072_s4 + $0xd8] sm:$0xff] }
  0x26   : > { %v1516_v62 = vld [vmem:[%s2072_s4 + $0xe8] sm:$0xff] }
  0x28   : > { %580 = vmatpush.bf16.msra.mxu3 %v1479_v14 }
  0x29   : > { %737 = vmatpush.bf16.msrb.mxu2 %v1492_v20 }
  0x2c   : > { %581 = vmatpush.bf16.msra.mxu3 %v1478_v15 }
  0x2d   : > { %738 = vmatpush.bf16.msrb.mxu2 %v1491_v22 }
  0x30   : > { %582 = vmatpush.bf16.msra.mxu3 %v1477_v17 }
  0x31   : > { %739 = vmatpush.bf16.msrb.mxu2 %v1490_v27 }
  0x34   : > { %583 = vmatpush.bf16.msra.mxu3 %v1476_v19 }
  0x35   : > { %740 = vmatpush.bf16.msrb.mxu2 %v1489_v30 }
  0x38   : > { %584 = vmatpush.bf16.msra.mxu3 %v1475_v21 }
  0x39   : > { %741 = vmatpush.bf16.msrb.mxu2 %v1488_v36 }
  0x3c   : > { %893 = vmatpush.bf16.msrb.mxu3 %v1506_v28 }
  0x8e   : > { %v265_v31 = vpop.xlane.xlu0 %264 }
  0x8f   : > { %v273_v35 = vmul.f32 %v272_v23, %v265_v31  ;;  %v1505_v31 = vld [vmem:[%s2072_s4 + $0xb0] sm:$0xff] }
  0x90   : > { %894 = vmatpush.bf16.msrb.mxu3 %v1505_v31 }
  0x91   : > { %v274_v38 = vadd.f32 1e-06, %v273_v35 }
  0x93   : > { %1590 = vrsqrt.f32 %v274_v38  ;;  %vm281_vm3 = vweird.f32 %v274_v38 }
  0x94   : > { %895 = vmatpush.bf16.msrb.mxu3 %v1504_v37 }
  0x99   : > { %v1591_v39 = vpop.eup %1590 }
  0x9a   : > { %v276_v40 = vmul.f32 %v1591_v39, %v274_v38  ;;  %vm282_vm2 = vweird.f32 %v1591_v39 }
  0x9b   : > { %vm283_vm4 = vmor %vm281_vm3, %vm282_vm2 }
  0x9c   : > { %v277_v41 = vmul.f32 %v1591_v39, %v276_v40  ;;  %v1503_v40 = vld [vmem:[%s2072_s4 + $0xa0] sm:$0xff] }
  0x9d   : > { %896 = vmatpush.bf16.msrb.mxu3 %v1503_v40 }
  0x9e   : > { %v278_v42 = vmul.f32 0.5, %v277_v41 }
  0xa0   : > { %v279_v43 = vsub.f32 1.5, %v278_v42 }
  0xa2   : > { %v280_v44 = vmul.f32 %v1591_v39, %v279_v43 }
  0xa4   : > { %v284_v46 = vsel %vm283_vm4, %v1591_v39, %v280_v44  ;;  %v1487_v39 = vld [vmem:[%s2072_s4 + $0x40] sm:$0xff] }
  0xa5   : > { %v285_v47 = vmul.f32 %v284_v46, %v1779_v0  ;;  %742 = vmatpush.bf16.msrb.mxu2 %v1487_v39  ;;  %v1502_v46 = vld [vmem:[%s2072_s4 + $0x98] sm:$0xff] }
  0xa6   : > { %897 = vmatpush.bf16.msrb.mxu3 %v1502_v46 }
  0xa7   : > { %v289_v52 = vmul.f32 %v1587_v45, %v285_v47  ;;  %v1518_v47 = vld [vmem:[%s2072_s4 + $0xf8] sm:$0xff] }
  0xa9   : > { %v290_v54 = vpack.c.bf16 %v289_v52, %v289_v52  ;;  %v1501_v52 = vld [vmem:[%s2072_s4 + $0x90] sm:$0xff] }
  0xaa   : > { %898 = vmatpush.bf16.msrb.mxu3 %v1501_v52 }
  0xab   : > { %1194 = vmatmul.msk.bf16.vlgmr.msra.gmra.mxu0 %vm262_vm0, %v290_v54  ;;  %1217 = vmatmul.msk.bf16.vlgmr.msra.gmra.mxu1 %vm262_vm0, %v290_v54 }
  0xac   : > { %1218 = vmatmul.msk.bf16.vlgmr.msra.gmra.mxu2 %vm262_vm0, %v290_v54  ;;  %786 = vmatpush.bf16.msra.mxu0 %v1338_v53  ;;  %v1517_v53 = vld [vmem:[%s2072_s4 + $0xf0] sm:$0xff] }
  0xad   : > { %799 = vmatpush.bf16.msra.mxu1 %v1342_v55  ;;  %1051 = vmatpush.bf16.msra.mxu2 %v1518_v47 }
  0xb0   : > { %787 = vmatpush.bf16.msra.mxu0 %v1330_v60 }
  0xb1   : > { %800 = vmatpush.bf16.msra.mxu1 %v1334_v61  ;;  %1052 = vmatpush.bf16.msra.mxu2 %v1517_v53  ;;  %v1500_v61 = vld [vmem:[%s2072_s4 + $0x88] sm:$0xff] }
  0xb2   : > { %899 = vmatpush.bf16.msrb.mxu3 %v1500_v61 }
  0xb5   : > { %1053 = vmatpush.bf16.msra.mxu2 %v1516_v62 }
  0xbb   : > { %1272 = vmatmul.msk.bf16.vlgmr.msrb.gmra.mxu0 %vm262_vm0, %v290_v54  ;;  %1273 = vmatmul.msk.bf16.vlgmr.msrb.gmra.mxu1 %vm262_vm0, %v290_v54 }
  0xbc   : > { %944 = vmatpush.bf16.msrb.mxu0 %v1409_v3  ;;  %957 = vmatpush.bf16.msrb.mxu1 %v1413_v4  ;;  %v1499_v3 = vld [vmem:[%s2072_s4 + $0x80] sm:$0xff] }
  0xbd   : > { %v1515_v4 = vld [vmem:[%s2072_s4 + $0xe0] sm:$0xff]  ;;  %900 = vmatpush.bf16.msrb.mxu3 %v1499_v3 }
  0xbe   : > { %1054 = vmatpush.bf16.msra.mxu2 %v1515_v4 }
  0xc0   : > { %945 = vmatpush.bf16.msrb.mxu0 %v1401_v9  ;;  %958 = vmatpush.bf16.msrb.mxu1 %v1405_v10 }
  0xc2   : > { %1055 = vmatpush.bf16.msra.mxu2 %v1514_v11 }
  0xc6   : > { %1056 = vmatpush.bf16.msra.mxu2 %v1513_v16 }
  0xcb   : > { %1343 = vmatmul.msk.bf16.vlgmr.msra.gmra.mxu0 %vm262_vm0, %v290_v54  ;;  %1344 = vmatmul.msk.bf16.vlgmr.msra.gmra.mxu1 %vm262_vm0, %v290_v54 }
  0xdb   : > { %1414 = vmatmul.msk.bf16.vlgmr.msrb.gmra.mxu0 %vm262_vm0, %v290_v54  ;;  %1415 = vmatmul.msk.bf16.vlgmr.msrb.gmra.mxu1 %vm262_vm0, %v290_v54 }
 0x128   : > { %v1940_v23 = vpop.f32.mrf.mxu0  ;;  %v1942_v24 = vpop.f32.mrf.mxu1 }
 0x129   : > { %v1219_v25 = vmul.f32 -1.442695, %v1942_v24  ;;  %v325_v26 = vsel %vm323_vm5, %v1940_v23, -inf  ;;  %324 = vst.msk [vmem:[%s257_s15] sm:$0xff] %vm323_vm5, %v1940_v23  ;;  %s1677_s15 = smov 3  }
 0x12a   : > { %326 = vmax.xlane.f32.xlu0 %v325_v26 }
 0x12b   : > { %1592 = vpow2.f32 %v1219_v25  ;;  %v1512_v25 = vld [vmem:[%s2072_s4 + $0xc8] sm:$0xff] }
 0x12c   : > { %1057 = vmatpush.bf16.msra.mxu2 %v1512_v25 }
 0x12f   : > { %v487_v29 = vpop.f32.mrf.mxu2 }
 0x130   : > { %v321_v32 = vpop.f32.mrf.mxu0  ;;  %v476_v33 = vpop.f32.mrf.mxu1 }
 0x131   : > { %v1593_v34 = vpop.eup %1592 }
 0x132   : > { %v494_v35 = vadd.f32 1.0, %v1593_v34 }
 0x134   : > { %1594 = vrcp.f32 %v494_v35  ;;  %v506_v49 = vand.u32 2147483648, %v494_v35  ;;  %v504_v51 = vand.u32 2147483647, %v494_v35  ;;  %vm500_vm7 = vweird.f32 %v494_v35 }
 0x136   : > { %v507_v58 = vor.u32 1.1754944e-38, %v506_v49  ;;  %vm505_vm9 = vcmp.eq.f32.partialorder %v504_v51, 8.507059e+37 }
 0x137   : > { %v489_v38 = vpop.f32.mrf.mxu2 }
 0x138   : > { %v1973_v41 = vpop.f32.mrf.mxu0  ;;  %v1975_v42 = vpop.f32.mrf.mxu1 }
 0x139   : > { %v1274_v43 = vmul.f32 -1.442695, %v1973_v41 }
 0x13a   : > { %v1595_v44 = vpop.eup %1594 }
 0x13b   : > { %v496_v45 = vmul.f32 %v1595_v44, %v494_v35  ;;  %1596 = vpow2.f32 %v1274_v43  ;;  %vm501_vm6 = vweird.f32 %v1595_v44 }
 0x13c   : > { %vm502_vm8 = vmor %vm500_vm7, %vm501_vm6 }
 0x13d   : > { %v497_v48 = vsub.f32 1.0, %v496_v45 }
 0x13f   : > { %v498_v50 = vmul.f32 %v1595_v44, %v497_v48 }
 0x140   : > { %v633_v54 = vpop.f32.mrf.mxu0  ;;  %v646_v55 = vpop.f32.mrf.mxu1 }
 0x141   : > { %v1597_v56 = vpop.eup %1596  ;;  %v499_v57 = vadd.f32 %v1595_v44, %v498_v50 }
 0x142   : > { %v651_v59 = vadd.f32 1.0, %v1597_v56 }
 0x143   : > { %v503_v60 = vsel %vm502_vm8, %v1595_v44, %v499_v57 }
 0x144   : > { %v508_v63 = vsel %vm505_vm9, %v507_v58, %v503_v60  ;;  %1598 = vrcp.f32 %v651_v59  ;;  %v663_v13 = vand.u32 2147483648, %v651_v59  ;;  %v661_v15 = vand.u32 2147483647, %v651_v59 }
 0x145   : > { %v510_v1 = vmul.f32 %v508_v63, %v1942_v24  ;;  %vm657_vm11 = vweird.f32 %v651_v59 }
 0x146   : > { %v664_v21 = vor.u32 1.1754944e-38, %v663_v13  ;;  %vm662_vm13 = vcmp.eq.f32.partialorder %v661_v15, 8.507059e+37 }
 0x147   : > { %v511_v2 = vmul.f32 %v510_v1, %v487_v29  ;;  %v1511_v29 = vld [vmem:[%s2072_s4 + $0xc0] sm:$0xff] }
 0x148   : > { %v789_v5 = vpop.f32.mrf.mxu0  ;;  %v802_v6 = vpop.f32.mrf.mxu1  ;;  %1058 = vmatpush.bf16.msra.mxu2 %v1511_v29 }
 0x149   : > { %v512_v7 = vpack.c.bf16 %v511_v2, %v511_v2  ;;  %v1345_v8 = vmul.f32 -1.442695, %v789_v5 }
 0x14a   : > { %v1599_v9 = vpop.eup %1598 }
 0x14b   : > { %v653_v10 = vmul.f32 %v1599_v9, %v651_v59  ;;  %1600 = vpow2.f32 %v1345_v8  ;;  %585 = vmatmul.bf16.vlgmr.msra.gmra.mxu3 %v512_v7  ;;  %vm658_vm10 = vweird.f32 %v1599_v9 }
 0x14c   : > { %vm659_vm12 = vmor %vm657_vm11, %vm658_vm10 }
 0x14d   : > { %v654_v12 = vsub.f32 1.0, %v653_v10 }
 0x14f   : > { %v655_v14 = vmul.f32 %v1599_v9, %v654_v12 }
 0x150   : > { %v791_v17 = vpop.f32.mrf.mxu0  ;;  %v804_v18 = vpop.f32.mrf.mxu1 }
 0x151   : > { %v1601_v19 = vpop.eup %1600  ;;  %v656_v20 = vadd.f32 %v1599_v9, %v655_v14 }
 0x152   : > { %v809_v22 = vadd.f32 1.0, %v1601_v19 }
 0x153   : > { %v660_v24 = vsel %vm659_vm12, %v1599_v9, %v656_v20 }
 0x154   : > { %v665_v26 = vsel %vm662_vm13, %v664_v21, %v660_v24  ;;  %1602 = vrcp.f32 %v809_v22  ;;  %v821_v37 = vand.u32 2147483648, %v809_v22  ;;  %v819_v39 = vand.u32 2147483647, %v809_v22 }
 0x155   : > { %v667_v27 = vmul.f32 %v665_v26, %v1973_v41  ;;  %vm815_vm15 = vweird.f32 %v809_v22 }
 0x156   : > { %v822_v44 = vor.u32 1.1754944e-38, %v821_v37  ;;  %vm820_vm2 = vcmp.eq.f32.partialorder %v819_v39, 8.507059e+37 }
 0x157   : > { %v668_v28 = vmul.f32 %v667_v27, %v1975_v42 }
 0x158   : > { %v947_v30 = vpop.f32.mrf.mxu0  ;;  %v960_v31 = vpop.f32.mrf.mxu1 }
 0x159   : > { %v669_v32 = vpack.c.bf16 %v668_v28, %v668_v28  ;;  %v1416_v33 = vmul.f32 -1.442695, %v947_v30  ;;  %v1683_v28 = vmov 0.0  }
 0x15a   : > { %v1603_v34 = vpop.eup %1602 }
 0x15b   : > { %v811_v35 = vmul.f32 %v1603_v34, %v809_v22  ;;  %1604 = vpow2.f32 %v1416_v33  ;;  %743 = vmatmul.bf16.vlgmr.msrb.gmra.mxu2 %v669_v32  ;;  %vm816_vm14 = vweird.f32 %v1603_v34 }
 0x15c   : > { %vm817_vm1 = vmor %vm815_vm15, %vm816_vm14 }
 0x15d   : > { %v812_v36 = vsub.f32 1.0, %v811_v35 }
 0x15f   : > { %v813_v38 = vmul.f32 %v1603_v34, %v812_v36 }
 0x160   : > { %v949_v40 = vpop.f32.mrf.mxu0  ;;  %v962_v41 = vpop.f32.mrf.mxu1 }
 0x161   : > { %v1605_v42 = vpop.eup %1604  ;;  %v814_v43 = vadd.f32 %v1603_v34, %v813_v38  ;;  %v1684_v40 = vmov 1   ;;  %v1685_v41 = vmov 0  }
 0x162   : > { %v967_v45 = vadd.f32 1.0, %v1605_v42  ;;  %1583 = vset.pattern.permute.xlu0 %v1684_v40  ;;  %1585 = vset.pattern.permute.xlu1 %v1685_v41 }
 0x163   : > { %v818_v46 = vsel %vm817_vm1, %v1603_v34, %v814_v43  ;;  %1584 = vset.pattern.permute.xlu2 %v1685_v41 }
 0x164   : > { %v823_v47 = vsel %vm820_vm2, %v822_v44, %v818_v46  ;;  %1606 = vrcp.f32 %v967_v45  ;;  %v979_v54 = vand.u32 2147483648, %v967_v45  ;;  %v977_v56 = vand.u32 2147483647, %v967_v45 }
 0x165   : > { %v825_v48 = vmul.f32 %v823_v47, %v789_v5  ;;  %vm973_vm4 = vweird.f32 %v967_v45 }
 0x166   : > { %v980_v58 = vor.u32 1.1754944e-38, %v979_v54  ;;  %vm978_vm7 = vcmp.eq.f32.partialorder %v977_v56, 8.507059e+37 }
 0x167   : > { %v826_v49 = vmul.f32 %v825_v48, %v802_v6 }
 0x169   : > { %v827_v50 = vpack.c.bf16 %v826_v49, %v826_v49 }
 0x16a   : > { %v1607_v51 = vpop.eup %1606 }
 0x16b   : > { %v969_v52 = vmul.f32 %v1607_v51, %v967_v45  ;;  %901 = vmatmul.bf16.vlgmr.msrb.gmra.mxu3 %v827_v50  ;;  %vm974_vm3 = vweird.f32 %v1607_v51 }
 0x16c   : > { %vm975_vm6 = vmor %vm973_vm4, %vm974_vm3 }
 0x16d   : > { %v970_v53 = vsub.f32 1.0, %v969_v52 }
 0x16f   : > { %v971_v55 = vmul.f32 %v1607_v51, %v970_v53 }
 0x171   : > { %v972_v57 = vadd.f32 %v1607_v51, %v971_v55 }
 0x173   : > { %v976_v59 = vsel %vm975_vm6, %v1607_v51, %v972_v57 }
 0x174   : > { %v981_v60 = vsel %vm978_vm7, %v980_v58, %v976_v59 }
 0x175   : > { %v983_v61 = vmul.f32 %v981_v60, %v947_v30 }
 0x177   : > { %v984_v62 = vmul.f32 %v983_v61, %v960_v31 }
 0x179   : > { %v985_v63 = vpack.c.bf16 %v984_v62, %v984_v62 }
 0x17b   : > { %1059 = vmatmul.bf16.vlgmr.msra.gmra.mxu2 %v985_v63 }
 0x19d   : > { %v327_v1 = vpop.xlane.xlu0 %326 }
 0x19e   : > { %v328_v2 = vsub.f32 %v1940_v23, %v327_v1 }
 0x1a0   : > { %v329_v3 = vmul.f32 1.442695, %v328_v2 }
 0x1a2   : > { %1608 = vpow2.f32 %v329_v3 }
 0x1a8   : > { %v1609_v4 = vpop.eup %1608 }
 0x1a9   : > { %v331_v5 = vsel %vm323_vm5, %v1609_v4, 0.0 }
 0x1aa   : > { %332 = vadd.xlane.f32.xlu1 %v331_v5 }
 0x1ce   : > { %v2019_v6 = vpop.f32.mrf.mxu3 }
 0x1d6   : > { %v588_v7 = vpop.f32.mrf.mxu3 }
 0x1de   : > { %v2021_v8 = vpop.f32.mrf.mxu2 }
 0x1e6   : > { %v746_v9 = vpop.f32.mrf.mxu2 }
 0x1ee   : > { %v2023_v10 = vpop.f32.mrf.mxu3 }
 0x1f6   : > { %v904_v11 = vpop.f32.mrf.mxu3 }
 0x1fe   : > { %v2025_v12 = vpop.f32.mrf.mxu2 }
 0x206   : > { %v1062_v13 = vpop.f32.mrf.mxu2 }
 0x21d   : > { %v333_v14 = vpop.xlane.xlu1 %332 }
 0x21e   : > { %1610 = vrcp.f32 %v333_v14  ;;  %v345_v17 = vand.u32 2147483648, %v333_v14  ;;  %v343_v19 = vand.u32 2147483647, %v333_v14  ;;  %vm339_vm8 = vweird.f32 %v333_v14 }
 0x220   : > { %v346_v21 = vor.u32 1.1754944e-38, %v345_v17  ;;  %vm344_vm10 = vcmp.eq.f32.partialorder %v343_v19, 8.507059e+37 }
 0x224   : > { %v1611_v23 = vpop.eup %1610 }
 0x225   : > { %v335_v15 = vmul.f32 %v1611_v23, %v333_v14  ;;  %vm340_vm5 = vweird.f32 %v1611_v23 }
 0x226   : > { %vm341_vm9 = vmor %vm339_vm8, %vm340_vm5 }
 0x227   : > { %v336_v16 = vsub.f32 1.0, %v335_v15 }
 0x229   : > { %v337_v18 = vmul.f32 %v1611_v23, %v336_v16 }
 0x22b   : > { %v338_v20 = vadd.f32 %v1611_v23, %v337_v18 }
 0x22d   : > { %v342_v22 = vsel %vm341_vm9, %v1611_v23, %v338_v20 }
 0x22e   : > { %v347_v24 = vsel %vm344_vm10, %v346_v21, %v342_v22 }
 0x22f   : > { %v348_v25 = vmul.f32 %v1609_v4, %v347_v24 }
 0x231   : > { %368 = vrot.lane.b32.xlu0 %v348_v25, %s1677_s15  ;;  %357 = vrot.lane.b32.xlu2 %v348_v25, %s1678_s16  ;;  %s1626_s15 = sshra.s32 %s1093_s14, 4  ;;  %s1627_s15 = int_to_ptr.hbm [resolvable:$true] %s1626_s15 }
 0x232   : > { %350 = vrot.lane.b32.xlu1 %v348_v25, %s1679_s17  ;;  %s1628_s16 = scalar_lea.hbm %s1627_s15, 8  ;;  %p1633_p0 = scmp.lt.s32.totalorder %s1627_s15, %s2073_s5 }
 0x233   : > { %p1629_p11 = scmp.ne.s32.totalorder %s1627_s15, %s1628_s16 }
 0x235   : > { %p1630_p12 = pnand %p1629_p11, %p1759_p5 }
 0x237   : > { %p1631_p13 = pneg %p1630_p12 }
 0x239   : > { %381 = vrot.lane.b32.xlu2 %v348_v25, %s1680_s18 }
 0x23a   : > { %421 = vrot.lane.b32.xlu1 %v348_v25, %s1681_s19 }
 0x241   : > { %401 = vrot.lane.b32.xlu2 %v348_v25, %s1682_s9 }
 0x28b   : > { %v358_v26 = vpop.permute.xlu2 %357 }
 0x28c   : > { %vm360_vm14 = vcmp.gt.f32.partialorder %v348_v25, %v358_v26 }
 0x28d   : > { %v1196_v33 = vsel %vm360_vm14, 1.0, %v1683_v28 }
 0x293   : > { %v382_v27 = vpop.permute.xlu2 %381 }
 0x294   : > { %vm384_vm11 = vcmp.gt.f32.partialorder %v348_v25, %v382_v27  ;;  %vm385_vm12 = vcmp.eq.f32.partialorder %v348_v25, %v382_v27 }
 0x295   : > { %vm386_vm13 = vmor %vm384_vm11, %vm385_vm12 }
 0x296   : > { %v1198_v29 = vsel %vm386_vm13, 1.0, %v1683_v28 }
 0x297   : > { %435 = vrot.lane.b32.xlu1 %v1198_v29, %s1682_s9  ;;  %v1578_v38 = vpack.i.bf16 %v1198_v29, %v1196_v33 }
 0x29b   : > { %v402_v37 = vpop.permute.xlu2 %401 }
 0x29c   : > { %vm404_vm2 = vcmp.gt.f32.partialorder %v348_v25, %v402_v37  ;;  %vm405_vm3 = vcmp.eq.f32.partialorder %v348_v25, %v402_v37 }
 0x29d   : > { %vm406_vm4 = vmor %vm404_vm2, %vm405_vm3 }
 0x29e   : > { %v1199_v39 = vsel %vm406_vm4, 1.0, %v1683_v28 }
 0x2a3   : > { %v369_v30 = vpop.permute.xlu0 %368 }
 0x2a4   : > { %vm371_vm15 = vcmp.gt.f32.partialorder %v348_v25, %v369_v30  ;;  %v351_v31 = vpop.permute.xlu1 %350 }
 0x2a5   : > { %v1197_v32 = vsel %vm371_vm15, 1.0, %v1683_v28  ;;  %vm353_vm1 = vcmp.gt.f32.partialorder %v348_v25, %v351_v31 }
 0x2a6   : > { %v1195_v34 = vsel %vm353_vm1, 1.0, %v1683_v28 }
 0x2a7   : > { %v1573_v35 = vpack.i.bf16 %v1195_v34, %v1196_v33  ;;  %v1568_v36 = vpack.i.bf16 %v1197_v32, %v1195_v34 }
 0x2a9   : > { %1574 = vrot.lane.b32.xlu0 %v1573_v35, %s1681_s19  ;;  %1569 = vrot.lane.b32.xlu2 %v1568_v36, %s1682_s9  ;;  %s1632_s19 = scalar_lea.hbm %s2073_s5, 16 }
 0x2aa   : > { %p1634_p1 = scmp.lt.s32.totalorder %s1632_s19, %s1628_s16 }
 0x2ac   : > { %v422_v49 = vpop.permute.xlu1 %421  ;;  %p1635_p2 = por %p1634_p1, %p1633_p0 }
 0x2ad   : > { %vm424_vm7 = vcmp.gt.f32.partialorder %v348_v25, %v422_v49  ;;  %vm425_vm5 = vcmp.eq.f32.partialorder %v348_v25, %v422_v49 }
 0x2ae   : > { %vm426_vm8 = vmor %vm424_vm7, %vm425_vm5  ;;  %p1636_p3 = pnand %p1635_p2, %p1631_p13 }
 0x2af   : > { %v1200_v58 = vsel %vm426_vm8, 1.0, %v1683_v28 }
 0x2b1   : > { %1579 = vrot.lane.b32.xlu2 %v1578_v38, %s1680_s18 }
 0x2b9   : > { %431 = vrot.lane.b32.xlu2 %v1199_v39, %s1680_s18 }
 0x303   : > { %v1570_v42 = vpop.permute.xlu2 %1569 }
 0x304   : > { %v1572_v45 = vunpack.i.h.bf16 %v1570_v42  ;;  %v1571_v50 = vunpack.i.l.bf16 %v1570_v42 }
 0x306   : > { %v394_v54 = vadd.f32 %v1571_v50, %v1198_v29 }
 0x309   : > { %v436_v62 = vpop.permute.xlu1 %435 }
 0x30b   : > { %v1580_v43 = vpop.permute.xlu2 %1579 }
 0x30c   : > { %v1581_v44 = vunpack.i.l.bf16 %v1580_v43  ;;  %v1582_v51 = vunpack.i.h.bf16 %v1580_v43 }
 0x30e   : > { %v367_v46 = vadd.f32 %v1581_v44, %v1195_v34  ;;  %v414_v55 = vadd.f32 %v1582_v51, %v1199_v39 }
 0x310   : > { %v378_v47 = vadd.f32 %v1572_v45, %v367_v46 }
 0x312   : > { %vm379_vm6 = vcmp.lt.f32.partialorder %v378_v47, 2.0 }
 0x313   : > { %v380_v48 = vsel %vm379_vm6, %v351_v31, 0.0  ;;  %v432_v52 = vpop.permute.xlu2 %431 }
 0x314   : > { %592 = vperm.xlu0 %1583, %v380_v48   ;;  %v434_v59 = vadd.f32 %v1200_v58, %v432_v52 }
 0x316   : > { %v438_v2 = vadd.f32 %v436_v62, %v434_v59 }
 0x318   : > { %vm439_vm11 = vcmp.lt.f32.partialorder %v438_v2, 2.0 }
 0x319   : > { %v440_v3 = vsel %vm439_vm11, %v422_v49, 0.0 }
 0x31b   : > { %v1575_v53 = vpop.permute.xlu0 %1574 }
 0x31c   : > { %v1577_v56 = vunpack.i.h.bf16 %v1575_v53  ;;  %v1576_v57 = vunpack.i.l.bf16 %v1575_v53  ;;  %1586 = vset.pattern.permute.xlu0 %v1685_v41 }
 0x31e   : > { %v418_v60 = vadd.f32 %v1577_v56, %v414_v55  ;;  %v398_v61 = vadd.f32 %v1576_v57, %v394_v54 }
 0x320   : > { %vm419_vm9 = vcmp.lt.f32.partialorder %v418_v60, 2.0  ;;  %vm399_vm10 = vcmp.lt.f32.partialorder %v398_v61, 2.0 }
 0x321   : > { %v420_v63 = vsel %vm419_vm9, %v402_v37, 0.0  ;;  %v400_v1 = vsel %vm399_vm10, %v382_v27, 0.0 }
 0x322   : > { %908 = vperm.xlu1 %1585, %v420_v63   ;;  %750 = vperm.xlu2 %1584, %v400_v1  }
 0x32a   : > { %1066 = vperm.xlu2 %1584, %v440_v3  }
 0x37c   : > { %v751_v4 = vpop.permute.xlu2 %750 }
 0x37d   : > { %v753_v9 = vmul.f32 %v751_v4, %v2021_v8 }
 0x384   : > { %v1067_v11 = vpop.permute.xlu2 %1066 }
 0x385   : > { %v1069_v15 = vmul.f32 %v1067_v11, %v2025_v12 }
 0x386   : > { %v593_v5 = vpop.permute.xlu0 %592 }
 0x387   : > { %v595_v7 = vmul.f32 %v593_v5, %v2019_v6 }
 0x389   : > { %v754_v14 = vadd.f32 %v753_v9, %v595_v7 }
 0x394   : > { %v909_v13 = vpop.permute.xlu1 %908 }
 0x395   : > { %v911_v23 = vmul.f32 %v909_v13, %v2023_v10 }
 0x397   : > { %v912_v16 = vadd.f32 %v911_v23, %v754_v14 }
 0x399   : > { %v1070_v6 = vadd.f32 %v1069_v15, %v912_v16 }
 0x39b   : > { %v1071_v17 = vadd.f32 %v1070_v6, %v1779_v0 }
 0x39d   : > { %1072 = vst.msk [vmem:[%s243_s12] sm:$0xff] %vm262_vm0, %v1071_v17 }
 0x39e   : > { %1639 = shalt.err (!%p1636_p3)
}
 0x39f   : > { %1519 = dma.vmem_to_hbm [thread:$0]  (%p1759_p5), %s1091_s13, 128, %s1093_s14, %s1074_s25  }
 0x3a0 PF: > { %p1525_p4 = scmp.ge.s32.totalorder %s1674_s24, 2  ;;  %s1107_s10 = sand.u32 1, %s1662_s21  }
 0x3a1   : > { %s1108_s26 = scalar_lea.sflag [#allocation3], %s1107_s10 }
 0x3a2   : > { %p1522_p7 = pnand %p1525_p4, %p1763_p6 }
 0x3a4   : > { %p1523_p8 = pneg %p1522_p7 }
 0x3a6   : > { %1657 = dma.done.wait (%p1523_p8), %s1108_s26, 128  }
 0x3a7   : > { %1659 = vsyncadd (%p1523_p8), %s1108_s26, 4294967168  ;;  %p17_p9 = scmp.ge.s32.totalorder %s1746_s27, 4   ;;  %s2077_s21 = smov %s1666_s22 }
 0x3a8   : > { %s2078_s22 = smov %s1670_s23  ;;  %s2079_s23 = smov %s1757_s30 }
 0x3a9   : > { %s2080_s24 = smov %s1746_s27  ;;  %19 = sbr.rel (!%p17_p9) target bundleno = 3 (0x3), region = 93 }
 0x3ae   :  { %1121 = vsyncpa [#allocation3], 1 }
 0x3af   :  { %1123 = vsyncpa [#allocation3 + $0x1], 1 }

</bundles_post_ra>
